<compile_context>
chip_gen: v7x
topology: tpu7x:2x2x1
jax: 0.10.0
libtpu: 0.0.40
codegen_flags: <defaults>
</compile_context>

<pallas_src>
import math
import functools

import jax
import jax.numpy as jnp
from jax import lax
from jax.experimental import pallas as pl
from jax.experimental.pallas import tpu as pltpu


# ------------------------------ config ---------------------------------------
BATCH = 2
SEQ = 8
D_EMBED = 32
NUM_HEADS = 4
D_FF = 64
N_ENCODER = 2
VOCAB = 50
MAX_SEQ_LEN = 16
LN_EPS = 1e-5

# q @ k^T expressed as a dot_general contracting the last dims of both operands
# (no explicit transpose / XLU relayout).
_NT_DIMS = (((1,), (1,)), ((), ()))


# ------------------------------ kernel ----------------------------------------
def _layer_norm(x, gamma, beta, eps=LN_EPS):
    mean = jnp.mean(x, axis=-1, keepdims=True)
    var = jnp.mean((x - mean) ** 2, axis=-1, keepdims=True)
    return (x - mean) * lax.rsqrt(var + eps) * gamma + beta


def fused_encoder_kernel(tok_ref,                       # (B*S,) int32 in SMEM
                         tok_emb_ref, pos_ref,          # (V,1,D), (MAX_SEQ,D) VMEM
                         ln1_g_ref, ln1_b_ref,
                         wqkv_ref, bqkv_ref, wo_ref, bo_ref,
                         ln2_g_ref, ln2_b_ref,
                         w1_ref, b1_ref, w2_ref, b2_ref,
                         nrm_g_ref, nrm_b_ref,
                         o_ref,                          # (B*S, D) output
                         x_scr,                          # (B*S, D) VMEM scratch
                         *, batch, seq, num_heads, num_layers):
    BS = batch * seq
    D = o_ref.shape[-1]
    d_k = D // num_heads
    scale = 1.0 / math.sqrt(d_k)

    # ---- fused embedding: per-row gather by SMEM token id + positional add ----
    for i in range(BS):                                   # static unroll (16 rows)
        x_scr[pl.ds(i, 1), :] = tok_emb_ref[tok_ref[i]]   # dynamic leading-axis gather
    pos = pos_ref[pl.ds(0, seq), :]                       # (S, D) static slice
    x = x_scr[...] + jnp.concatenate([pos] * batch, axis=0)   # embedding dropout == identity

    # TODO(synk): attention mask path not implemented (reference forward uses mask=None)
    for l in range(num_layers):                           # static unroll (L=2), weights VMEM-resident
        # ---- residual 1: pre-LayerNorm + multi-head self-attention ----
        xn = _layer_norm(x, ln1_g_ref[l], ln1_b_ref[l])
        # Q/K/V fused into one (BS, D) @ (D, 3D) matmul over all batch rows.
        qkv = jnp.dot(xn, wqkv_ref[l],
                      preferred_element_type=jnp.float32) + bqkv_ref[l]   # (BS, 3D)
        wo_l = wo_ref[l]                                  # (D, D)
        batch_outs = []
        for b in range(batch):                            # per-batch (S, S) attention
            r0 = b * seq
            ob = jnp.zeros((seq, D), jnp.float32)
            for h in range(num_heads):                    # static unroll over heads
                c0 = h * d_k
                q_h = qkv[r0:r0 + seq, c0:c0 + d_k] * scale
                k_h = qkv[r0:r0 + seq, D + c0:D + c0 + d_k]
                v_h = qkv[r0:r0 + seq, 2 * D + c0:2 * D + c0 + d_k]
                s = lax.dot_general(q_h, k_h, _NT_DIMS,
                                    preferred_element_type=jnp.float32)   # (S, S)
                s = s - jnp.max(s, axis=-1, keepdims=True)
                p = jnp.exp(s)
                p = p / jnp.sum(p, axis=-1, keepdims=True)   # exact softmax divide
                pv = jnp.dot(p, v_h, preferred_element_type=jnp.float32)  # (S, d_k)
                # accumulate through the sublane-aligned row slice of Wo (no lane concat)
                ob = ob + jnp.dot(pv, wo_l[c0:c0 + d_k, :],
                                  preferred_element_type=jnp.float32)
            batch_outs.append(ob)
        attn = jnp.concatenate(batch_outs, axis=0) + bo_ref[l]            # (BS, D)
        x = x + attn                                       # residual dropout == identity

        # ---- residual 2: pre-LayerNorm + feed-forward (all rows at once) ----
        xn2 = _layer_norm(x, ln2_g_ref[l], ln2_b_ref[l])
        h1 = jnp.dot(xn2, w1_ref[l],
                     preferred_element_type=jnp.float32) + b1_ref[l]
        h1 = jnp.maximum(h1, 0.0)                          # ReLU
        x = x + jnp.dot(h1, w2_ref[l],
                        preferred_element_type=jnp.float32) + b2_ref[l]

    # ---- final LayerNorm ----
    o_ref[...] = _layer_norm(x, nrm_g_ref[...], nrm_b_ref[...])


# ------------------------------ wrapper ---------------------------------------
_PARAM_KEYS = ("tok_embed", "pos_embed",
               "ln1_g", "ln1_b", "wqkv", "bqkv", "wo", "bo",
               "ln2_g", "ln2_b", "w1", "b1", "w2", "b2",
               "norm_g", "norm_b")


def fused_encoder(tokens, params):
    B, S = tokens.shape
    assert S <= MAX_SEQ_LEN, "sequence longer than max_seq_len"
    BS = B * S
    plist = [params[k] for k in _PARAM_KEYS]
    kernel = functools.partial(fused_encoder_kernel,
                               batch=B, seq=S,
                               num_heads=NUM_HEADS, num_layers=N_ENCODER)
    out2d = pl.pallas_call(
        kernel,
        out_shape=jax.ShapeDtypeStruct((BS, D_EMBED), jnp.float32),
        in_specs=([pl.BlockSpec(memory_space=pltpu.MemorySpace.SMEM)]      # token ids
                  + [pl.BlockSpec(memory_space=pltpu.MemorySpace.VMEM)
                     for _ in plist]),                                     # untiled VMEM weights
        out_specs=pl.BlockSpec(memory_space=pltpu.MemorySpace.VMEM),
        scratch_shapes=[pltpu.VMEM((BS, D_EMBED), jnp.float32)],
    )(tokens.reshape(BS), *plist)
    return out2d.reshape(B, S, D_EMBED)


# ------------------------------ parameter init --------------------------------
def init_params(key):
    def nrm(k, shape, scale=0.02):
        return (scale * jax.random.normal(k, shape)).astype(jnp.float32)

    L, D, F = N_ENCODER, D_EMBED, D_FF
    k_emb, k_pos, k_blocks = jax.random.split(key, 3)
    bkeys = jax.random.split(k_blocks, L * 6)

    wqkv_l, wo_l, w1_l, w2_l = [], [], [], []
    for i in range(L):
        kq, kk, kv, ko, kf1, kf2 = bkeys[i * 6:(i + 1) * 6]
        wqkv_l.append(jnp.concatenate(
            [nrm(kq, (D, D)), nrm(kk, (D, D)), nrm(kv, (D, D))], axis=-1))  # (D, 3D)
        wo_l.append(nrm(ko, (D, D)))
        w1_l.append(nrm(kf1, (D, F)))
        w2_l.append(nrm(kf2, (F, D)))

    params = {
        # (VOCAB, 1, D) so the in-kernel gather is a dynamic index on a leading axis
        "tok_embed": nrm(k_emb, (VOCAB, 1, D), 1.0),
        "pos_embed": nrm(k_pos, (MAX_SEQ_LEN, D), 1.0),
        "norm_g": jnp.ones((1, D), jnp.float32),
        "norm_b": jnp.zeros((1, D), jnp.float32),
        # per-layer params stacked along a leading layer axis
        "ln1_g": jnp.ones((L, 1, D), jnp.float32),
        "ln1_b": jnp.zeros((L, 1, D), jnp.float32),
        "ln2_g": jnp.ones((L, 1, D), jnp.float32),
        "ln2_b": jnp.zeros((L, 1, D), jnp.float32),
        "wqkv": jnp.stack(wqkv_l),                 # (L, D, 3D)
        "bqkv": jnp.zeros((L, 1, 3 * D), jnp.float32),
        "wo": jnp.stack(wo_l),                     # (L, D, D)
        "bo": jnp.zeros((L, 1, D), jnp.float32),
        "w1": jnp.stack(w1_l),                     # (L, D, F)
        "b1": jnp.zeros((L, 1, F), jnp.float32),
        "w2": jnp.stack(w2_l),                     # (L, F, D)
        "b2": jnp.zeros((L, 1, D), jnp.float32),
    }
    return params


# ------------------------------ forward ---------------------------------------
@jax.jit
def encoder_forward(params, tokens):
    # Everything (embedding gather, pos add, N encoder blocks, final LN) is one pallas_call.
    return fused_encoder(tokens, params)


# ------------------------------ main -------------------------------------------
if __name__ == "__main__":
    key = jax.random.PRNGKey(0)
    k_param, k_tok = jax.random.split(key)
    params = init_params(k_param)
    tokens = jax.random.randint(k_tok, (BATCH, SEQ), 0, VOCAB, dtype=jnp.int32)

    out = encoder_forward(params, tokens)
    out = jax.block_until_ready(out)
    assert out.shape == (BATCH, SEQ, D_EMBED), out.shape
    assert out.dtype == jnp.float32
    assert bool(jnp.all(jnp.isfinite(out)))
    print("KERNEL_OK")
</pallas_src>

<mosaic_0001>
module attributes {stable_mosaic.version = 11 : i64} {
  func.func @fused_encoder_kernel(%arg0: memref<16xi32, #tpu.memory_space<smem>>, %arg1: memref<50x1x32xf32, #tpu.memory_space<vmem>>, %arg2: memref<16x32xf32, #tpu.memory_space<vmem>>, %arg3: memref<2x1x32xf32, #tpu.memory_space<vmem>>, %arg4: memref<2x1x32xf32, #tpu.memory_space<vmem>>, %arg5: memref<2x32x96xf32, #tpu.memory_space<vmem>>, %arg6: memref<2x1x96xf32, #tpu.memory_space<vmem>>, %arg7: memref<2x32x32xf32, #tpu.memory_space<vmem>>, %arg8: memref<2x1x32xf32, #tpu.memory_space<vmem>>, %arg9: memref<2x1x32xf32, #tpu.memory_space<vmem>>, %arg10: memref<2x1x32xf32, #tpu.memory_space<vmem>>, %arg11: memref<2x32x64xf32, #tpu.memory_space<vmem>>, %arg12: memref<2x1x64xf32, #tpu.memory_space<vmem>>, %arg13: memref<2x64x32xf32, #tpu.memory_space<vmem>>, %arg14: memref<2x1x32xf32, #tpu.memory_space<vmem>>, %arg15: memref<1x32xf32, #tpu.memory_space<vmem>>, %arg16: memref<1x32xf32, #tpu.memory_space<vmem>>, %arg17: memref<16x32xf32, #tpu.memory_space<vmem>>, %arg18: memref<16x32xf32, #tpu.memory_space<vmem>>) attributes {dimension_semantics = [], scalar_prefetch = 0 : i64, scratch_operands = 1 : i64, tpu.core_type = #tpu.core_type<tc>} {
    %c0 = arith.constant 0 : index
    %0 = memref.load %arg0[%c0] : memref<16xi32, #tpu.memory_space<smem>>
    %1 = arith.index_cast %0 : i32 to index
    %c0_0 = arith.constant 0 : index
    %c0_1 = arith.constant 0 : index
    %2 = vector.load %arg1[%1, %c0_0, %c0_1] : memref<50x1x32xf32, #tpu.memory_space<vmem>>, vector<1x1x32xf32>
    %3 = vector.shape_cast %2 : vector<1x1x32xf32> to vector<1x32xf32>
    %c0_2 = arith.constant 0 : index
    %c0_3 = arith.constant 0 : index
    %4 = vector.load %arg18[%c0_2, %c0_3] : memref<16x32xf32, #tpu.memory_space<vmem>>, vector<1x32xf32>
    tpu.vector_store %arg18[%c0_2, %c0_3], %3 {strides = array<i32>} : memref<16x32xf32, #tpu.memory_space<vmem>>, vector<1x32xf32>,
    %c1 = arith.constant 1 : index
    %5 = memref.load %arg0[%c1] : memref<16xi32, #tpu.memory_space<smem>>
    %6 = arith.index_cast %5 : i32 to index
    %c0_4 = arith.constant 0 : index
    %c0_5 = arith.constant 0 : index
    %7 = vector.load %arg1[%6, %c0_4, %c0_5] : memref<50x1x32xf32, #tpu.memory_space<vmem>>, vector<1x1x32xf32>
    %8 = vector.shape_cast %7 : vector<1x1x32xf32> to vector<1x32xf32>
    %c1_6 = arith.constant 1 : index
    %c0_7 = arith.constant 0 : index
    %9 = vector.load %arg18[%c1_6, %c0_7] : memref<16x32xf32, #tpu.memory_space<vmem>>, vector<1x32xf32>
    tpu.vector_store %arg18[%c1_6, %c0_7], %8 {strides = array<i32>} : memref<16x32xf32, #tpu.memory_space<vmem>>, vector<1x32xf32>,
    %c2 = arith.constant 2 : index
    %10 = memref.load %arg0[%c2] : memref<16xi32, #tpu.memory_space<smem>>
    %11 = arith.index_cast %10 : i32 to index
    %c0_8 = arith.constant 0 : index
    %c0_9 = arith.constant 0 : index
    %12 = vector.load %arg1[%11, %c0_8, %c0_9] : memref<50x1x32xf32, #tpu.memory_space<vmem>>, vector<1x1x32xf32>
    %13 = vector.shape_cast %12 : vector<1x1x32xf32> to vector<1x32xf32>
    %c2_10 = arith.constant 2 : index
    %c0_11 = arith.constant 0 : index
    %14 = vector.load %arg18[%c2_10, %c0_11] : memref<16x32xf32, #tpu.memory_space<vmem>>, vector<1x32xf32>
    tpu.vector_store %arg18[%c2_10, %c0_11], %13 {strides = array<i32>} : memref<16x32xf32, #tpu.memory_space<vmem>>, vector<1x32xf32>,
    %c3 = arith.constant 3 : index
    %15 = memref.load %arg0[%c3] : memref<16xi32, #tpu.memory_space<smem>>
    %16 = arith.index_cast %15 : i32 to index
    %c0_12 = arith.constant 0 : index
    %c0_13 = arith.constant 0 : index
    %17 = vector.load %arg1[%16, %c0_12, %c0_13] : memref<50x1x32xf32, #tpu.memory_space<vmem>>, vector<1x1x32xf32>
    %18 = vector.shape_cast %17 : vector<1x1x32xf32> to vector<1x32xf32>
    %c3_14 = arith.constant 3 : index
    %c0_15 = arith.constant 0 : index
    %19 = vector.load %arg18[%c3_14, %c0_15] : memref<16x32xf32, #tpu.memory_space<vmem>>, vector<1x32xf32>
    tpu.vector_store %arg18[%c3_14, %c0_15], %18 {strides = array<i32>} : memref<16x32xf32, #tpu.memory_space<vmem>>, vector<1x32xf32>,
    %c4 = arith.constant 4 : index
    %20 = memref.load %arg0[%c4] : memref<16xi32, #tpu.memory_space<smem>>
    %21 = arith.index_cast %20 : i32 to index
    %c0_16 = arith.constant 0 : index
    %c0_17 = arith.constant 0 : index
    %22 = vector.load %arg1[%21, %c0_16, %c0_17] : memref<50x1x32xf32, #tpu.memory_space<vmem>>, vector<1x1x32xf32>
    %23 = vector.shape_cast %22 : vector<1x1x32xf32> to vector<1x32xf32>
    %c4_18 = arith.constant 4 : index
    %c0_19 = arith.constant 0 : index
    %24 = vector.load %arg18[%c4_18, %c0_19] : memref<16x32xf32, #tpu.memory_space<vmem>>, vector<1x32xf32>
    tpu.vector_store %arg18[%c4_18, %c0_19], %23 {strides = array<i32>} : memref<16x32xf32, #tpu.memory_space<vmem>>, vector<1x32xf32>,
    %c5 = arith.constant 5 : index
    %25 = memref.load %arg0[%c5] : memref<16xi32, #tpu.memory_space<smem>>
    %26 = arith.index_cast %25 : i32 to index
    %c0_20 = arith.constant 0 : index
    %c0_21 = arith.constant 0 : index
    %27 = vector.load %arg1[%26, %c0_20, %c0_21] : memref<50x1x32xf32, #tpu.memory_space<vmem>>, vector<1x1x32xf32>
    %28 = vector.shape_cast %27 : vector<1x1x32xf32> to vector<1x32xf32>
    %c5_22 = arith.constant 5 : index
    %c0_23 = arith.constant 0 : index
    %29 = vector.load %arg18[%c5_22, %c0_23] : memref<16x32xf32, #tpu.memory_space<vmem>>, vector<1x32xf32>
    tpu.vector_store %arg18[%c5_22, %c0_23], %28 {strides = array<i32>} : memref<16x32xf32, #tpu.memory_space<vmem>>, vector<1x32xf32>,
    %c6 = arith.constant 6 : index
    %30 = memref.load %arg0[%c6] : memref<16xi32, #tpu.memory_space<smem>>
    %31 = arith.index_cast %30 : i32 to index
    %c0_24 = arith.constant 0 : index
    %c0_25 = arith.constant 0 : index
    %32 = vector.load %arg1[%31, %c0_24, %c0_25] : memref<50x1x32xf32, #tpu.memory_space<vmem>>, vector<1x1x32xf32>
    %33 = vector.shape_cast %32 : vector<1x1x32xf32> to vector<1x32xf32>
    %c6_26 = arith.constant 6 : index
    %c0_27 = arith.constant 0 : index
    %34 = vector.load %arg18[%c6_26, %c0_27] : memref<16x32xf32, #tpu.memory_space<vmem>>, vector<1x32xf32>
    tpu.vector_store %arg18[%c6_26, %c0_27], %33 {strides = array<i32>} : memref<16x32xf32, #tpu.memory_space<vmem>>, vector<1x32xf32>,
    %c7 = arith.constant 7 : index
    %35 = memref.load %arg0[%c7] : memref<16xi32, #tpu.memory_space<smem>>
    %36 = arith.index_cast %35 : i32 to index
    %c0_28 = arith.constant 0 : index
    %c0_29 = arith.constant 0 : index
    %37 = vector.load %arg1[%36, %c0_28, %c0_29] : memref<50x1x32xf32, #tpu.memory_space<vmem>>, vector<1x1x32xf32>
    %38 = vector.shape_cast %37 : vector<1x1x32xf32> to vector<1x32xf32>
    %c7_30 = arith.constant 7 : index
    %c0_31 = arith.constant 0 : index
    %39 = vector.load %arg18[%c7_30, %c0_31] : memref<16x32xf32, #tpu.memory_space<vmem>>, vector<1x32xf32>
    tpu.vector_store %arg18[%c7_30, %c0_31], %38 {strides = array<i32>} : memref<16x32xf32, #tpu.memory_space<vmem>>, vector<1x32xf32>,
    %c8 = arith.constant 8 : index
    %40 = memref.load %arg0[%c8] : memref<16xi32, #tpu.memory_space<smem>>
    %41 = arith.index_cast %40 : i32 to index
    %c0_32 = arith.constant 0 : index
    %c0_33 = arith.constant 0 : index
    %42 = vector.load %arg1[%41, %c0_32, %c0_33] : memref<50x1x32xf32, #tpu.memory_space<vmem>>, vector<1x1x32xf32>
    %43 = vector.shape_cast %42 : vector<1x1x32xf32> to vector<1x32xf32>
    %c8_34 = arith.constant 8 : index
    %c0_35 = arith.constant 0 : index
    %44 = vector.load %arg18[%c8_34, %c0_35] : memref<16x32xf32, #tpu.memory_space<vmem>>, vector<1x32xf32>
    tpu.vector_store %arg18[%c8_34, %c0_35], %43 {strides = array<i32>} : memref<16x32xf32, #tpu.memory_space<vmem>>, vector<1x32xf32>,
    %c9 = arith.constant 9 : index
    %45 = memref.load %arg0[%c9] : memref<16xi32, #tpu.memory_space<smem>>
    %46 = arith.index_cast %45 : i32 to index
    %c0_36 = arith.constant 0 : index
    %c0_37 = arith.constant 0 : index
    %47 = vector.load %arg1[%46, %c0_36, %c0_37] : memref<50x1x32xf32, #tpu.memory_space<vmem>>, vector<1x1x32xf32>
    %48 = vector.shape_cast %47 : vector<1x1x32xf32> to vector<1x32xf32>
    %c9_38 = arith.constant 9 : index
    %c0_39 = arith.constant 0 : index
    %49 = vector.load %arg18[%c9_38, %c0_39] : memref<16x32xf32, #tpu.memory_space<vmem>>, vector<1x32xf32>
    tpu.vector_store %arg18[%c9_38, %c0_39], %48 {strides = array<i32>} : memref<16x32xf32, #tpu.memory_space<vmem>>, vector<1x32xf32>,
    %c10 = arith.constant 10 : index
    %50 = memref.load %arg0[%c10] : memref<16xi32, #tpu.memory_space<smem>>
    %51 = arith.index_cast %50 : i32 to index
    %c0_40 = arith.constant 0 : index
    %c0_41 = arith.constant 0 : index
    %52 = vector.load %arg1[%51, %c0_40, %c0_41] : memref<50x1x32xf32, #tpu.memory_space<vmem>>, vector<1x1x32xf32>
    %53 = vector.shape_cast %52 : vector<1x1x32xf32> to vector<1x32xf32>
    %c10_42 = arith.constant 10 : index
    %c0_43 = arith.constant 0 : index
    %54 = vector.load %arg18[%c10_42, %c0_43] : memref<16x32xf32, #tpu.memory_space<vmem>>, vector<1x32xf32>
    tpu.vector_store %arg18[%c10_42, %c0_43], %53 {strides = array<i32>} : memref<16x32xf32, #tpu.memory_space<vmem>>, vector<1x32xf32>,
    %c11 = arith.constant 11 : index
    %55 = memref.load %arg0[%c11] : memref<16xi32, #tpu.memory_space<smem>>
    %56 = arith.index_cast %55 : i32 to index
    %c0_44 = arith.constant 0 : index
    %c0_45 = arith.constant 0 : index
    %57 = vector.load %arg1[%56, %c0_44, %c0_45] : memref<50x1x32xf32, #tpu.memory_space<vmem>>, vector<1x1x32xf32>
    %58 = vector.shape_cast %57 : vector<1x1x32xf32> to vector<1x32xf32>
    %c11_46 = arith.constant 11 : index
    %c0_47 = arith.constant 0 : index
    %59 = vector.load %arg18[%c11_46, %c0_47] : memref<16x32xf32, #tpu.memory_space<vmem>>, vector<1x32xf32>
    tpu.vector_store %arg18[%c11_46, %c0_47], %58 {strides = array<i32>} : memref<16x32xf32, #tpu.memory_space<vmem>>, vector<1x32xf32>,
    %c12 = arith.constant 12 : index
    %60 = memref.load %arg0[%c12] : memref<16xi32, #tpu.memory_space<smem>>
    %61 = arith.index_cast %60 : i32 to index
    %c0_48 = arith.constant 0 : index
    %c0_49 = arith.constant 0 : index
    %62 = vector.load %arg1[%61, %c0_48, %c0_49] : memref<50x1x32xf32, #tpu.memory_space<vmem>>, vector<1x1x32xf32>
    %63 = vector.shape_cast %62 : vector<1x1x32xf32> to vector<1x32xf32>
    %c12_50 = arith.constant 12 : index
    %c0_51 = arith.constant 0 : index
    %64 = vector.load %arg18[%c12_50, %c0_51] : memref<16x32xf32, #tpu.memory_space<vmem>>, vector<1x32xf32>
    tpu.vector_store %arg18[%c12_50, %c0_51], %63 {strides = array<i32>} : memref<16x32xf32, #tpu.memory_space<vmem>>, vector<1x32xf32>,
    %c13 = arith.constant 13 : index
    %65 = memref.load %arg0[%c13] : memref<16xi32, #tpu.memory_space<smem>>
    %66 = arith.index_cast %65 : i32 to index
    %c0_52 = arith.constant 0 : index
    %c0_53 = arith.constant 0 : index
    %67 = vector.load %arg1[%66, %c0_52, %c0_53] : memref<50x1x32xf32, #tpu.memory_space<vmem>>, vector<1x1x32xf32>
    %68 = vector.shape_cast %67 : vector<1x1x32xf32> to vector<1x32xf32>
    %c13_54 = arith.constant 13 : index
    %c0_55 = arith.constant 0 : index
    %69 = vector.load %arg18[%c13_54, %c0_55] : memref<16x32xf32, #tpu.memory_space<vmem>>, vector<1x32xf32>
    tpu.vector_store %arg18[%c13_54, %c0_55], %68 {strides = array<i32>} : memref<16x32xf32, #tpu.memory_space<vmem>>, vector<1x32xf32>,
    %c14 = arith.constant 14 : index
    %70 = memref.load %arg0[%c14] : memref<16xi32, #tpu.memory_space<smem>>
    %71 = arith.index_cast %70 : i32 to index
    %c0_56 = arith.constant 0 : index
    %c0_57 = arith.constant 0 : index
    %72 = vector.load %arg1[%71, %c0_56, %c0_57] : memref<50x1x32xf32, #tpu.memory_space<vmem>>, vector<1x1x32xf32>
    %73 = vector.shape_cast %72 : vector<1x1x32xf32> to vector<1x32xf32>
    %c14_58 = arith.constant 14 : index
    %c0_59 = arith.constant 0 : index
    %74 = vector.load %arg18[%c14_58, %c0_59] : memref<16x32xf32, #tpu.memory_space<vmem>>, vector<1x32xf32>
    tpu.vector_store %arg18[%c14_58, %c0_59], %73 {strides = array<i32>} : memref<16x32xf32, #tpu.memory_space<vmem>>, vector<1x32xf32>,
    %c15 = arith.constant 15 : index
    %75 = memref.load %arg0[%c15] : memref<16xi32, #tpu.memory_space<smem>>
    %76 = arith.index_cast %75 : i32 to index
    %c0_60 = arith.constant 0 : index
    %c0_61 = arith.constant 0 : index
    %77 = vector.load %arg1[%76, %c0_60, %c0_61] : memref<50x1x32xf32, #tpu.memory_space<vmem>>, vector<1x1x32xf32>
    %78 = vector.shape_cast %77 : vector<1x1x32xf32> to vector<1x32xf32>
    %c15_62 = arith.constant 15 : index
    %c0_63 = arith.constant 0 : index
    %79 = vector.load %arg18[%c15_62, %c0_63] : memref<16x32xf32, #tpu.memory_space<vmem>>, vector<1x32xf32>
    tpu.vector_store %arg18[%c15_62, %c0_63], %78 {strides = array<i32>} : memref<16x32xf32, #tpu.memory_space<vmem>>, vector<1x32xf32>,
    %c0_64 = arith.constant 0 : index
    %c0_65 = arith.constant 0 : index
    %80 = vector.load %arg2[%c0_64, %c0_65] : memref<16x32xf32, #tpu.memory_space<vmem>>, vector<8x32xf32>
    %c0_66 = arith.constant 0 : index
    %c0_67 = arith.constant 0 : index
    %81 = vector.load %arg18[%c0_66, %c0_67] : memref<16x32xf32, #tpu.memory_space<vmem>>, vector<16x32xf32>
    %82 = tpu.concatenate %80, %80 in 0 : vector<8x32xf32>, vector<8x32xf32> -> vector<16x32xf32>
    %83 = arith.addf %81, %82 : vector<16x32xf32>
    %c0_68 = arith.constant 0 : index
    %c0_69 = arith.constant 0 : index
    %c0_70 = arith.constant 0 : index
    %84 = vector.load %arg3[%c0_68, %c0_69, %c0_70] : memref<2x1x32xf32, #tpu.memory_space<vmem>>, vector<1x1x32xf32>
    %85 = vector.shape_cast %84 : vector<1x1x32xf32> to vector<1x32xf32>
    %c0_71 = arith.constant 0 : index
    %c0_72 = arith.constant 0 : index
    %c0_73 = arith.constant 0 : index
    %86 = vector.load %arg4[%c0_71, %c0_72, %c0_73] : memref<2x1x32xf32, #tpu.memory_space<vmem>>, vector<1x1x32xf32>
    %87 = vector.shape_cast %86 : vector<1x1x32xf32> to vector<1x32xf32>
    %cst = arith.constant dense<0.000000e+00> : vector<16xf32>
    %88 = vector.multi_reduction <add>, %83, %cst [1] : vector<16x32xf32> to vector<16xf32>
    %89 = vector.shape_cast %88 : vector<16xf32> to vector<16x1xf32>
    %cst_74 = arith.constant 3.200000e+01 : f32
    %90 = vector.broadcast %cst_74 : f32 to vector<16x1xf32>
    %91 = arith.divf %89, %90 : vector<16x1xf32>
    %92 = vector.broadcast %91 : vector<16x1xf32> to vector<16x32xf32>
    %93 = arith.subf %83, %92 : vector<16x32xf32>
    %94 = arith.mulf %93, %93 : vector<16x32xf32>
    %cst_75 = arith.constant dense<0.000000e+00> : vector<16xf32>
    %95 = vector.multi_reduction <add>, %94, %cst_75 [1] : vector<16x32xf32> to vector<16xf32>
    %96 = vector.shape_cast %95 : vector<16xf32> to vector<16x1xf32>
    %cst_76 = arith.constant 3.200000e+01 : f32
    %97 = vector.broadcast %cst_76 : f32 to vector<16x1xf32>
    %98 = arith.divf %96, %97 : vector<16x1xf32>
    %99 = vector.broadcast %91 : vector<16x1xf32> to vector<16x32xf32>
    %100 = arith.subf %83, %99 : vector<16x32xf32>
    %cst_77 = arith.constant 9.99999974E-6 : f32
    %101 = vector.broadcast %cst_77 : f32 to vector<16x1xf32>
    %102 = arith.addf %98, %101 : vector<16x1xf32>
    %103 = math.rsqrt %102 : vector<16x1xf32>
    %104 = vector.broadcast %103 : vector<16x1xf32> to vector<16x32xf32>
    %105 = arith.mulf %100, %104 : vector<16x32xf32>
    %106 = vector.broadcast %85 : vector<1x32xf32> to vector<16x32xf32>
    %107 = arith.mulf %105, %106 : vector<16x32xf32>
    %108 = vector.broadcast %87 : vector<1x32xf32> to vector<16x32xf32>
    %109 = arith.addf %107, %108 : vector<16x32xf32>
    %c0_78 = arith.constant 0 : index
    %c0_79 = arith.constant 0 : index
    %c0_80 = arith.constant 0 : index
    %110 = vector.load %arg5[%c0_78, %c0_79, %c0_80] : memref<2x32x96xf32, #tpu.memory_space<vmem>>, vector<1x32x96xf32>
    %111 = vector.shape_cast %110 : vector<1x32x96xf32> to vector<32x96xf32>
    %cst_81 = arith.constant dense<0.000000e+00> : vector<16x96xf32>
    %112 = tpu.matmul %109, %111, %cst_81 {dimension_numbers = #tpu.dot_dimension_numbers<[1], [0], [0], [1], [0, 0, 1, 1], [], []>} : vector<16x32xf32>, vector<32x96xf32>, vector<16x96xf32> -> vector<16x96xf32>
    %c0_82 = arith.constant 0 : index
    %c0_83 = arith.constant 0 : index
    %c0_84 = arith.constant 0 : index
    %113 = vector.load %arg6[%c0_82, %c0_83, %c0_84] : memref<2x1x96xf32, #tpu.memory_space<vmem>>, vector<1x1x96xf32>
    %114 = vector.shape_cast %113 : vector<1x1x96xf32> to vector<1x96xf32>
    %115 = vector.broadcast %114 : vector<1x96xf32> to vector<16x96xf32>
    %116 = arith.addf %112, %115 : vector<16x96xf32>
    %c0_85 = arith.constant 0 : index
    %c0_86 = arith.constant 0 : index
    %c0_87 = arith.constant 0 : index
    %117 = vector.load %arg7[%c0_85, %c0_86, %c0_87] : memref<2x32x32xf32, #tpu.memory_space<vmem>>, vector<1x32x32xf32>
    %118 = vector.shape_cast %117 : vector<1x32x32xf32> to vector<32x32xf32>
    %cst_88 = arith.constant 0.000000e+00 : f32
    %119 = vector.broadcast %cst_88 : f32 to vector<8x32xf32>
    %120 = vector.extract_strided_slice %116 {offsets = [0, 0], sizes = [8, 8], strides = [1, 1]} : vector<16x96xf32> to vector<8x8xf32>
    %cst_89 = arith.constant 0.353553385 : f32
    %121 = vector.broadcast %cst_89 : f32 to vector<8x8xf32>
    %122 = arith.mulf %120, %121 : vector<8x8xf32>
    %123 = vector.extract_strided_slice %116 {offsets = [0, 32], sizes = [8, 8], strides = [1, 1]} : vector<16x96xf32> to vector<8x8xf32>
    %124 = vector.extract_strided_slice %116 {offsets = [0, 64], sizes = [8, 8], strides = [1, 1]} : vector<16x96xf32> to vector<8x8xf32>
    %cst_90 = arith.constant dense<0.000000e+00> : vector<8x8xf32>
    %125 = tpu.matmul %122, %123, %cst_90 {dimension_numbers = #tpu.dot_dimension_numbers<[1], [1], [0], [0], [0, 0, 1, 0], [], []>} : vector<8x8xf32>, vector<8x8xf32>, vector<8x8xf32> -> vector<8x8xf32>
    %cst_91 = arith.constant dense<0xFF800000> : vector<8xf32>
    %126 = vector.multi_reduction <maximumf>, %125, %cst_91 [1] : vector<8x8xf32> to vector<8xf32>
    %127 = vector.shape_cast %126 : vector<8xf32> to vector<8x1xf32>
    %128 = vector.broadcast %127 : vector<8x1xf32> to vector<8x8xf32>
    %129 = arith.subf %125, %128 : vector<8x8xf32>
    %130 = math.exp %129 : vector<8x8xf32>
    %cst_92 = arith.constant dense<0.000000e+00> : vector<8xf32>
    %131 = vector.multi_reduction <add>, %130, %cst_92 [1] : vector<8x8xf32> to vector<8xf32>
    %132 = vector.shape_cast %131 : vector<8xf32> to vector<8x1xf32>
    %133 = vector.broadcast %132 : vector<8x1xf32> to vector<8x8xf32>
    %134 = arith.divf %130, %133 : vector<8x8xf32>
    %cst_93 = arith.constant dense<0.000000e+00> : vector<8x8xf32>
    %135 = tpu.matmul %134, %124, %cst_93 {dimension_numbers = #tpu.dot_dimension_numbers<[1], [0], [0], [1], [0, 0, 1, 1], [], []>} : vector<8x8xf32>, vector<8x8xf32>, vector<8x8xf32> -> vector<8x8xf32>
    %136 = vector.extract_strided_slice %118 {offsets = [0, 0], sizes = [8, 32], strides = [1, 1]} : vector<32x32xf32> to vector<8x32xf32>
    %cst_94 = arith.constant dense<0.000000e+00> : vector<8x32xf32>
    %137 = tpu.matmul %135, %136, %cst_94 {dimension_numbers = #tpu.dot_dimension_numbers<[1], [0], [0], [1], [0, 0, 1, 1], [], []>} : vector<8x8xf32>, vector<8x32xf32>, vector<8x32xf32> -> vector<8x32xf32>
    %138 = arith.addf %119, %137 : vector<8x32xf32>
    %139 = vector.extract_strided_slice %116 {offsets = [0, 8], sizes = [8, 8], strides = [1, 1]} : vector<16x96xf32> to vector<8x8xf32>
    %cst_95 = arith.constant 0.353553385 : f32
    %140 = vector.broadcast %cst_95 : f32 to vector<8x8xf32>
    %141 = arith.mulf %139, %140 : vector<8x8xf32>
    %142 = vector.extract_strided_slice %116 {offsets = [0, 40], sizes = [8, 8], strides = [1, 1]} : vector<16x96xf32> to vector<8x8xf32>
    %143 = vector.extract_strided_slice %116 {offsets = [0, 72], sizes = [8, 8], strides = [1, 1]} : vector<16x96xf32> to vector<8x8xf32>
    %cst_96 = arith.constant dense<0.000000e+00> : vector<8x8xf32>
    %144 = tpu.matmul %141, %142, %cst_96 {dimension_numbers = #tpu.dot_dimension_numbers<[1], [1], [0], [0], [0, 0, 1, 0], [], []>} : vector<8x8xf32>, vector<8x8xf32>, vector<8x8xf32> -> vector<8x8xf32>
    %cst_97 = arith.constant dense<0xFF800000> : vector<8xf32>
    %145 = vector.multi_reduction <maximumf>, %144, %cst_97 [1] : vector<8x8xf32> to vector<8xf32>
    %146 = vector.shape_cast %145 : vector<8xf32> to vector<8x1xf32>
    %147 = vector.broadcast %146 : vector<8x1xf32> to vector<8x8xf32>
    %148 = arith.subf %144, %147 : vector<8x8xf32>
    %149 = math.exp %148 : vector<8x8xf32>
    %cst_98 = arith.constant dense<0.000000e+00> : vector<8xf32>
    %150 = vector.multi_reduction <add>, %149, %cst_98 [1] : vector<8x8xf32> to vector<8xf32>
    %151 = vector.shape_cast %150 : vector<8xf32> to vector<8x1xf32>
    %152 = vector.broadcast %151 : vector<8x1xf32> to vector<8x8xf32>
    %153 = arith.divf %149, %152 : vector<8x8xf32>
    %cst_99 = arith.constant dense<0.000000e+00> : vector<8x8xf32>
    %154 = tpu.matmul %153, %143, %cst_99 {dimension_numbers = #tpu.dot_dimension_numbers<[1], [0], [0], [1], [0, 0, 1, 1], [], []>} : vector<8x8xf32>, vector<8x8xf32>, vector<8x8xf32> -> vector<8x8xf32>
    %155 = vector.extract_strided_slice %118 {offsets = [8, 0], sizes = [8, 32], strides = [1, 1]} : vector<32x32xf32> to vector<8x32xf32>
    %cst_100 = arith.constant dense<0.000000e+00> : vector<8x32xf32>
    %156 = tpu.matmul %154, %155, %cst_100 {dimension_numbers = #tpu.dot_dimension_numbers<[1], [0], [0], [1], [0, 0, 1, 1], [], []>} : vector<8x8xf32>, vector<8x32xf32>, vector<8x32xf32> -> vector<8x32xf32>
    %157 = arith.addf %138, %156 : vector<8x32xf32>
    %158 = vector.extract_strided_slice %116 {offsets = [0, 16], sizes = [8, 8], strides = [1, 1]} : vector<16x96xf32> to vector<8x8xf32>
    %cst_101 = arith.constant 0.353553385 : f32
    %159 = vector.broadcast %cst_101 : f32 to vector<8x8xf32>
    %160 = arith.mulf %158, %159 : vector<8x8xf32>
    %161 = vector.extract_strided_slice %116 {offsets = [0, 48], sizes = [8, 8], strides = [1, 1]} : vector<16x96xf32> to vector<8x8xf32>
    %162 = vector.extract_strided_slice %116 {offsets = [0, 80], sizes = [8, 8], strides = [1, 1]} : vector<16x96xf32> to vector<8x8xf32>
    %cst_102 = arith.constant dense<0.000000e+00> : vector<8x8xf32>
    %163 = tpu.matmul %160, %161, %cst_102 {dimension_numbers = #tpu.dot_dimension_numbers<[1], [1], [0], [0], [0, 0, 1, 0], [], []>} : vector<8x8xf32>, vector<8x8xf32>, vector<8x8xf32> -> vector<8x8xf32>
    %cst_103 = arith.constant dense<0xFF800000> : vector<8xf32>
    %164 = vector.multi_reduction <maximumf>, %163, %cst_103 [1] : vector<8x8xf32> to vector<8xf32>
    %165 = vector.shape_cast %164 : vector<8xf32> to vector<8x1xf32>
    %166 = vector.broadcast %165 : vector<8x1xf32> to vector<8x8xf32>
    %167 = arith.subf %163, %166 : vector<8x8xf32>
    %168 = math.exp %167 : vector<8x8xf32>
    %cst_104 = arith.constant dense<0.000000e+00> : vector<8xf32>
    %169 = vector.multi_reduction <add>, %168, %cst_104 [1] : vector<8x8xf32> to vector<8xf32>
    %170 = vector.shape_cast %169 : vector<8xf32> to vector<8x1xf32>
    %171 = vector.broadcast %170 : vector<8x1xf32> to vector<8x8xf32>
    %172 = arith.divf %168, %171 : vector<8x8xf32>
    %cst_105 = arith.constant dense<0.000000e+00> : vector<8x8xf32>
    %173 = tpu.matmul %172, %162, %cst_105 {dimension_numbers = #tpu.dot_dimension_numbers<[1], [0], [0], [1], [0, 0, 1, 1], [], []>} : vector<8x8xf32>, vector<8x8xf32>, vector<8x8xf32> -> vector<8x8xf32>
    %174 = vector.extract_strided_slice %118 {offsets = [16, 0], sizes = [8, 32], strides = [1, 1]} : vector<32x32xf32> to vector<8x32xf32>
    %cst_106 = arith.constant dense<0.000000e+00> : vector<8x32xf32>
    %175 = tpu.matmul %173, %174, %cst_106 {dimension_numbers = #tpu.dot_dimension_numbers<[1], [0], [0], [1], [0, 0, 1, 1], [], []>} : vector<8x8xf32>, vector<8x32xf32>, vector<8x32xf32> -> vector<8x32xf32>
    %176 = arith.addf %157, %175 : vector<8x32xf32>
    %177 = vector.extract_strided_slice %116 {offsets = [0, 24], sizes = [8, 8], strides = [1, 1]} : vector<16x96xf32> to vector<8x8xf32>
    %cst_107 = arith.constant 0.353553385 : f32
    %178 = vector.broadcast %cst_107 : f32 to vector<8x8xf32>
    %179 = arith.mulf %177, %178 : vector<8x8xf32>
    %180 = vector.extract_strided_slice %116 {offsets = [0, 56], sizes = [8, 8], strides = [1, 1]} : vector<16x96xf32> to vector<8x8xf32>
    %181 = vector.extract_strided_slice %116 {offsets = [0, 88], sizes = [8, 8], strides = [1, 1]} : vector<16x96xf32> to vector<8x8xf32>
    %cst_108 = arith.constant dense<0.000000e+00> : vector<8x8xf32>
    %182 = tpu.matmul %179, %180, %cst_108 {dimension_numbers = #tpu.dot_dimension_numbers<[1], [1], [0], [0], [0, 0, 1, 0], [], []>} : vector<8x8xf32>, vector<8x8xf32>, vector<8x8xf32> -> vector<8x8xf32>
    %cst_109 = arith.constant dense<0xFF800000> : vector<8xf32>
    %183 = vector.multi_reduction <maximumf>, %182, %cst_109 [1] : vector<8x8xf32> to vector<8xf32>
    %184 = vector.shape_cast %183 : vector<8xf32> to vector<8x1xf32>
    %185 = vector.broadcast %184 : vector<8x1xf32> to vector<8x8xf32>
    %186 = arith.subf %182, %185 : vector<8x8xf32>
    %187 = math.exp %186 : vector<8x8xf32>
    %cst_110 = arith.constant dense<0.000000e+00> : vector<8xf32>
    %188 = vector.multi_reduction <add>, %187, %cst_110 [1] : vector<8x8xf32> to vector<8xf32>
    %189 = vector.shape_cast %188 : vector<8xf32> to vector<8x1xf32>
    %190 = vector.broadcast %189 : vector<8x1xf32> to vector<8x8xf32>
    %191 = arith.divf %187, %190 : vector<8x8xf32>
    %cst_111 = arith.constant dense<0.000000e+00> : vector<8x8xf32>
    %192 = tpu.matmul %191, %181, %cst_111 {dimension_numbers = #tpu.dot_dimension_numbers<[1], [0], [0], [1], [0, 0, 1, 1], [], []>} : vector<8x8xf32>, vector<8x8xf32>, vector<8x8xf32> -> vector<8x8xf32>
    %193 = vector.extract_strided_slice %118 {offsets = [24, 0], sizes = [8, 32], strides = [1, 1]} : vector<32x32xf32> to vector<8x32xf32>
    %cst_112 = arith.constant dense<0.000000e+00> : vector<8x32xf32>
    %194 = tpu.matmul %192, %193, %cst_112 {dimension_numbers = #tpu.dot_dimension_numbers<[1], [0], [0], [1], [0, 0, 1, 1], [], []>} : vector<8x8xf32>, vector<8x32xf32>, vector<8x32xf32> -> vector<8x32xf32>
    %195 = arith.addf %176, %194 : vector<8x32xf32>
    %cst_113 = arith.constant 0.000000e+00 : f32
    %196 = vector.broadcast %cst_113 : f32 to vector<8x32xf32>
    %197 = vector.extract_strided_slice %116 {offsets = [8, 0], sizes = [8, 8], strides = [1, 1]} : vector<16x96xf32> to vector<8x8xf32>
    %cst_114 = arith.constant 0.353553385 : f32
    %198 = vector.broadcast %cst_114 : f32 to vector<8x8xf32>
    %199 = arith.mulf %197, %198 : vector<8x8xf32>
    %200 = vector.extract_strided_slice %116 {offsets = [8, 32], sizes = [8, 8], strides = [1, 1]} : vector<16x96xf32> to vector<8x8xf32>
    %201 = vector.extract_strided_slice %116 {offsets = [8, 64], sizes = [8, 8], strides = [1, 1]} : vector<16x96xf32> to vector<8x8xf32>
    %cst_115 = arith.constant dense<0.000000e+00> : vector<8x8xf32>
    %202 = tpu.matmul %199, %200, %cst_115 {dimension_numbers = #tpu.dot_dimension_numbers<[1], [1], [0], [0], [0, 0, 1, 0], [], []>} : vector<8x8xf32>, vector<8x8xf32>, vector<8x8xf32> -> vector<8x8xf32>
    %cst_116 = arith.constant dense<0xFF800000> : vector<8xf32>
    %203 = vector.multi_reduction <maximumf>, %202, %cst_116 [1] : vector<8x8xf32> to vector<8xf32>
    %204 = vector.shape_cast %203 : vector<8xf32> to vector<8x1xf32>
    %205 = vector.broadcast %204 : vector<8x1xf32> to vector<8x8xf32>
    %206 = arith.subf %202, %205 : vector<8x8xf32>
    %207 = math.exp %206 : vector<8x8xf32>
    %cst_117 = arith.constant dense<0.000000e+00> : vector<8xf32>
    %208 = vector.multi_reduction <add>, %207, %cst_117 [1] : vector<8x8xf32> to vector<8xf32>
    %209 = vector.shape_cast %208 : vector<8xf32> to vector<8x1xf32>
    %210 = vector.broadcast %209 : vector<8x1xf32> to vector<8x8xf32>
    %211 = arith.divf %207, %210 : vector<8x8xf32>
    %cst_118 = arith.constant dense<0.000000e+00> : vector<8x8xf32>
    %212 = tpu.matmul %211, %201, %cst_118 {dimension_numbers = #tpu.dot_dimension_numbers<[1], [0], [0], [1], [0, 0, 1, 1], [], []>} : vector<8x8xf32>, vector<8x8xf32>, vector<8x8xf32> -> vector<8x8xf32>
    %213 = vector.extract_strided_slice %118 {offsets = [0, 0], sizes = [8, 32], strides = [1, 1]} : vector<32x32xf32> to vector<8x32xf32>
    %cst_119 = arith.constant dense<0.000000e+00> : vector<8x32xf32>
    %214 = tpu.matmul %212, %213, %cst_119 {dimension_numbers = #tpu.dot_dimension_numbers<[1], [0], [0], [1], [0, 0, 1, 1], [], []>} : vector<8x8xf32>, vector<8x32xf32>, vector<8x32xf32> -> vector<8x32xf32>
    %215 = arith.addf %196, %214 : vector<8x32xf32>
    %216 = vector.extract_strided_slice %116 {offsets = [8, 8], sizes = [8, 8], strides = [1, 1]} : vector<16x96xf32> to vector<8x8xf32>
    %cst_120 = arith.constant 0.353553385 : f32
    %217 = vector.broadcast %cst_120 : f32 to vector<8x8xf32>
    %218 = arith.mulf %216, %217 : vector<8x8xf32>
    %219 = vector.extract_strided_slice %116 {offsets = [8, 40], sizes = [8, 8], strides = [1, 1]} : vector<16x96xf32> to vector<8x8xf32>
    %220 = vector.extract_strided_slice %116 {offsets = [8, 72], sizes = [8, 8], strides = [1, 1]} : vector<16x96xf32> to vector<8x8xf32>
    %cst_121 = arith.constant dense<0.000000e+00> : vector<8x8xf32>
    %221 = tpu.matmul %218, %219, %cst_121 {dimension_numbers = #tpu.dot_dimension_numbers<[1], [1], [0], [0], [0, 0, 1, 0], [], []>} : vector<8x8xf32>, vector<8x8xf32>, vector<8x8xf32> -> vector<8x8xf32>
    %cst_122 = arith.constant dense<0xFF800000> : vector<8xf32>
    %222 = vector.multi_reduction <maximumf>, %221, %cst_122 [1] : vector<8x8xf32> to vector<8xf32>
    %223 = vector.shape_cast %222 : vector<8xf32> to vector<8x1xf32>
    %224 = vector.broadcast %223 : vector<8x1xf32> to vector<8x8xf32>
    %225 = arith.subf %221, %224 : vector<8x8xf32>
    %226 = math.exp %225 : vector<8x8xf32>
    %cst_123 = arith.constant dense<0.000000e+00> : vector<8xf32>
    %227 = vector.multi_reduction <add>, %226, %cst_123 [1] : vector<8x8xf32> to vector<8xf32>
    %228 = vector.shape_cast %227 : vector<8xf32> to vector<8x1xf32>
    %229 = vector.broadcast %228 : vector<8x1xf32> to vector<8x8xf32>
    %230 = arith.divf %226, %229 : vector<8x8xf32>
    %cst_124 = arith.constant dense<0.000000e+00> : vector<8x8xf32>
    %231 = tpu.matmul %230, %220, %cst_124 {dimension_numbers = #tpu.dot_dimension_numbers<[1], [0], [0], [1], [0, 0, 1, 1], [], []>} : vector<8x8xf32>, vector<8x8xf32>, vector<8x8xf32> -> vector<8x8xf32>
    %232 = vector.extract_strided_slice %118 {offsets = [8, 0], sizes = [8, 32], strides = [1, 1]} : vector<32x32xf32> to vector<8x32xf32>
    %cst_125 = arith.constant dense<0.000000e+00> : vector<8x32xf32>
    %233 = tpu.matmul %231, %232, %cst_125 {dimension_numbers = #tpu.dot_dimension_numbers<[1], [0], [0], [1], [0, 0, 1, 1], [], []>} : vector<8x8xf32>, vector<8x32xf32>, vector<8x32xf32> -> vector<8x32xf32>
    %234 = arith.addf %215, %233 : vector<8x32xf32>
    %235 = vector.extract_strided_slice %116 {offsets = [8, 16], sizes = [8, 8], strides = [1, 1]} : vector<16x96xf32> to vector<8x8xf32>
    %cst_126 = arith.constant 0.353553385 : f32
    %236 = vector.broadcast %cst_126 : f32 to vector<8x8xf32>
    %237 = arith.mulf %235, %236 : vector<8x8xf32>
    %238 = vector.extract_strided_slice %116 {offsets = [8, 48], sizes = [8, 8], strides = [1, 1]} : vector<16x96xf32> to vector<8x8xf32>
    %239 = vector.extract_strided_slice %116 {offsets = [8, 80], sizes = [8, 8], strides = [1, 1]} : vector<16x96xf32> to vector<8x8xf32>
    %cst_127 = arith.constant dense<0.000000e+00> : vector<8x8xf32>
    %240 = tpu.matmul %237, %238, %cst_127 {dimension_numbers = #tpu.dot_dimension_numbers<[1], [1], [0], [0], [0, 0, 1, 0], [], []>} : vector<8x8xf32>, vector<8x8xf32>, vector<8x8xf32> -> vector<8x8xf32>
    %cst_128 = arith.constant dense<0xFF800000> : vector<8xf32>
    %241 = vector.multi_reduction <maximumf>, %240, %cst_128 [1] : vector<8x8xf32> to vector<8xf32>
    %242 = vector.shape_cast %241 : vector<8xf32> to vector<8x1xf32>
    %243 = vector.broadcast %242 : vector<8x1xf32> to vector<8x8xf32>
    %244 = arith.subf %240, %243 : vector<8x8xf32>
    %245 = math.exp %244 : vector<8x8xf32>
    %cst_129 = arith.constant dense<0.000000e+00> : vector<8xf32>
    %246 = vector.multi_reduction <add>, %245, %cst_129 [1] : vector<8x8xf32> to vector<8xf32>
    %247 = vector.shape_cast %246 : vector<8xf32> to vector<8x1xf32>
    %248 = vector.broadcast %247 : vector<8x1xf32> to vector<8x8xf32>
    %249 = arith.divf %245, %248 : vector<8x8xf32>
    %cst_130 = arith.constant dense<0.000000e+00> : vector<8x8xf32>
    %250 = tpu.matmul %249, %239, %cst_130 {dimension_numbers = #tpu.dot_dimension_numbers<[1], [0], [0], [1], [0, 0, 1, 1], [], []>} : vector<8x8xf32>, vector<8x8xf32>, vector<8x8xf32> -> vector<8x8xf32>
    %251 = vector.extract_strided_slice %118 {offsets = [16, 0], sizes = [8, 32], strides = [1, 1]} : vector<32x32xf32> to vector<8x32xf32>
    %cst_131 = arith.constant dense<0.000000e+00> : vector<8x32xf32>
    %252 = tpu.matmul %250, %251, %cst_131 {dimension_numbers = #tpu.dot_dimension_numbers<[1], [0], [0], [1], [0, 0, 1, 1], [], []>} : vector<8x8xf32>, vector<8x32xf32>, vector<8x32xf32> -> vector<8x32xf32>
    %253 = arith.addf %234, %252 : vector<8x32xf32>
    %254 = vector.extract_strided_slice %116 {offsets = [8, 24], sizes = [8, 8], strides = [1, 1]} : vector<16x96xf32> to vector<8x8xf32>
    %cst_132 = arith.constant 0.353553385 : f32
    %255 = vector.broadcast %cst_132 : f32 to vector<8x8xf32>
    %256 = arith.mulf %254, %255 : vector<8x8xf32>
    %257 = vector.extract_strided_slice %116 {offsets = [8, 56], sizes = [8, 8], strides = [1, 1]} : vector<16x96xf32> to vector<8x8xf32>
    %258 = vector.extract_strided_slice %116 {offsets = [8, 88], sizes = [8, 8], strides = [1, 1]} : vector<16x96xf32> to vector<8x8xf32>
    %cst_133 = arith.constant dense<0.000000e+00> : vector<8x8xf32>
    %259 = tpu.matmul %256, %257, %cst_133 {dimension_numbers = #tpu.dot_dimension_numbers<[1], [1], [0], [0], [0, 0, 1, 0], [], []>} : vector<8x8xf32>, vector<8x8xf32>, vector<8x8xf32> -> vector<8x8xf32>
    %cst_134 = arith.constant dense<0xFF800000> : vector<8xf32>
    %260 = vector.multi_reduction <maximumf>, %259, %cst_134 [1] : vector<8x8xf32> to vector<8xf32>
    %261 = vector.shape_cast %260 : vector<8xf32> to vector<8x1xf32>
    %262 = vector.broadcast %261 : vector<8x1xf32> to vector<8x8xf32>
    %263 = arith.subf %259, %262 : vector<8x8xf32>
    %264 = math.exp %263 : vector<8x8xf32>
    %cst_135 = arith.constant dense<0.000000e+00> : vector<8xf32>
    %265 = vector.multi_reduction <add>, %264, %cst_135 [1] : vector<8x8xf32> to vector<8xf32>
    %266 = vector.shape_cast %265 : vector<8xf32> to vector<8x1xf32>
    %267 = vector.broadcast %266 : vector<8x1xf32> to vector<8x8xf32>
    %268 = arith.divf %264, %267 : vector<8x8xf32>
    %cst_136 = arith.constant dense<0.000000e+00> : vector<8x8xf32>
    %269 = tpu.matmul %268, %258, %cst_136 {dimension_numbers = #tpu.dot_dimension_numbers<[1], [0], [0], [1], [0, 0, 1, 1], [], []>} : vector<8x8xf32>, vector<8x8xf32>, vector<8x8xf32> -> vector<8x8xf32>
    %270 = vector.extract_strided_slice %118 {offsets = [24, 0], sizes = [8, 32], strides = [1, 1]} : vector<32x32xf32> to vector<8x32xf32>
    %cst_137 = arith.constant dense<0.000000e+00> : vector<8x32xf32>
    %271 = tpu.matmul %269, %270, %cst_137 {dimension_numbers = #tpu.dot_dimension_numbers<[1], [0], [0], [1], [0, 0, 1, 1], [], []>} : vector<8x8xf32>, vector<8x32xf32>, vector<8x32xf32> -> vector<8x32xf32>
    %272 = arith.addf %253, %271 : vector<8x32xf32>
    %273 = tpu.concatenate %195, %272 in 0 : vector<8x32xf32>, vector<8x32xf32> -> vector<16x32xf32>
    %c0_138 = arith.constant 0 : index
    %c0_139 = arith.constant 0 : index
    %c0_140 = arith.constant 0 : index
    %274 = vector.load %arg8[%c0_138, %c0_139, %c0_140] : memref<2x1x32xf32, #tpu.memory_space<vmem>>, vector<1x1x32xf32>
    %275 = vector.shape_cast %274 : vector<1x1x32xf32> to vector<1x32xf32>
    %276 = vector.broadcast %275 : vector<1x32xf32> to vector<16x32xf32>
    %277 = arith.addf %273, %276 : vector<16x32xf32>
    %278 = arith.addf %83, %277 : vector<16x32xf32>
    %c0_141 = arith.constant 0 : index
    %c0_142 = arith.constant 0 : index
    %c0_143 = arith.constant 0 : index
    %279 = vector.load %arg9[%c0_141, %c0_142, %c0_143] : memref<2x1x32xf32, #tpu.memory_space<vmem>>, vector<1x1x32xf32>
    %280 = vector.shape_cast %279 : vector<1x1x32xf32> to vector<1x32xf32>
    %c0_144 = arith.constant 0 : index
    %c0_145 = arith.constant 0 : index
    %c0_146 = arith.constant 0 : index
    %281 = vector.load %arg10[%c0_144, %c0_145, %c0_146] : memref<2x1x32xf32, #tpu.memory_space<vmem>>, vector<1x1x32xf32>
    %282 = vector.shape_cast %281 : vector<1x1x32xf32> to vector<1x32xf32>
    %cst_147 = arith.constant dense<0.000000e+00> : vector<16xf32>
    %283 = vector.multi_reduction <add>, %278, %cst_147 [1] : vector<16x32xf32> to vector<16xf32>
    %284 = vector.shape_cast %283 : vector<16xf32> to vector<16x1xf32>
    %cst_148 = arith.constant 3.200000e+01 : f32
    %285 = vector.broadcast %cst_148 : f32 to vector<16x1xf32>
    %286 = arith.divf %284, %285 : vector<16x1xf32>
    %287 = vector.broadcast %286 : vector<16x1xf32> to vector<16x32xf32>
    %288 = arith.subf %278, %287 : vector<16x32xf32>
    %289 = arith.mulf %288, %288 : vector<16x32xf32>
    %cst_149 = arith.constant dense<0.000000e+00> : vector<16xf32>
    %290 = vector.multi_reduction <add>, %289, %cst_149 [1] : vector<16x32xf32> to vector<16xf32>
    %291 = vector.shape_cast %290 : vector<16xf32> to vector<16x1xf32>
    %cst_150 = arith.constant 3.200000e+01 : f32
    %292 = vector.broadcast %cst_150 : f32 to vector<16x1xf32>
    %293 = arith.divf %291, %292 : vector<16x1xf32>
    %294 = vector.broadcast %286 : vector<16x1xf32> to vector<16x32xf32>
    %295 = arith.subf %278, %294 : vector<16x32xf32>
    %cst_151 = arith.constant 9.99999974E-6 : f32
    %296 = vector.broadcast %cst_151 : f32 to vector<16x1xf32>
    %297 = arith.addf %293, %296 : vector<16x1xf32>
    %298 = math.rsqrt %297 : vector<16x1xf32>
    %299 = vector.broadcast %298 : vector<16x1xf32> to vector<16x32xf32>
    %300 = arith.mulf %295, %299 : vector<16x32xf32>
    %301 = vector.broadcast %280 : vector<1x32xf32> to vector<16x32xf32>
    %302 = arith.mulf %300, %301 : vector<16x32xf32>
    %303 = vector.broadcast %282 : vector<1x32xf32> to vector<16x32xf32>
    %304 = arith.addf %302, %303 : vector<16x32xf32>
    %c0_152 = arith.constant 0 : index
    %c0_153 = arith.constant 0 : index
    %c0_154 = arith.constant 0 : index
    %305 = vector.load %arg11[%c0_152, %c0_153, %c0_154] : memref<2x32x64xf32, #tpu.memory_space<vmem>>, vector<1x32x64xf32>
    %306 = vector.shape_cast %305 : vector<1x32x64xf32> to vector<32x64xf32>
    %cst_155 = arith.constant dense<0.000000e+00> : vector<16x64xf32>
    %307 = tpu.matmul %304, %306, %cst_155 {dimension_numbers = #tpu.dot_dimension_numbers<[1], [0], [0], [1], [0, 0, 1, 1], [], []>} : vector<16x32xf32>, vector<32x64xf32>, vector<16x64xf32> -> vector<16x64xf32>
    %c0_156 = arith.constant 0 : index
    %c0_157 = arith.constant 0 : index
    %c0_158 = arith.constant 0 : index
    %308 = vector.load %arg12[%c0_156, %c0_157, %c0_158] : memref<2x1x64xf32, #tpu.memory_space<vmem>>, vector<1x1x64xf32>
    %309 = vector.shape_cast %308 : vector<1x1x64xf32> to vector<1x64xf32>
    %310 = vector.broadcast %309 : vector<1x64xf32> to vector<16x64xf32>
    %311 = arith.addf %307, %310 : vector<16x64xf32>
    %cst_159 = arith.constant 0.000000e+00 : f32
    %312 = vector.broadcast %cst_159 : f32 to vector<16x64xf32>
    %313 = arith.maximumf %311, %312 : vector<16x64xf32>
    %c0_160 = arith.constant 0 : index
    %c0_161 = arith.constant 0 : index
    %c0_162 = arith.constant 0 : index
    %314 = vector.load %arg13[%c0_160, %c0_161, %c0_162] : memref<2x64x32xf32, #tpu.memory_space<vmem>>, vector<1x64x32xf32>
    %315 = vector.shape_cast %314 : vector<1x64x32xf32> to vector<64x32xf32>
    %cst_163 = arith.constant dense<0.000000e+00> : vector<16x32xf32>
    %316 = tpu.matmul %313, %315, %cst_163 {dimension_numbers = #tpu.dot_dimension_numbers<[1], [0], [0], [1], [0, 0, 1, 1], [], []>} : vector<16x64xf32>, vector<64x32xf32>, vector<16x32xf32> -> vector<16x32xf32>
    %317 = arith.addf %278, %316 : vector<16x32xf32>
    %c0_164 = arith.constant 0 : index
    %c0_165 = arith.constant 0 : index
    %c0_166 = arith.constant 0 : index
    %318 = vector.load %arg14[%c0_164, %c0_165, %c0_166] : memref<2x1x32xf32, #tpu.memory_space<vmem>>, vector<1x1x32xf32>
    %319 = vector.shape_cast %318 : vector<1x1x32xf32> to vector<1x32xf32>
    %320 = vector.broadcast %319 : vector<1x32xf32> to vector<16x32xf32>
    %321 = arith.addf %317, %320 : vector<16x32xf32>
    %c1_167 = arith.constant 1 : index
    %c0_168 = arith.constant 0 : index
    %c0_169 = arith.constant 0 : index
    %322 = vector.load %arg3[%c1_167, %c0_168, %c0_169] : memref<2x1x32xf32, #tpu.memory_space<vmem>>, vector<1x1x32xf32>
    %323 = vector.shape_cast %322 : vector<1x1x32xf32> to vector<1x32xf32>
    %c1_170 = arith.constant 1 : index
    %c0_171 = arith.constant 0 : index
    %c0_172 = arith.constant 0 : index
    %324 = vector.load %arg4[%c1_170, %c0_171, %c0_172] : memref<2x1x32xf32, #tpu.memory_space<vmem>>, vector<1x1x32xf32>
    %325 = vector.shape_cast %324 : vector<1x1x32xf32> to vector<1x32xf32>
    %cst_173 = arith.constant dense<0.000000e+00> : vector<16xf32>
    %326 = vector.multi_reduction <add>, %321, %cst_173 [1] : vector<16x32xf32> to vector<16xf32>
    %327 = vector.shape_cast %326 : vector<16xf32> to vector<16x1xf32>
    %cst_174 = arith.constant 3.200000e+01 : f32
    %328 = vector.broadcast %cst_174 : f32 to vector<16x1xf32>
    %329 = arith.divf %327, %328 : vector<16x1xf32>
    %330 = vector.broadcast %329 : vector<16x1xf32> to vector<16x32xf32>
    %331 = arith.subf %321, %330 : vector<16x32xf32>
    %332 = arith.mulf %331, %331 : vector<16x32xf32>
    %cst_175 = arith.constant dense<0.000000e+00> : vector<16xf32>
    %333 = vector.multi_reduction <add>, %332, %cst_175 [1] : vector<16x32xf32> to vector<16xf32>
    %334 = vector.shape_cast %333 : vector<16xf32> to vector<16x1xf32>
    %cst_176 = arith.constant 3.200000e+01 : f32
    %335 = vector.broadcast %cst_176 : f32 to vector<16x1xf32>
    %336 = arith.divf %334, %335 : vector<16x1xf32>
    %337 = vector.broadcast %329 : vector<16x1xf32> to vector<16x32xf32>
    %338 = arith.subf %321, %337 : vector<16x32xf32>
    %cst_177 = arith.constant 9.99999974E-6 : f32
    %339 = vector.broadcast %cst_177 : f32 to vector<16x1xf32>
    %340 = arith.addf %336, %339 : vector<16x1xf32>
    %341 = math.rsqrt %340 : vector<16x1xf32>
    %342 = vector.broadcast %341 : vector<16x1xf32> to vector<16x32xf32>
    %343 = arith.mulf %338, %342 : vector<16x32xf32>
    %344 = vector.broadcast %323 : vector<1x32xf32> to vector<16x32xf32>
    %345 = arith.mulf %343, %344 : vector<16x32xf32>
    %346 = vector.broadcast %325 : vector<1x32xf32> to vector<16x32xf32>
    %347 = arith.addf %345, %346 : vector<16x32xf32>
    %c1_178 = arith.constant 1 : index
    %c0_179 = arith.constant 0 : index
    %c0_180 = arith.constant 0 : index
    %348 = vector.load %arg5[%c1_178, %c0_179, %c0_180] : memref<2x32x96xf32, #tpu.memory_space<vmem>>, vector<1x32x96xf32>
    %349 = vector.shape_cast %348 : vector<1x32x96xf32> to vector<32x96xf32>
    %cst_181 = arith.constant dense<0.000000e+00> : vector<16x96xf32>
    %350 = tpu.matmul %347, %349, %cst_181 {dimension_numbers = #tpu.dot_dimension_numbers<[1], [0], [0], [1], [0, 0, 1, 1], [], []>} : vector<16x32xf32>, vector<32x96xf32>, vector<16x96xf32> -> vector<16x96xf32>
    %c1_182 = arith.constant 1 : index
    %c0_183 = arith.constant 0 : index
    %c0_184 = arith.constant 0 : index
    %351 = vector.load %arg6[%c1_182, %c0_183, %c0_184] : memref<2x1x96xf32, #tpu.memory_space<vmem>>, vector<1x1x96xf32>
    %352 = vector.shape_cast %351 : vector<1x1x96xf32> to vector<1x96xf32>
    %353 = vector.broadcast %352 : vector<1x96xf32> to vector<16x96xf32>
    %354 = arith.addf %350, %353 : vector<16x96xf32>
    %c1_185 = arith.constant 1 : index
    %c0_186 = arith.constant 0 : index
    %c0_187 = arith.constant 0 : index
    %355 = vector.load %arg7[%c1_185, %c0_186, %c0_187] : memref<2x32x32xf32, #tpu.memory_space<vmem>>, vector<1x32x32xf32>
    %356 = vector.shape_cast %355 : vector<1x32x32xf32> to vector<32x32xf32>
    %cst_188 = arith.constant 0.000000e+00 : f32
    %357 = vector.broadcast %cst_188 : f32 to vector<8x32xf32>
    %358 = vector.extract_strided_slice %354 {offsets = [0, 0], sizes = [8, 8], strides = [1, 1]} : vector<16x96xf32> to vector<8x8xf32>
    %cst_189 = arith.constant 0.353553385 : f32
    %359 = vector.broadcast %cst_189 : f32 to vector<8x8xf32>
    %360 = arith.mulf %358, %359 : vector<8x8xf32>
    %361 = vector.extract_strided_slice %354 {offsets = [0, 32], sizes = [8, 8], strides = [1, 1]} : vector<16x96xf32> to vector<8x8xf32>
    %362 = vector.extract_strided_slice %354 {offsets = [0, 64], sizes = [8, 8], strides = [1, 1]} : vector<16x96xf32> to vector<8x8xf32>
    %cst_190 = arith.constant dense<0.000000e+00> : vector<8x8xf32>
    %363 = tpu.matmul %360, %361, %cst_190 {dimension_numbers = #tpu.dot_dimension_numbers<[1], [1], [0], [0], [0, 0, 1, 0], [], []>} : vector<8x8xf32>, vector<8x8xf32>, vector<8x8xf32> -> vector<8x8xf32>
    %cst_191 = arith.constant dense<0xFF800000> : vector<8xf32>
    %364 = vector.multi_reduction <maximumf>, %363, %cst_191 [1] : vector<8x8xf32> to vector<8xf32>
    %365 = vector.shape_cast %364 : vector<8xf32> to vector<8x1xf32>
    %366 = vector.broadcast %365 : vector<8x1xf32> to vector<8x8xf32>
    %367 = arith.subf %363, %366 : vector<8x8xf32>
    %368 = math.exp %367 : vector<8x8xf32>
    %cst_192 = arith.constant dense<0.000000e+00> : vector<8xf32>
    %369 = vector.multi_reduction <add>, %368, %cst_192 [1] : vector<8x8xf32> to vector<8xf32>
    %370 = vector.shape_cast %369 : vector<8xf32> to vector<8x1xf32>
    %371 = vector.broadcast %370 : vector<8x1xf32> to vector<8x8xf32>
    %372 = arith.divf %368, %371 : vector<8x8xf32>
    %cst_193 = arith.constant dense<0.000000e+00> : vector<8x8xf32>
    %373 = tpu.matmul %372, %362, %cst_193 {dimension_numbers = #tpu.dot_dimension_numbers<[1], [0], [0], [1], [0, 0, 1, 1], [], []>} : vector<8x8xf32>, vector<8x8xf32>, vector<8x8xf32> -> vector<8x8xf32>
    %374 = vector.extract_strided_slice %356 {offsets = [0, 0], sizes = [8, 32], strides = [1, 1]} : vector<32x32xf32> to vector<8x32xf32>
    %cst_194 = arith.constant dense<0.000000e+00> : vector<8x32xf32>
    %375 = tpu.matmul %373, %374, %cst_194 {dimension_numbers = #tpu.dot_dimension_numbers<[1], [0], [0], [1], [0, 0, 1, 1], [], []>} : vector<8x8xf32>, vector<8x32xf32>, vector<8x32xf32> -> vector<8x32xf32>
    %376 = arith.addf %357, %375 : vector<8x32xf32>
    %377 = vector.extract_strided_slice %354 {offsets = [0, 8], sizes = [8, 8], strides = [1, 1]} : vector<16x96xf32> to vector<8x8xf32>
    %cst_195 = arith.constant 0.353553385 : f32
    %378 = vector.broadcast %cst_195 : f32 to vector<8x8xf32>
    %379 = arith.mulf %377, %378 : vector<8x8xf32>
    %380 = vector.extract_strided_slice %354 {offsets = [0, 40], sizes = [8, 8], strides = [1, 1]} : vector<16x96xf32> to vector<8x8xf32>
    %381 = vector.extract_strided_slice %354 {offsets = [0, 72], sizes = [8, 8], strides = [1, 1]} : vector<16x96xf32> to vector<8x8xf32>
    %cst_196 = arith.constant dense<0.000000e+00> : vector<8x8xf32>
    %382 = tpu.matmul %379, %380, %cst_196 {dimension_numbers = #tpu.dot_dimension_numbers<[1], [1], [0], [0], [0, 0, 1, 0], [], []>} : vector<8x8xf32>, vector<8x8xf32>, vector<8x8xf32> -> vector<8x8xf32>
    %cst_197 = arith.constant dense<0xFF800000> : vector<8xf32>
    %383 = vector.multi_reduction <maximumf>, %382, %cst_197 [1] : vector<8x8xf32> to vector<8xf32>
    %384 = vector.shape_cast %383 : vector<8xf32> to vector<8x1xf32>
    %385 = vector.broadcast %384 : vector<8x1xf32> to vector<8x8xf32>
    %386 = arith.subf %382, %385 : vector<8x8xf32>
    %387 = math.exp %386 : vector<8x8xf32>
    %cst_198 = arith.constant dense<0.000000e+00> : vector<8xf32>
    %388 = vector.multi_reduction <add>, %387, %cst_198 [1] : vector<8x8xf32> to vector<8xf32>
    %389 = vector.shape_cast %388 : vector<8xf32> to vector<8x1xf32>
    %390 = vector.broadcast %389 : vector<8x1xf32> to vector<8x8xf32>
    %391 = arith.divf %387, %390 : vector<8x8xf32>
    %cst_199 = arith.constant dense<0.000000e+00> : vector<8x8xf32>
    %392 = tpu.matmul %391, %381, %cst_199 {dimension_numbers = #tpu.dot_dimension_numbers<[1], [0], [0], [1], [0, 0, 1, 1], [], []>} : vector<8x8xf32>, vector<8x8xf32>, vector<8x8xf32> -> vector<8x8xf32>
    %393 = vector.extract_strided_slice %356 {offsets = [8, 0], sizes = [8, 32], strides = [1, 1]} : vector<32x32xf32> to vector<8x32xf32>
    %cst_200 = arith.constant dense<0.000000e+00> : vector<8x32xf32>
    %394 = tpu.matmul %392, %393, %cst_200 {dimension_numbers = #tpu.dot_dimension_numbers<[1], [0], [0], [1], [0, 0, 1, 1], [], []>} : vector<8x8xf32>, vector<8x32xf32>, vector<8x32xf32> -> vector<8x32xf32>
    %395 = arith.addf %376, %394 : vector<8x32xf32>
    %396 = vector.extract_strided_slice %354 {offsets = [0, 16], sizes = [8, 8], strides = [1, 1]} : vector<16x96xf32> to vector<8x8xf32>
    %cst_201 = arith.constant 0.353553385 : f32
    %397 = vector.broadcast %cst_201 : f32 to vector<8x8xf32>
    %398 = arith.mulf %396, %397 : vector<8x8xf32>
    %399 = vector.extract_strided_slice %354 {offsets = [0, 48], sizes = [8, 8], strides = [1, 1]} : vector<16x96xf32> to vector<8x8xf32>
    %400 = vector.extract_strided_slice %354 {offsets = [0, 80], sizes = [8, 8], strides = [1, 1]} : vector<16x96xf32> to vector<8x8xf32>
    %cst_202 = arith.constant dense<0.000000e+00> : vector<8x8xf32>
    %401 = tpu.matmul %398, %399, %cst_202 {dimension_numbers = #tpu.dot_dimension_numbers<[1], [1], [0], [0], [0, 0, 1, 0], [], []>} : vector<8x8xf32>, vector<8x8xf32>, vector<8x8xf32> -> vector<8x8xf32>
    %cst_203 = arith.constant dense<0xFF800000> : vector<8xf32>
    %402 = vector.multi_reduction <maximumf>, %401, %cst_203 [1] : vector<8x8xf32> to vector<8xf32>
    %403 = vector.shape_cast %402 : vector<8xf32> to vector<8x1xf32>
    %404 = vector.broadcast %403 : vector<8x1xf32> to vector<8x8xf32>
    %405 = arith.subf %401, %404 : vector<8x8xf32>
    %406 = math.exp %405 : vector<8x8xf32>
    %cst_204 = arith.constant dense<0.000000e+00> : vector<8xf32>
    %407 = vector.multi_reduction <add>, %406, %cst_204 [1] : vector<8x8xf32> to vector<8xf32>
    %408 = vector.shape_cast %407 : vector<8xf32> to vector<8x1xf32>
    %409 = vector.broadcast %408 : vector<8x1xf32> to vector<8x8xf32>
    %410 = arith.divf %406, %409 : vector<8x8xf32>
    %cst_205 = arith.constant dense<0.000000e+00> : vector<8x8xf32>
    %411 = tpu.matmul %410, %400, %cst_205 {dimension_numbers = #tpu.dot_dimension_numbers<[1], [0], [0], [1], [0, 0, 1, 1], [], []>} : vector<8x8xf32>, vector<8x8xf32>, vector<8x8xf32> -> vector<8x8xf32>
    %412 = vector.extract_strided_slice %356 {offsets = [16, 0], sizes = [8, 32], strides = [1, 1]} : vector<32x32xf32> to vector<8x32xf32>
    %cst_206 = arith.constant dense<0.000000e+00> : vector<8x32xf32>
    %413 = tpu.matmul %411, %412, %cst_206 {dimension_numbers = #tpu.dot_dimension_numbers<[1], [0], [0], [1], [0, 0, 1, 1], [], []>} : vector<8x8xf32>, vector<8x32xf32>, vector<8x32xf32> -> vector<8x32xf32>
    %414 = arith.addf %395, %413 : vector<8x32xf32>
    %415 = vector.extract_strided_slice %354 {offsets = [0, 24], sizes = [8, 8], strides = [1, 1]} : vector<16x96xf32> to vector<8x8xf32>
    %cst_207 = arith.constant 0.353553385 : f32
    %416 = vector.broadcast %cst_207 : f32 to vector<8x8xf32>
    %417 = arith.mulf %415, %416 : vector<8x8xf32>
    %418 = vector.extract_strided_slice %354 {offsets = [0, 56], sizes = [8, 8], strides = [1, 1]} : vector<16x96xf32> to vector<8x8xf32>
    %419 = vector.extract_strided_slice %354 {offsets = [0, 88], sizes = [8, 8], strides = [1, 1]} : vector<16x96xf32> to vector<8x8xf32>
    %cst_208 = arith.constant dense<0.000000e+00> : vector<8x8xf32>
    %420 = tpu.matmul %417, %418, %cst_208 {dimension_numbers = #tpu.dot_dimension_numbers<[1], [1], [0], [0], [0, 0, 1, 0], [], []>} : vector<8x8xf32>, vector<8x8xf32>, vector<8x8xf32> -> vector<8x8xf32>
    %cst_209 = arith.constant dense<0xFF800000> : vector<8xf32>
    %421 = vector.multi_reduction <maximumf>, %420, %cst_209 [1] : vector<8x8xf32> to vector<8xf32>
    %422 = vector.shape_cast %421 : vector<8xf32> to vector<8x1xf32>
    %423 = vector.broadcast %422 : vector<8x1xf32> to vector<8x8xf32>
    %424 = arith.subf %420, %423 : vector<8x8xf32>
    %425 = math.exp %424 : vector<8x8xf32>
    %cst_210 = arith.constant dense<0.000000e+00> : vector<8xf32>
    %426 = vector.multi_reduction <add>, %425, %cst_210 [1] : vector<8x8xf32> to vector<8xf32>
    %427 = vector.shape_cast %426 : vector<8xf32> to vector<8x1xf32>
    %428 = vector.broadcast %427 : vector<8x1xf32> to vector<8x8xf32>
    %429 = arith.divf %425, %428 : vector<8x8xf32>
    %cst_211 = arith.constant dense<0.000000e+00> : vector<8x8xf32>
    %430 = tpu.matmul %429, %419, %cst_211 {dimension_numbers = #tpu.dot_dimension_numbers<[1], [0], [0], [1], [0, 0, 1, 1], [], []>} : vector<8x8xf32>, vector<8x8xf32>, vector<8x8xf32> -> vector<8x8xf32>
    %431 = vector.extract_strided_slice %356 {offsets = [24, 0], sizes = [8, 32], strides = [1, 1]} : vector<32x32xf32> to vector<8x32xf32>
    %cst_212 = arith.constant dense<0.000000e+00> : vector<8x32xf32>
    %432 = tpu.matmul %430, %431, %cst_212 {dimension_numbers = #tpu.dot_dimension_numbers<[1], [0], [0], [1], [0, 0, 1, 1], [], []>} : vector<8x8xf32>, vector<8x32xf32>, vector<8x32xf32> -> vector<8x32xf32>
    %433 = arith.addf %414, %432 : vector<8x32xf32>
    %cst_213 = arith.constant 0.000000e+00 : f32
    %434 = vector.broadcast %cst_213 : f32 to vector<8x32xf32>
    %435 = vector.extract_strided_slice %354 {offsets = [8, 0], sizes = [8, 8], strides = [1, 1]} : vector<16x96xf32> to vector<8x8xf32>
    %cst_214 = arith.constant 0.353553385 : f32
    %436 = vector.broadcast %cst_214 : f32 to vector<8x8xf32>
    %437 = arith.mulf %435, %436 : vector<8x8xf32>
    %438 = vector.extract_strided_slice %354 {offsets = [8, 32], sizes = [8, 8], strides = [1, 1]} : vector<16x96xf32> to vector<8x8xf32>
    %439 = vector.extract_strided_slice %354 {offsets = [8, 64], sizes = [8, 8], strides = [1, 1]} : vector<16x96xf32> to vector<8x8xf32>
    %cst_215 = arith.constant dense<0.000000e+00> : vector<8x8xf32>
    %440 = tpu.matmul %437, %438, %cst_215 {dimension_numbers = #tpu.dot_dimension_numbers<[1], [1], [0], [0], [0, 0, 1, 0], [], []>} : vector<8x8xf32>, vector<8x8xf32>, vector<8x8xf32> -> vector<8x8xf32>
    %cst_216 = arith.constant dense<0xFF800000> : vector<8xf32>
    %441 = vector.multi_reduction <maximumf>, %440, %cst_216 [1] : vector<8x8xf32> to vector<8xf32>
    %442 = vector.shape_cast %441 : vector<8xf32> to vector<8x1xf32>
    %443 = vector.broadcast %442 : vector<8x1xf32> to vector<8x8xf32>
    %444 = arith.subf %440, %443 : vector<8x8xf32>
    %445 = math.exp %444 : vector<8x8xf32>
    %cst_217 = arith.constant dense<0.000000e+00> : vector<8xf32>
    %446 = vector.multi_reduction <add>, %445, %cst_217 [1] : vector<8x8xf32> to vector<8xf32>
    %447 = vector.shape_cast %446 : vector<8xf32> to vector<8x1xf32>
    %448 = vector.broadcast %447 : vector<8x1xf32> to vector<8x8xf32>
    %449 = arith.divf %445, %448 : vector<8x8xf32>
    %cst_218 = arith.constant dense<0.000000e+00> : vector<8x8xf32>
    %450 = tpu.matmul %449, %439, %cst_218 {dimension_numbers = #tpu.dot_dimension_numbers<[1], [0], [0], [1], [0, 0, 1, 1], [], []>} : vector<8x8xf32>, vector<8x8xf32>, vector<8x8xf32> -> vector<8x8xf32>
    %451 = vector.extract_strided_slice %356 {offsets = [0, 0], sizes = [8, 32], strides = [1, 1]} : vector<32x32xf32> to vector<8x32xf32>
    %cst_219 = arith.constant dense<0.000000e+00> : vector<8x32xf32>
    %452 = tpu.matmul %450, %451, %cst_219 {dimension_numbers = #tpu.dot_dimension_numbers<[1], [0], [0], [1], [0, 0, 1, 1], [], []>} : vector<8x8xf32>, vector<8x32xf32>, vector<8x32xf32> -> vector<8x32xf32>
    %453 = arith.addf %434, %452 : vector<8x32xf32>
    %454 = vector.extract_strided_slice %354 {offsets = [8, 8], sizes = [8, 8], strides = [1, 1]} : vector<16x96xf32> to vector<8x8xf32>
    %cst_220 = arith.constant 0.353553385 : f32
    %455 = vector.broadcast %cst_220 : f32 to vector<8x8xf32>
    %456 = arith.mulf %454, %455 : vector<8x8xf32>
    %457 = vector.extract_strided_slice %354 {offsets = [8, 40], sizes = [8, 8], strides = [1, 1]} : vector<16x96xf32> to vector<8x8xf32>
    %458 = vector.extract_strided_slice %354 {offsets = [8, 72], sizes = [8, 8], strides = [1, 1]} : vector<16x96xf32> to vector<8x8xf32>
    %cst_221 = arith.constant dense<0.000000e+00> : vector<8x8xf32>
    %459 = tpu.matmul %456, %457, %cst_221 {dimension_numbers = #tpu.dot_dimension_numbers<[1], [1], [0], [0], [0, 0, 1, 0], [], []>} : vector<8x8xf32>, vector<8x8xf32>, vector<8x8xf32> -> vector<8x8xf32>
    %cst_222 = arith.constant dense<0xFF800000> : vector<8xf32>
    %460 = vector.multi_reduction <maximumf>, %459, %cst_222 [1] : vector<8x8xf32> to vector<8xf32>
    %461 = vector.shape_cast %460 : vector<8xf32> to vector<8x1xf32>
    %462 = vector.broadcast %461 : vector<8x1xf32> to vector<8x8xf32>
    %463 = arith.subf %459, %462 : vector<8x8xf32>
    %464 = math.exp %463 : vector<8x8xf32>
    %cst_223 = arith.constant dense<0.000000e+00> : vector<8xf32>
    %465 = vector.multi_reduction <add>, %464, %cst_223 [1] : vector<8x8xf32> to vector<8xf32>
    %466 = vector.shape_cast %465 : vector<8xf32> to vector<8x1xf32>
    %467 = vector.broadcast %466 : vector<8x1xf32> to vector<8x8xf32>
    %468 = arith.divf %464, %467 : vector<8x8xf32>
    %cst_224 = arith.constant dense<0.000000e+00> : vector<8x8xf32>
    %469 = tpu.matmul %468, %458, %cst_224 {dimension_numbers = #tpu.dot_dimension_numbers<[1], [0], [0], [1], [0, 0, 1, 1], [], []>} : vector<8x8xf32>, vector<8x8xf32>, vector<8x8xf32> -> vector<8x8xf32>
    %470 = vector.extract_strided_slice %356 {offsets = [8, 0], sizes = [8, 32], strides = [1, 1]} : vector<32x32xf32> to vector<8x32xf32>
    %cst_225 = arith.constant dense<0.000000e+00> : vector<8x32xf32>
    %471 = tpu.matmul %469, %470, %cst_225 {dimension_numbers = #tpu.dot_dimension_numbers<[1], [0], [0], [1], [0, 0, 1, 1], [], []>} : vector<8x8xf32>, vector<8x32xf32>, vector<8x32xf32> -> vector<8x32xf32>
    %472 = arith.addf %453, %471 : vector<8x32xf32>
    %473 = vector.extract_strided_slice %354 {offsets = [8, 16], sizes = [8, 8], strides = [1, 1]} : vector<16x96xf32> to vector<8x8xf32>
    %cst_226 = arith.constant 0.353553385 : f32
    %474 = vector.broadcast %cst_226 : f32 to vector<8x8xf32>
    %475 = arith.mulf %473, %474 : vector<8x8xf32>
    %476 = vector.extract_strided_slice %354 {offsets = [8, 48], sizes = [8, 8], strides = [1, 1]} : vector<16x96xf32> to vector<8x8xf32>
    %477 = vector.extract_strided_slice %354 {offsets = [8, 80], sizes = [8, 8], strides = [1, 1]} : vector<16x96xf32> to vector<8x8xf32>
    %cst_227 = arith.constant dense<0.000000e+00> : vector<8x8xf32>
    %478 = tpu.matmul %475, %476, %cst_227 {dimension_numbers = #tpu.dot_dimension_numbers<[1], [1], [0], [0], [0, 0, 1, 0], [], []>} : vector<8x8xf32>, vector<8x8xf32>, vector<8x8xf32> -> vector<8x8xf32>
    %cst_228 = arith.constant dense<0xFF800000> : vector<8xf32>
    %479 = vector.multi_reduction <maximumf>, %478, %cst_228 [1] : vector<8x8xf32> to vector<8xf32>
    %480 = vector.shape_cast %479 : vector<8xf32> to vector<8x1xf32>
    %481 = vector.broadcast %480 : vector<8x1xf32> to vector<8x8xf32>
    %482 = arith.subf %478, %481 : vector<8x8xf32>
    %483 = math.exp %482 : vector<8x8xf32>
    %cst_229 = arith.constant dense<0.000000e+00> : vector<8xf32>
    %484 = vector.multi_reduction <add>, %483, %cst_229 [1] : vector<8x8xf32> to vector<8xf32>
    %485 = vector.shape_cast %484 : vector<8xf32> to vector<8x1xf32>
    %486 = vector.broadcast %485 : vector<8x1xf32> to vector<8x8xf32>
    %487 = arith.divf %483, %486 : vector<8x8xf32>
    %cst_230 = arith.constant dense<0.000000e+00> : vector<8x8xf32>
    %488 = tpu.matmul %487, %477, %cst_230 {dimension_numbers = #tpu.dot_dimension_numbers<[1], [0], [0], [1], [0, 0, 1, 1], [], []>} : vector<8x8xf32>, vector<8x8xf32>, vector<8x8xf32> -> vector<8x8xf32>
    %489 = vector.extract_strided_slice %356 {offsets = [16, 0], sizes = [8, 32], strides = [1, 1]} : vector<32x32xf32> to vector<8x32xf32>
    %cst_231 = arith.constant dense<0.000000e+00> : vector<8x32xf32>
    %490 = tpu.matmul %488, %489, %cst_231 {dimension_numbers = #tpu.dot_dimension_numbers<[1], [0], [0], [1], [0, 0, 1, 1], [], []>} : vector<8x8xf32>, vector<8x32xf32>, vector<8x32xf32> -> vector<8x32xf32>
    %491 = arith.addf %472, %490 : vector<8x32xf32>
    %492 = vector.extract_strided_slice %354 {offsets = [8, 24], sizes = [8, 8], strides = [1, 1]} : vector<16x96xf32> to vector<8x8xf32>
    %cst_232 = arith.constant 0.353553385 : f32
    %493 = vector.broadcast %cst_232 : f32 to vector<8x8xf32>
    %494 = arith.mulf %492, %493 : vector<8x8xf32>
    %495 = vector.extract_strided_slice %354 {offsets = [8, 56], sizes = [8, 8], strides = [1, 1]} : vector<16x96xf32> to vector<8x8xf32>
    %496 = vector.extract_strided_slice %354 {offsets = [8, 88], sizes = [8, 8], strides = [1, 1]} : vector<16x96xf32> to vector<8x8xf32>
    %cst_233 = arith.constant dense<0.000000e+00> : vector<8x8xf32>
    %497 = tpu.matmul %494, %495, %cst_233 {dimension_numbers = #tpu.dot_dimension_numbers<[1], [1], [0], [0], [0, 0, 1, 0], [], []>} : vector<8x8xf32>, vector<8x8xf32>, vector<8x8xf32> -> vector<8x8xf32>
    %cst_234 = arith.constant dense<0xFF800000> : vector<8xf32>
    %498 = vector.multi_reduction <maximumf>, %497, %cst_234 [1] : vector<8x8xf32> to vector<8xf32>
    %499 = vector.shape_cast %498 : vector<8xf32> to vector<8x1xf32>
    %500 = vector.broadcast %499 : vector<8x1xf32> to vector<8x8xf32>
    %501 = arith.subf %497, %500 : vector<8x8xf32>
    %502 = math.exp %501 : vector<8x8xf32>
    %cst_235 = arith.constant dense<0.000000e+00> : vector<8xf32>
    %503 = vector.multi_reduction <add>, %502, %cst_235 [1] : vector<8x8xf32> to vector<8xf32>
    %504 = vector.shape_cast %503 : vector<8xf32> to vector<8x1xf32>
    %505 = vector.broadcast %504 : vector<8x1xf32> to vector<8x8xf32>
    %506 = arith.divf %502, %505 : vector<8x8xf32>
    %cst_236 = arith.constant dense<0.000000e+00> : vector<8x8xf32>
    %507 = tpu.matmul %506, %496, %cst_236 {dimension_numbers = #tpu.dot_dimension_numbers<[1], [0], [0], [1], [0, 0, 1, 1], [], []>} : vector<8x8xf32>, vector<8x8xf32>, vector<8x8xf32> -> vector<8x8xf32>
    %508 = vector.extract_strided_slice %356 {offsets = [24, 0], sizes = [8, 32], strides = [1, 1]} : vector<32x32xf32> to vector<8x32xf32>
    %cst_237 = arith.constant dense<0.000000e+00> : vector<8x32xf32>
    %509 = tpu.matmul %507, %508, %cst_237 {dimension_numbers = #tpu.dot_dimension_numbers<[1], [0], [0], [1], [0, 0, 1, 1], [], []>} : vector<8x8xf32>, vector<8x32xf32>, vector<8x32xf32> -> vector<8x32xf32>
    %510 = arith.addf %491, %509 : vector<8x32xf32>
    %511 = tpu.concatenate %433, %510 in 0 : vector<8x32xf32>, vector<8x32xf32> -> vector<16x32xf32>
    %c1_238 = arith.constant 1 : index
    %c0_239 = arith.constant 0 : index
    %c0_240 = arith.constant 0 : index
    %512 = vector.load %arg8[%c1_238, %c0_239, %c0_240] : memref<2x1x32xf32, #tpu.memory_space<vmem>>, vector<1x1x32xf32>
    %513 = vector.shape_cast %512 : vector<1x1x32xf32> to vector<1x32xf32>
    %514 = vector.broadcast %513 : vector<1x32xf32> to vector<16x32xf32>
    %515 = arith.addf %511, %514 : vector<16x32xf32>
    %516 = arith.addf %321, %515 : vector<16x32xf32>
    %c1_241 = arith.constant 1 : index
    %c0_242 = arith.constant 0 : index
    %c0_243 = arith.constant 0 : index
    %517 = vector.load %arg9[%c1_241, %c0_242, %c0_243] : memref<2x1x32xf32, #tpu.memory_space<vmem>>, vector<1x1x32xf32>
    %518 = vector.shape_cast %517 : vector<1x1x32xf32> to vector<1x32xf32>
    %c1_244 = arith.constant 1 : index
    %c0_245 = arith.constant 0 : index
    %c0_246 = arith.constant 0 : index
    %519 = vector.load %arg10[%c1_244, %c0_245, %c0_246] : memref<2x1x32xf32, #tpu.memory_space<vmem>>, vector<1x1x32xf32>
    %520 = vector.shape_cast %519 : vector<1x1x32xf32> to vector<1x32xf32>
    %cst_247 = arith.constant dense<0.000000e+00> : vector<16xf32>
    %521 = vector.multi_reduction <add>, %516, %cst_247 [1] : vector<16x32xf32> to vector<16xf32>
    %522 = vector.shape_cast %521 : vector<16xf32> to vector<16x1xf32>
    %cst_248 = arith.constant 3.200000e+01 : f32
    %523 = vector.broadcast %cst_248 : f32 to vector<16x1xf32>
    %524 = arith.divf %522, %523 : vector<16x1xf32>
    %525 = vector.broadcast %524 : vector<16x1xf32> to vector<16x32xf32>
    %526 = arith.subf %516, %525 : vector<16x32xf32>
    %527 = arith.mulf %526, %526 : vector<16x32xf32>
    %cst_249 = arith.constant dense<0.000000e+00> : vector<16xf32>
    %528 = vector.multi_reduction <add>, %527, %cst_249 [1] : vector<16x32xf32> to vector<16xf32>
    %529 = vector.shape_cast %528 : vector<16xf32> to vector<16x1xf32>
    %cst_250 = arith.constant 3.200000e+01 : f32
    %530 = vector.broadcast %cst_250 : f32 to vector<16x1xf32>
    %531 = arith.divf %529, %530 : vector<16x1xf32>
    %532 = vector.broadcast %524 : vector<16x1xf32> to vector<16x32xf32>
    %533 = arith.subf %516, %532 : vector<16x32xf32>
    %cst_251 = arith.constant 9.99999974E-6 : f32
    %534 = vector.broadcast %cst_251 : f32 to vector<16x1xf32>
    %535 = arith.addf %531, %534 : vector<16x1xf32>
    %536 = math.rsqrt %535 : vector<16x1xf32>
    %537 = vector.broadcast %536 : vector<16x1xf32> to vector<16x32xf32>
    %538 = arith.mulf %533, %537 : vector<16x32xf32>
    %539 = vector.broadcast %518 : vector<1x32xf32> to vector<16x32xf32>
    %540 = arith.mulf %538, %539 : vector<16x32xf32>
    %541 = vector.broadcast %520 : vector<1x32xf32> to vector<16x32xf32>
    %542 = arith.addf %540, %541 : vector<16x32xf32>
    %c1_252 = arith.constant 1 : index
    %c0_253 = arith.constant 0 : index
    %c0_254 = arith.constant 0 : index
    %543 = vector.load %arg11[%c1_252, %c0_253, %c0_254] : memref<2x32x64xf32, #tpu.memory_space<vmem>>, vector<1x32x64xf32>
    %544 = vector.shape_cast %543 : vector<1x32x64xf32> to vector<32x64xf32>
    %cst_255 = arith.constant dense<0.000000e+00> : vector<16x64xf32>
    %545 = tpu.matmul %542, %544, %cst_255 {dimension_numbers = #tpu.dot_dimension_numbers<[1], [0], [0], [1], [0, 0, 1, 1], [], []>} : vector<16x32xf32>, vector<32x64xf32>, vector<16x64xf32> -> vector<16x64xf32>
    %c1_256 = arith.constant 1 : index
    %c0_257 = arith.constant 0 : index
    %c0_258 = arith.constant 0 : index
    %546 = vector.load %arg12[%c1_256, %c0_257, %c0_258] : memref<2x1x64xf32, #tpu.memory_space<vmem>>, vector<1x1x64xf32>
    %547 = vector.shape_cast %546 : vector<1x1x64xf32> to vector<1x64xf32>
    %548 = vector.broadcast %547 : vector<1x64xf32> to vector<16x64xf32>
    %549 = arith.addf %545, %548 : vector<16x64xf32>
    %cst_259 = arith.constant 0.000000e+00 : f32
    %550 = vector.broadcast %cst_259 : f32 to vector<16x64xf32>
    %551 = arith.maximumf %549, %550 : vector<16x64xf32>
    %c1_260 = arith.constant 1 : index
    %c0_261 = arith.constant 0 : index
    %c0_262 = arith.constant 0 : index
    %552 = vector.load %arg13[%c1_260, %c0_261, %c0_262] : memref<2x64x32xf32, #tpu.memory_space<vmem>>, vector<1x64x32xf32>
    %553 = vector.shape_cast %552 : vector<1x64x32xf32> to vector<64x32xf32>
    %cst_263 = arith.constant dense<0.000000e+00> : vector<16x32xf32>
    %554 = tpu.matmul %551, %553, %cst_263 {dimension_numbers = #tpu.dot_dimension_numbers<[1], [0], [0], [1], [0, 0, 1, 1], [], []>} : vector<16x64xf32>, vector<64x32xf32>, vector<16x32xf32> -> vector<16x32xf32>
    %555 = arith.addf %516, %554 : vector<16x32xf32>
    %c1_264 = arith.constant 1 : index
    %c0_265 = arith.constant 0 : index
    %c0_266 = arith.constant 0 : index
    %556 = vector.load %arg14[%c1_264, %c0_265, %c0_266] : memref<2x1x32xf32, #tpu.memory_space<vmem>>, vector<1x1x32xf32>
    %557 = vector.shape_cast %556 : vector<1x1x32xf32> to vector<1x32xf32>
    %558 = vector.broadcast %557 : vector<1x32xf32> to vector<16x32xf32>
    %559 = arith.addf %555, %558 : vector<16x32xf32>
    %c0_267 = arith.constant 0 : index
    %c0_268 = arith.constant 0 : index
    %560 = vector.load %arg15[%c0_267, %c0_268] : memref<1x32xf32, #tpu.memory_space<vmem>>, vector<1x32xf32>
    %c0_269 = arith.constant 0 : index
    %c0_270 = arith.constant 0 : index
    %561 = vector.load %arg16[%c0_269, %c0_270] : memref<1x32xf32, #tpu.memory_space<vmem>>, vector<1x32xf32>
    %cst_271 = arith.constant dense<0.000000e+00> : vector<16xf32>
    %562 = vector.multi_reduction <add>, %559, %cst_271 [1] : vector<16x32xf32> to vector<16xf32>
    %563 = vector.shape_cast %562 : vector<16xf32> to vector<16x1xf32>
    %cst_272 = arith.constant 3.200000e+01 : f32
    %564 = vector.broadcast %cst_272 : f32 to vector<16x1xf32>
    %565 = arith.divf %563, %564 : vector<16x1xf32>
    %566 = vector.broadcast %565 : vector<16x1xf32> to vector<16x32xf32>
    %567 = arith.subf %559, %566 : vector<16x32xf32>
    %568 = arith.mulf %567, %567 : vector<16x32xf32>
    %cst_273 = arith.constant dense<0.000000e+00> : vector<16xf32>
    %569 = vector.multi_reduction <add>, %568, %cst_273 [1] : vector<16x32xf32> to vector<16xf32>
    %570 = vector.shape_cast %569 : vector<16xf32> to vector<16x1xf32>
    %cst_274 = arith.constant 3.200000e+01 : f32
    %571 = vector.broadcast %cst_274 : f32 to vector<16x1xf32>
    %572 = arith.divf %570, %571 : vector<16x1xf32>
    %573 = vector.broadcast %565 : vector<16x1xf32> to vector<16x32xf32>
    %574 = arith.subf %559, %573 : vector<16x32xf32>
    %cst_275 = arith.constant 9.99999974E-6 : f32
    %575 = vector.broadcast %cst_275 : f32 to vector<16x1xf32>
    %576 = arith.addf %572, %575 : vector<16x1xf32>
    %577 = math.rsqrt %576 : vector<16x1xf32>
    %578 = vector.broadcast %577 : vector<16x1xf32> to vector<16x32xf32>
    %579 = arith.mulf %574, %578 : vector<16x32xf32>
    %580 = vector.broadcast %560 : vector<1x32xf32> to vector<16x32xf32>
    %581 = arith.mulf %579, %580 : vector<16x32xf32>
    %582 = vector.broadcast %561 : vector<1x32xf32> to vector<16x32xf32>
    %583 = arith.addf %581, %582 : vector<16x32xf32>
    %c0_276 = arith.constant 0 : index
    %c0_277 = arith.constant 0 : index
    %584 = vector.load %arg17[%c0_276, %c0_277] : memref<16x32xf32, #tpu.memory_space<vmem>>, vector<16x32xf32>
    tpu.vector_store %arg17[%c0_276, %c0_277], %583 {strides = array<i32>} : memref<16x32xf32, #tpu.memory_space<vmem>>, vector<16x32xf32>,
    return
  }
}

</mosaic_0001>

<bundles_post_ra>
// kernel: encoder_forward.1
= control target key start
LH: loop header
LB: loop body
LE: loop exit
PB: predicated region body
PF: predicated region fallthrough
CT: control target
= control target key end

     0   :  { %s6474_s0 = inlined_call_operand.vmem [shape: s32[16], index: 0, kind: input, shape index: {}]   ;;  %s6475_s1 = inlined_call_operand.vmem [shape: f32[50,1,32], index: 1, kind: input, shape index: {}]   ;;  %s6476_s2 = inlined_call_operand.vmem [shape: f32[16,32], index: 2, kind: input, shape index: {}]   ;;  %s6477_s3 = inlined_call_operand.vmem [shape: f32[2,1,32], index: 3, kind: input, shape index: {}]   ;;  %s6478_s4 = inlined_call_operand.vmem [shape: f32[2,1,32], index: 4, kind: input, shape index: {}]   ;;  %s6479_s5 = inlined_call_operand.vmem [shape: f32[2,32,96], index: 5, kind: input, shape index: {}]   ;;  %s6480_s6 = inlined_call_operand.vmem [shape: f32[2,1,96], index: 6, kind: input, shape index: {}]   ;;  %s6481_s7 = inlined_call_operand.vmem [shape: f32[2,32,32], index: 7, kind: input, shape index: {}]   ;;  %s6482_s8 = inlined_call_operand.vmem [shape: f32[2,1,32], index: 8, kind: input, shape index: {}]   ;;  %s6483_s9 = inlined_call_operand.vmem [shape: f32[2,1,32], index: 9, kind: input, shape index: {}]   ;;  %s6484_s10 = inlined_call_operand.vmem [shape: f32[2,1,32], index: 10, kind: input, shape index: {}]   ;;  %s6485_s11 = inlined_call_operand.vmem [shape: f32[2,32,64], index: 11, kind: input, shape index: {}]   ;;  %s6486_s12 = inlined_call_operand.vmem [shape: f32[2,1,64], index: 12, kind: input, shape index: {}]   ;;  %s6487_s13 = inlined_call_operand.vmem [shape: f32[2,64,32], index: 13, kind: input, shape index: {}]   ;;  %s6488_s14 = inlined_call_operand.vmem [shape: f32[2,1,32], index: 14, kind: input, shape index: {}]   ;;  %s6489_s15 = inlined_call_operand.vmem [shape: f32[1,32], index: 15, kind: input, shape index: {}]   ;;  %s6490_s16 = inlined_call_operand.vmem [shape: f32[1,32], index: 16, kind: input, shape index: {}]   ;;  %s6491_s17 = inlined_call_operand.hbm [shape: f32[16,32], index: 17, kind: output, shape index: {}]  }
   0x1   :  { %6501 = sst [smem:[#allocation9_spill]] %s6474_s0 }
   0x2   :  { %6502 = sst [smem:[#allocation10_spill]] %s6475_s1 }
   0x3   :  { %6503 = sst [smem:[#allocation11_spill]] %s6482_s8 }
   0x4   :  { %6504 = sst [smem:[#allocation12_spill]] %s6483_s9 }
   0x5   :  { %6505 = sst [smem:[#allocation13_spill]] %s6484_s10 }
   0x6   :  { %6506 = sst [smem:[#allocation14_spill]] %s6485_s11 }
   0x7   :  { %6507 = sst [smem:[#allocation15_spill]] %s6486_s12 }
   0x8   :  { %6508 = sst [smem:[#allocation16_spill]] %s6487_s13 }
   0x9   :  { %6509 = sst [smem:[#allocation17_spill]] %s6488_s14 }
   0xa   :  { %6510 = sst [smem:[#allocation18_spill]] %s6489_s15 }
   0xb   :  { %6511 = sst [smem:[#allocation19_spill]] %s6490_s16 }
   0xc   :  { %6512 = sst [smem:[#allocation20_spill]] %s6491_s17 }
   0xd   :  { %22 = vsyncpa [#allocation5], 0 }
   0xe   :  { %23 = vsyncpa [#allocation4], 0  ;;  %s6513_s26 = sld [smem:[#allocation9_spill]] }
  0x14   :  { %s30_s27 = sshll.u32 %s6513_s26, 4  ;;  %s31_s27 = int_to_ptr.vmem [resolvable:$true] %s30_s27 }
  0x15   :  { %s5597_s28 = scalar_lea.vmem %s31_s27, 16  ;;  %p5602_p1 = scmp.lt.s32.totalorder %s31_s27, %s31_s27 }
  0x16   :  { %p5598_p0 = scmp.ne.s32.totalorder %s31_s27, %s5597_s28  ;;  %p5603_p2 = scmp.lt.s32.totalorder %s5597_s28, %s5597_s28 }
  0x18   :  { %p5604_p3 = por %p5603_p2, %p5602_p1 }
  0x1a   :  { %p5605_p4 = pnand %p5604_p3, %p5598_p0 }
  0x1c   :  { %5608 = shalt.err (!%p5605_p4)
}
  0x1d   :  { %s5635_s29 = smov [#allocation3]  }
  0x1e   :  { %33 = dma.vmem_to_smem %s31_s27, 16, %s5635_s29, [#allocation5]  }
  0x1f   :  { %5631 = dma.done.wait [#allocation5], 16  }
  0x20   :  { %5632 = vsyncadd [#allocation5], 4294967280 }
  0x21   :  { %69 = sfence }
  0x22   :  { %s70_s0 = sld [smem:[#allocation3]]  ;;  %s4833_s30 = sld [smem:[#allocation3 + $0x1]]  ;;  %vm73_vm0 = vcmask 253952   ;;  %v135_v12 = vld [vmem:[%s6476_s2] sm:$0xff]  ;;  %vm142_vm1 = vcmask 261120   ;;  %v187_v34 = vld [vmem:[%s6479_s5 + $0x8] sm:$0xff] }
  0x23   :  { %s4834_s18 = sld [smem:[#allocation3 + $0x2]]  ;;  %s4835_s19 = sld [smem:[#allocation3 + $0x3]]  ;;  %v186_v33 = vld [vmem:[%s6479_s5] sm:$0xff]  ;;  %v188_v35 = vld [vmem:[%s6479_s5 + $0x10] sm:$0xff]  ;;  %v189_v37 = vld [vmem:[%s6479_s5 + $0x18] sm:$0xff]  ;;  %v5636_v55 = vmov 0.0  }
  0x24   :  { %s4836_s1 = sld [smem:[#allocation3 + $0x4]]  ;;  %s4837_s20 = sld [smem:[#allocation3 + $0x5]]  ;;  %v5432_v36 = vpack.c.bf16 %v187_v34, %v186_v33  ;;  %v5436_v38 = vpack.c.bf16 %v189_v37, %v188_v35  ;;  %v4848_v46 = vld [vmem:[%s6477_s3] ss:$0 sm:$0xff]  ;;  %5126 = vmatprep.subr.mxu1 %v5636_v55  ;;  %vm5637_vm2 = vmmov 0   ;;  %vm286_vm3 = vcmask 64512  }
  0x25   :  { %s4838_s21 = sld [smem:[#allocation3 + $0x6]]  ;;  %s4839_s22 = sld [smem:[#allocation3 + $0x7]]  ;;  %v4849_v48 = vld [vmem:[%s6478_s4] ss:$0 sm:$0xff]  ;;  %5128 = vmatprep.mubr.msk.f32.mxu1 %vm5637_vm2, %v5636_v55  ;;  %vm2350_vm4 = vcmask 523264  }
  0x26   :  { %s5745_s23 = sld [smem:[#allocation3 + $0x8]]  ;;  %s5747_s24 = sld [smem:[#allocation3 + $0x9]]  ;;  %5433 = vmatprep.subr.bf16.mxu0 %v5432_v36  ;;  %v4850_v56 = vld [vmem:[%s6480_s6] ss:$0 sm:$0xff] }
  0x27   :  { %s5749_s25 = sld [smem:[#allocation3 + $0xa]]  ;;  %s5751_s26 = sld [smem:[#allocation3 + $0xb]]  ;;  %5435 = vmatpush3.bf16.msra.mxu0 %v5432_v36 }
  0x28   :  { %s6514_s29 = sld [smem:[#allocation10_spill]]  ;;  %5437 = vmatprep.subr.bf16.mxu0 %v5436_v38  ;;  %s5639_s10 = smov 96  }
  0x29   :  { %s5642_s13 = smov 80   ;;  %s6516_s9 = sld [smem:[#allocation12_spill]] }
  0x2b   :  { %5439 = vmatpush3.bf16.msra.mxu0 %v5436_v38 }
  0x2c   :  { %5121 = vmatprep.subr.mxu0 %v5636_v55 }
  0x2e   :  { %s71_s17 = scalar_lea.vmem %s6514_s29, %s70_s0  ;;  %s76_s14 = scalar_lea.vmem %s6514_s29, %s4833_s30 }
  0x2f   :  { %v72_v0 = vld [vmem:[%s71_s17] sm:$0x1]  ;;  %s80_s11 = scalar_lea.vmem %s6514_s29, %s4834_s18  ;;  %s84_s8 = scalar_lea.vmem %s6514_s29, %s4835_s19 }
  0x30   :  { %v77_v1 = vld [vmem:[%s76_s14] sm:$0x1]  ;;  %74 = vst.msk [vmem:[#allocation2] sm:$0x1] %vm73_vm0, %v72_v0  ;;  %s88_s14 = scalar_lea.vmem %s6514_s29, %s4836_s1  ;;  %s92_s12 = scalar_lea.vmem %s6514_s29, %s4837_s20 }
  0x31   :  { %78 = vst.msk [vmem:[#allocation2 + $0x1] sm:$0x1] %vm73_vm0, %v77_v1  ;;  %v81_v2 = vld [vmem:[%s80_s11] sm:$0x1]  ;;  %s100_s30 = scalar_lea.vmem %s6514_s29, %s4839_s22  ;;  %s104_s1 = scalar_lea.vmem %s6514_s29, %s5745_s23 }
  0x32   :  { %v85_v3 = vld [vmem:[%s84_s8] sm:$0x1]  ;;  %82 = vst.msk [vmem:[#allocation2 + $0x2] sm:$0x1] %vm73_vm0, %v81_v2  ;;  %s96_s8 = scalar_lea.vmem %s6514_s29, %s4838_s21  ;;  %s108_s28 = scalar_lea.vmem %s6514_s29, %s5747_s24 }
  0x33   :  { %86 = vst.msk [vmem:[#allocation2 + $0x3] sm:$0x1] %vm73_vm0, %v85_v3  ;;  %v89_v4 = vld [vmem:[%s88_s14] sm:$0x1]  ;;  %s112_s15 = scalar_lea.vmem %s6514_s29, %s5749_s25  ;;  %s116_s17 = scalar_lea.vmem %s6514_s29, %s5751_s26 }
  0x34   :  { %v93_v5 = vld [vmem:[%s92_s12] sm:$0x1]  ;;  %90 = vst.msk [vmem:[#allocation2 + $0x4] sm:$0x1] %vm73_vm0, %v89_v4  ;;  %s4844_s23 = sld [smem:[#allocation3 + $0xc]]  ;;  %s4845_s24 = sld [smem:[#allocation3 + $0xd]] }
  0x35   :  { %94 = vst.msk [vmem:[#allocation2 + $0x5] sm:$0x1] %vm73_vm0, %v93_v5  ;;  %v97_v6 = vld [vmem:[%s96_s8] sm:$0x1]  ;;  %s4846_s0 = sld [smem:[#allocation3 + $0xe]]  ;;  %s4847_s12 = sld [smem:[#allocation3 + $0xf]] }
  0x36   :  { %v101_v7 = vld [vmem:[%s100_s30] sm:$0x1]  ;;  %98 = vst.msk [vmem:[#allocation2 + $0x6] sm:$0x1] %vm73_vm0, %v97_v6  ;;  %s5638_s26 = smov 88   ;;  %s5641_s11 = smov 64  }
  0x37   :  { %102 = vst.msk [vmem:[#allocation2 + $0x7] sm:$0x1] %vm73_vm0, %v101_v7  ;;  %v105_v8 = vld [vmem:[%s104_s1] sm:$0x1]  ;;  %s5644_s18 = smov 56   ;;  %s6518_s21 = sld [smem:[#allocation14_spill]] }
  0x38   :  { %v109_v9 = vld [vmem:[%s108_s28] sm:$0x1]  ;;  %106 = vst.msk [vmem:[#allocation2 + $0x8] sm:$0x1] %vm73_vm0, %v105_v8  ;;  %s5647_s28 = smov 48   ;;  %s6519_s19 = sld [smem:[#allocation16_spill]] }
  0x39   :  { %110 = vst.msk [vmem:[#allocation2 + $0x9] sm:$0x1] %vm73_vm0, %v109_v9  ;;  %v113_v10 = vld [vmem:[%s112_s15] sm:$0x1]  ;;  %s5648_s15 = smov 40   ;;  %s6521_s25 = sld [smem:[#allocation17_spill]] }
  0x3a   :  { %v117_v11 = vld [vmem:[%s116_s17] sm:$0x1]  ;;  %114 = vst.msk [vmem:[#allocation2 + $0xa] sm:$0x1] %vm73_vm0, %v113_v10  ;;  %s120_s8 = scalar_lea.vmem %s6514_s29, %s4844_s23  ;;  %s124_s30 = scalar_lea.vmem %s6514_s29, %s4845_s24 }
  0x3b   :  { %118 = vst.msk [vmem:[#allocation2 + $0xb] sm:$0x1] %vm73_vm0, %v117_v11  ;;  %v121_v15 = vld [vmem:[%s120_s8] sm:$0x1]  ;;  %s128_s1 = scalar_lea.vmem %s6514_s29, %s4846_s0  ;;  %s132_s27 = scalar_lea.vmem %s6514_s29, %s4847_s12 }
  0x3c   :  { %122 = vst.msk [vmem:[#allocation2 + $0xc] sm:$0x1] %vm73_vm0, %v121_v15  ;;  %v125_v16 = vld [vmem:[%s124_s30] sm:$0x1]  ;;  %s5640_s8 = smov 120   ;;  %s5643_s30 = smov 112  }
  0x3d   :  { %v129_v17 = vld [vmem:[%s128_s1] sm:$0x1]  ;;  %126 = vst.msk [vmem:[#allocation2 + $0xd] sm:$0x1] %vm73_vm0, %v125_v16  ;;  %s5646_s29 = smov 104   ;;  %s6515_s24 = sld [smem:[#allocation11_spill]] }
  0x3e   :  { %v136_v13 = vld [vmem:[#allocation2] sm:$0xff]  ;;  %130 = vst.msk [vmem:[#allocation2 + $0xe] sm:$0x1] %vm73_vm0, %v129_v17  ;;  %s6517_s1 = sld [smem:[#allocation13_spill]]  ;;  %s6520_s23 = sld [smem:[#allocation15_spill]] }
  0x3f   :  { %v5811_v14 = vadd.f32 %v136_v13, %v135_v12  ;;  %v133_v19 = vld [vmem:[%s132_s27] sm:$0x1]  ;;  %s5645_s27 = smov 72  }
  0x40   :  { %134 = vst.msk [vmem:[#allocation2 + $0xf] sm:$0x1] %vm73_vm0, %v133_v19  ;;  %v5905_v19 = vld [vmem:[%s6481_s7 + $0x8] sm:$0xff] }
  0x41   :  { %v143_v18 = vsel %vm142_vm1, %v5811_v14, 0.0 }
  0x42   :  { %144 = vadd.xlane.f32.xlu0 %v143_v18 }
  0x47   :  { %v137_v20 = vld [vmem:[#allocation2 + $0x8] sm:$0xff] }
  0x48   :  { %v5828_v21 = vadd.f32 %v137_v20, %v135_v12 }
  0x4a   :  { %v146_v22 = vsel %vm142_vm1, %v5828_v21, 0.0 }
  0x4b   :  { %147 = vadd.xlane.f32.xlu0 %v146_v22 }
  0xcf   :  { %v145_v23 = vpop.xlane.xlu0 %144 }
  0xd0   :  { %v150_v24 = vmul.f32 0.03125, %v145_v23 }
  0xd2   :  { %v152_v25 = vsub.f32 %v5811_v14, %v150_v24 }
  0xd4   :  { %v154_v26 = vmul.f32 %v152_v25, %v152_v25 }
  0xd6   :  { %v156_v27 = vsel %vm142_vm1, %v154_v26, 0.0 }
  0xd7   :  { %157 = vadd.xlane.f32.xlu1 %v156_v27 }
  0xd8   :  { %v148_v28 = vpop.xlane.xlu0 %147 }
  0xd9   :  { %v151_v29 = vmul.f32 0.03125, %v148_v28  ;;  %v5919_v28 = vld [vmem:[%s6481_s7] sm:$0xff] }
  0xdb   :  { %v153_v30 = vsub.f32 %v5828_v21, %v151_v29 }
  0xdd   :  { %v155_v31 = vmul.f32 %v153_v30, %v153_v30 }
  0xdf   :  { %v159_v32 = vsel %vm142_vm1, %v155_v31, 0.0 }
  0xe0   :  { %160 = vadd.xlane.f32.xlu1 %v159_v32 }
 0x164   :  { %v158_v39 = vpop.xlane.xlu1 %157 }
 0x165   :  { %v162_v40 = vmul.f32 0.03125, %v158_v39 }
 0x167   :  { %v164_v41 = vadd.f32 1e-05, %v162_v40 }
 0x169   :  { %5513 = vrsqrt.f32 %v164_v41 }
 0x16d   :  { %v161_v42 = vpop.xlane.xlu1 %160 }
 0x16e   :  { %v163_v43 = vmul.f32 0.03125, %v161_v42 }
 0x170   :  { %v165_v44 = vadd.f32 1e-05, %v163_v43 }
 0x172   :  { %5515 = vrsqrt.f32 %v165_v44 }
 0x173   :  { %v5514_v45 = vpop.eup %5513 }
 0x174   :  { %v168_v47 = vmul.f32 %v5514_v45, %v152_v25 }
 0x176   :  { %v176_v49 = vmul.f32 %v4848_v46, %v168_v47 }
 0x178   :  { %v184_v50 = vadd.f32 %v4849_v48, %v176_v49 }
 0x17a   :  { %5118 = vmatprep.mubr.msk.f32.mxu0 %vm142_vm1, %v184_v50 }
 0x17c   :  { %v5516_v51 = vpop.eup %5515 }
 0x17d   :  { %v169_v52 = vmul.f32 %v5516_v51, %v153_v30 }
 0x17f   :  { %v177_v53 = vmul.f32 %v4848_v46, %v169_v52 }
 0x181   :  { %v185_v54 = vadd.f32 %v4849_v48, %v177_v53 }
 0x183   :  { %5119 = vmatmul.mubr.msk.f32.vlgmr.msra.gmra.mrb[0].mxu0 %vm142_vm1, %v185_v54  ;;  %v5956_v54 = vld [vmem:[%s6481_s7 + $0x10] sm:$0xff] }
 0x184   :  { %5123 = vmatprep.mubr.msk.f32.mxu0 %vm5637_vm2, %v5636_v55 }
 0x256   :  { %v5120_v57 = vpop.f32.mrb[0].mxu0 }
 0x257   :  { %v5865_v58 = vadd.f32 %v5120_v57, %v4850_v56  ;;  %v269_v59 = vpop.f32.mrb[1].mxu0 }
 0x258   :  { %v5867_v60 = vadd.f32 %v4850_v56, %v269_v59 }
 0x25a   :  { %451 = vrot.lane.b32.xlu1 %v5867_v60, %s5638_s26  ;;  %284 = vrot.lane.b32.xlu0 %v5867_v60, %s5639_s10  ;;  %v5874_v61 = vmul.f32 0.35355338, %v5867_v60 }
 0x25e   :  { %449 = vrot.lane.b32.xlu1 %v5874_v61, %s5640_s8 }
 0x2cc   :  { %v285_v62 = vpop.permute.xlu0 %284  ;;  %v452_v63 = vpop.permute.xlu1 %451 }
 0x2cd   :  { %5122 = vmatpush3.xpose.msk.msra.mxu0 %vm286_vm3, %v285_v62 }
 0x2ce   :  { %5131 = vmatprep.subr.mxu0 %v5636_v55 }
 0x2d0   :  { %5124 = vmatmul.mubr.msk.f32.vlgmr.msra.gmra.mrb[2].mxu0 %vm286_vm3, %v5874_v61  ;;  %v450_v0 = vpop.permute.xlu1 %449 }
 0x2d1   :  { %5132 = vmatpush3.xpose.msk.msra.mxu0 %vm286_vm3, %v452_v63  ;;  %5133 = vmatprep.mubr.msk.f32.mxu0 %vm5637_vm2, %v5636_v55 }
 0x2d2   :  { %5141 = vmatprep.subr.mxu0 %v5636_v55 }
 0x2d4   :  { %5134 = vmatmul.mubr.msk.f32.vlgmr.msra.gmra.mrb[4].mxu0 %vm286_vm3, %v450_v0 }
 0x2d5   :  { %5143 = vmatprep.mubr.msk.f32.mxu0 %vm5637_vm2, %v5636_v55  ;;  %5142 = vmatpush3.msra.mxu0 %v5905_v19 }
 0x2d6   :  { %5151 = vmatprep.subr.mxu0 %v5636_v55 }
 0x3a3   :  { %v358_v1 = vpop.f32.mrb[2].mxu0 }
 0x3a4   :  { %v5125_v2 = vpop.f32.mrb[3].mxu0  ;;  %v362_v3 = vsel %vm286_vm3, %v358_v1, -inf }
 0x3a5   :  { %363 = vmax.xlane.f32.xlu1 %v362_v3 }
 0x3a7   :  { %v523_v4 = vpop.f32.mrb[4].mxu0 }
 0x3a8   :  { %v5135_v5 = vpop.f32.mrb[5].mxu0  ;;  %v527_v6 = vsel %vm286_vm3, %v523_v4, -inf }
 0x3a9   :  { %528 = vmax.xlane.f32.xlu0 %v527_v6  ;;  %v5971_v5 = vmul.f32 0.35355338, %v5865_v58 }
 0x3b6   :  { %373 = vrot.lane.b32.xlu1 %v5867_v60, %s5641_s11 }
 0x3ba   :  { %762 = vrot.lane.b32.xlu1 %v5867_v60, %s5642_s13 }
 0x3be   :  { %760 = vrot.lane.b32.xlu1 %v5874_v61, %s5643_s30 }
 0x432   :  { %v364_v7 = vpop.xlane.xlu1 %363 }
 0x433   :  { %v365_v8 = vsub.f32 %v358_v1, %v364_v7 }
 0x435   :  { %v366_v9 = vmul.f32 1.442695, %v365_v8 }
 0x436   :  { %v374_v10 = vpop.permute.xlu1 %373  ;;  %v529_v11 = vpop.xlane.xlu0 %528 }
 0x437   :  { %5517 = vpow2.f32 %v366_v9  ;;  %v530_v12 = vsub.f32 %v523_v4, %v529_v11  ;;  %5127 = vmatpush3.msra.mxu1 %v374_v10 }
 0x438   :  { %5136 = vmatprep.subr.mxu1 %v5636_v55 }
 0x439   :  { %v531_v13 = vmul.f32 1.442695, %v530_v12 }
 0x43a   :  { %v763_v31 = vpop.permute.xlu1 %762 }
 0x43b   :  { %5519 = vpow2.f32 %v531_v13 }
 0x43e   :  { %v761_v34 = vpop.permute.xlu1 %760 }
 0x441   :  { %v5518_v15 = vpop.eup %5517 }
 0x442   :  { %v368_v16 = vsel %vm286_vm3, %v5518_v15, 0.0 }
 0x443   :  { %369 = vadd.xlane.f32.xlu0 %v368_v16 }
 0x445   :  { %v5520_v17 = vpop.eup %5519 }
 0x446   :  { %v533_v18 = vsel %vm286_vm3, %v5520_v17, 0.0 }
 0x447   :  { %534 = vadd.xlane.f32.xlu0 %v533_v18 }
 0x45d   :  { %538 = vrot.lane.b32.xlu0 %v5867_v60, %s5644_s18 }
 0x4d0   :  { %v370_v20 = vpop.xlane.xlu0 %369 }
 0x4d1   :  { %5521 = vrcp.f32 %v370_v20 }
 0x4d4   :  { %v535_v22 = vpop.xlane.xlu0 %534 }
 0x4d5   :  { %5523 = vrcp.f32 %v535_v22 }
 0x4d8   :  { %v539_v25 = vpop.permute.xlu0 %538 }
 0x4db   :  { %v5522_v23 = vpop.eup %5521 }
 0x4dc   :  { %v372_v24 = vmul.f32 %v5522_v23, %v5518_v15  ;;  %v5994_v15 = vld [vmem:[%s6481_s7 + $0x18] sm:$0xff] }
 0x4de   :  { %5129 = vmatmul.mubr.msk.f32.vlgmr.msra.gmra.mrb[0].mxu1 %vm286_vm3, %v372_v24 }
 0x4df   :  { %v5524_v26 = vpop.eup %5523  ;;  %5137 = vmatpush3.msra.mxu1 %v539_v25  ;;  %5138 = vmatprep.mubr.msk.f32.mxu1 %vm5637_vm2, %v5636_v55 }
 0x4e0   :  { %v537_v27 = vmul.f32 %v5524_v26, %v5520_v17  ;;  %5146 = vmatprep.subr.mxu1 %v5636_v55 }
 0x4e2   :  { %5139 = vmatmul.mubr.msk.f32.vlgmr.msra.gmra.mrb[2].mxu1 %vm286_vm3, %v537_v27 }
 0x4e3   :  { %5148 = vmatprep.mubr.msk.f32.mxu1 %vm5637_vm2, %v5636_v55  ;;  %5147 = vmatpush3.msra.mxu1 %v5919_v28 }
 0x4e4   :  { %5156 = vmatprep.subr.mxu1 %v5636_v55 }
 0x5b1   :  { %v445_v29 = vpop.f32.mrb[0].mxu1 }
 0x5b2   :  { %v5130_v30 = vpop.f32.mrb[1].mxu1  ;;  %5149 = vmatmul.mubr.msk.f32.vlgmr.msra.gmra.mrb[4].mxu1 %vm286_vm3, %v445_v29 }
 0x5b3   :  { %5158 = vmatprep.mubr.msk.f32.mxu1 %vm5637_vm2, %v5636_v55 }
 0x5b5   :  { %v610_v32 = vpop.f32.mrb[2].mxu1 }
 0x5b6   :  { %v5140_v33 = vpop.f32.mrb[3].mxu1  ;;  %5144 = vmatmul.mubr.msk.f32.vlgmr.msra.gmra.mrb[6].mxu0 %vm286_vm3, %v610_v32 }
 0x5b7   :  { %5152 = vmatpush3.xpose.msk.msra.mxu0 %vm286_vm3, %v763_v31  ;;  %5153 = vmatprep.mubr.msk.f32.mxu0 %vm5637_vm2, %v5636_v55 }
 0x5b8   :  { %5161 = vmatprep.subr.mxu0 %v5636_v55 }
 0x5ba   :  { %5154 = vmatmul.mubr.msk.f32.vlgmr.msra.gmra.mrb[8].mxu0 %vm286_vm3, %v761_v34 }
 0x5bb   :  { %5163 = vmatprep.mubr.msk.f32.mxu0 %vm5637_vm2, %v5636_v55  ;;  %5162 = vmatpush3.msra.mxu0 %v5956_v54 }
 0x5bc   :  { %5171 = vmatprep.subr.mxu0 %v5636_v55 }
 0x685   :  { %v756_v35 = vpop.f32.mrb[4].mxu1 }
 0x686   :  { %v5150_v36 = vpop.f32.mrb[5].mxu1 }
 0x689   :  { %v683_v37 = vpop.f32.mrb[6].mxu0 }
 0x68a   :  { %v757_v38 = vadd.f32 %v756_v35, %v683_v37  ;;  %v5145_v39 = vpop.f32.mrb[7].mxu0 }
 0x68d   :  { %v834_v40 = vpop.f32.mrb[8].mxu0 }
 0x68e   :  { %v5155_v41 = vpop.f32.mrb[9].mxu0  ;;  %v838_v42 = vsel %vm286_vm3, %v834_v40, -inf }
 0x68f   :  { %839 = vmax.xlane.f32.xlu1 %v838_v42 }
 0x6a0   :  { %1001 = vrot.lane.b32.xlu1 %v5867_v60, %s5645_s27 }
 0x6a4   :  { %999 = vrot.lane.b32.xlu1 %v5874_v61, %s5646_s29 }
 0x6a8   :  { %1240 = vrot.lane.b32.xlu1 %v5865_v58, %s5639_s10 }
 0x71c   :  { %v840_v43 = vpop.xlane.xlu1 %839 }
 0x71d   :  { %v841_v44 = vsub.f32 %v834_v40, %v840_v43 }
 0x71f   :  { %v842_v45 = vmul.f32 1.442695, %v841_v44 }
 0x720   :  { %v1002_v51 = vpop.permute.xlu1 %1001 }
 0x721   :  { %5525 = vpow2.f32 %v842_v45 }
 0x724   :  { %v1000_v53 = vpop.permute.xlu1 %999 }
 0x728   :  { %v1241_v8 = vpop.permute.xlu1 %1240 }
 0x72b   :  { %v5526_v46 = vpop.eup %5525 }
 0x72c   :  { %v844_v47 = vsel %vm286_vm3, %v5526_v46, 0.0 }
 0x72d   :  { %845 = vadd.xlane.f32.xlu0 %v844_v47 }
 0x743   :  { %849 = vrot.lane.b32.xlu0 %v5867_v60, %s5647_s28 }
 0x7ba   :  { %v846_v48 = vpop.xlane.xlu0 %845 }
 0x7bb   :  { %5527 = vrcp.f32 %v846_v48 }
 0x7be   :  { %v850_v49 = vpop.permute.xlu0 %849 }
 0x7bf   :  { %5157 = vmatpush3.msra.mxu1 %v850_v49 }
 0x7c0   :  { %5166 = vmatprep.subr.mxu1 %v5636_v55 }
 0x7c5   :  { %v5528_v50 = vpop.eup %5527 }
 0x7c6   :  { %v848_v52 = vmul.f32 %v5528_v50, %v5526_v46 }
 0x7c8   :  { %5159 = vmatmul.mubr.msk.f32.vlgmr.msra.gmra.mrb[6].mxu1 %vm286_vm3, %v848_v52 }
 0x7c9   :  { %5167 = vmatpush3.xpose.msk.msra.mxu1 %vm286_vm3, %v1002_v51  ;;  %5168 = vmatprep.mubr.msk.f32.mxu1 %vm5637_vm2, %v5636_v55 }
 0x7ca   :  { %5176 = vmatprep.subr.mxu1 %v5636_v55 }
 0x7cc   :  { %5169 = vmatmul.mubr.msk.f32.vlgmr.msra.gmra.mrb[8].mxu1 %vm286_vm3, %v1000_v53 }
 0x7cd   :  { %5178 = vmatprep.mubr.msk.f32.mxu1 %vm5637_vm2, %v5636_v55  ;;  %5177 = vmatpush3.msra.mxu1 %v5994_v15 }
 0x7ce   :  { %5186 = vmatprep.subr.mxu1 %v5636_v55 }
 0x89b   :  { %v921_v56 = vpop.f32.mrb[6].mxu1 }
 0x89c   :  { %v5160_v57 = vpop.f32.mrb[7].mxu1  ;;  %5164 = vmatmul.mubr.msk.f32.vlgmr.msra.gmra.mrb[10].mxu0 %vm286_vm3, %v921_v56 }
 0x89d   :  { %5173 = vmatprep.mubr.msk.f32.mxu0 %vm5637_vm2, %v5636_v55 }
 0x89f   :  { %v1073_v59 = vpop.f32.mrb[8].mxu1 }
 0x8a0   :  { %v5170_v61 = vpop.f32.mrb[9].mxu1  ;;  %v1077_v62 = vsel %vm286_vm3, %v1073_v59, -inf }
 0x8a1   :  { %1078 = vmax.xlane.f32.xlu0 %v1077_v62 }
 0x8b7   :  { %1088 = vrot.lane.b32.xlu0 %v5867_v60, %s5648_s15 }
 0x8bb   :  { %1406 = vrot.lane.b32.xlu0 %v5865_v58, %s5638_s26 }
 0x92e   :  { %v1079_v63 = vpop.xlane.xlu0 %1078 }
 0x92f   :  { %v1080_v0 = vsub.f32 %v1073_v59, %v1079_v63 }
 0x931   :  { %v1081_v1 = vmul.f32 1.442695, %v1080_v0 }
 0x932   :  { %v1089_v2 = vpop.permute.xlu0 %1088 }
 0x933   :  { %5529 = vpow2.f32 %v1081_v1  ;;  %5172 = vmatpush3.msra.mxu0 %v1089_v2 }
 0x934   :  { %5181 = vmatprep.subr.mxu0 %v5636_v55 }
 0x936   :  { %v1407_v12 = vpop.permute.xlu0 %1406 }
 0x93d   :  { %v5530_v3 = vpop.eup %5529 }
 0x93e   :  { %v1083_v4 = vsel %vm286_vm3, %v5530_v3, 0.0 }
 0x93f   :  { %1084 = vadd.xlane.f32.xlu1 %v1083_v4 }
 0x950   :  { %1404 = vrot.lane.b32.xlu1 %v5971_v5, %s5640_s8 }
 0x96f   :  { %v994_v60 = vpop.f32.mrb[10].mxu0 }
 0x970   :  { %v998_v6 = vadd.f32 %v994_v60, %v757_v38  ;;  %v5165_v7 = vpop.f32.mrb[11].mxu0 }
 0x9cc   :  { %v1085_v9 = vpop.xlane.xlu1 %1084 }
 0x9cd   :  { %5531 = vrcp.f32 %v1085_v9  ;;  %v4885_v9 = vld [vmem:[%s6515_s24] ss:$0 sm:$0xff] }
 0x9d0   :  { %v1405_v13 = vpop.permute.xlu1 %1404 }
 0x9d7   :  { %v5532_v10 = vpop.eup %5531 }
 0x9d8   :  { %v1087_v11 = vmul.f32 %v5532_v10, %v5530_v3 }
 0x9da   :  { %5174 = vmatmul.mubr.msk.f32.vlgmr.msra.gmra.mrb[12].mxu0 %vm286_vm3, %v1087_v11 }
 0x9db   :  { %5182 = vmatpush3.xpose.msk.msra.mxu0 %vm286_vm3, %v1241_v8  ;;  %5183 = vmatprep.mubr.msk.f32.mxu0 %vm5637_vm2, %v5636_v55 }
 0x9dc   :  { %5191 = vmatprep.subr.mxu0 %v5636_v55 }
 0x9de   :  { %5184 = vmatmul.mubr.msk.f32.vlgmr.msra.gmra.mrb[14].mxu0 %vm286_vm3, %v5971_v5 }
 0x9df   :  { %5192 = vmatpush3.xpose.msk.msra.mxu0 %vm286_vm3, %v1407_v12  ;;  %5193 = vmatprep.mubr.msk.f32.mxu0 %vm5637_vm2, %v5636_v55 }
 0x9e0   :  { %5201 = vmatprep.subr.mxu0 %v5636_v55 }
 0x9e2   :  { %5194 = vmatmul.mubr.msk.f32.vlgmr.msra.gmra.mrb[16].mxu0 %vm286_vm3, %v1405_v13 }
 0x9e3   :  { %5202 = vmatpush3.msra.mxu0 %v5905_v19  ;;  %5203 = vmatprep.mubr.msk.f32.mxu0 %vm5637_vm2, %v5636_v55 }
 0x9e4   :  { %5211 = vmatprep.subr.mxu0 %v5636_v55 }
 0xaad   :  { %v1160_v16 = vpop.f32.mrb[12].mxu0 }
 0xaae   :  { %v5175_v17 = vpop.f32.mrb[13].mxu0  ;;  %5179 = vmatmul.mubr.msk.f32.vlgmr.msra.gmra.mrb[10].mxu1 %vm286_vm3, %v1160_v16 }
 0xaaf   :  { %5188 = vmatprep.mubr.msk.f32.mxu1 %vm5637_vm2, %v5636_v55 }
 0xab1   :  { %v1313_v18 = vpop.f32.mrb[14].mxu0 }
 0xab2   :  { %v5185_v19 = vpop.f32.mrb[15].mxu0  ;;  %v1317_v20 = vsel %vm286_vm3, %v1313_v18, -inf }
 0xab3   :  { %1318 = vmax.xlane.f32.xlu0 %v1317_v20 }
 0xab5   :  { %v1478_v22 = vpop.f32.mrb[16].mxu0 }
 0xab6   :  { %v5195_v23 = vpop.f32.mrb[17].mxu0  ;;  %v1482_v24 = vsel %vm286_vm3, %v1478_v22, -inf }
 0xab7   :  { %1483 = vmax.xlane.f32.xlu1 %v1482_v24 }
 0xac8   :  { %1493 = vrot.lane.b32.xlu1 %v5865_v58, %s5644_s18 }
 0xacc   :  { %1717 = vrot.lane.b32.xlu1 %v5865_v58, %s5642_s13 }
 0xad0   :  { %1715 = vrot.lane.b32.xlu1 %v5971_v5, %s5643_s30 }
 0xb40   :  { %v1319_v25 = vpop.xlane.xlu0 %1318 }
 0xb41   :  { %v1320_v26 = vsub.f32 %v1313_v18, %v1319_v25 }
 0xb43   :  { %v1321_v27 = vmul.f32 1.442695, %v1320_v26 }
 0xb44   :  { %v1484_v29 = vpop.xlane.xlu1 %1483 }
 0xb45   :  { %5533 = vpow2.f32 %v1321_v27  ;;  %v1485_v30 = vsub.f32 %v1478_v22, %v1484_v29 }
 0xb47   :  { %v1486_v31 = vmul.f32 1.442695, %v1485_v30 }
 0xb48   :  { %v1494_v44 = vpop.permute.xlu1 %1493 }
 0xb49   :  { %5535 = vpow2.f32 %v1486_v31 }
 0xb4c   :  { %v1718_v49 = vpop.permute.xlu1 %1717 }
 0xb4f   :  { %v5534_v32 = vpop.eup %5533 }
 0xb50   :  { %v1323_v33 = vsel %vm286_vm3, %v5534_v32, 0.0 }
 0xb51   :  { %1324 = vadd.xlane.f32.xlu0 %v1323_v33 }
 0xb53   :  { %v5536_v34 = vpop.eup %5535 }
 0xb54   :  { %v1488_v35 = vsel %vm286_vm3, %v5536_v34, 0.0 }
 0xb55   :  { %1489 = vadd.xlane.f32.xlu0 %v1488_v35 }
 0xb6b   :  { %1328 = vrot.lane.b32.xlu0 %v5865_v58, %s5641_s11 }
 0xb81   :  { %v1233_v36 = vpop.f32.mrb[10].mxu1 }
 0xb82   :  { %v6013_v37 = vadd.f32 %v1233_v36, %v998_v6  ;;  %v5180_v38 = vpop.f32.mrb[11].mxu1 }
 0xb84   :  { %v2200_v11 = vadd.f32 %v4885_v9, %v6013_v37 }
 0xb86   :  { %v6064_v16 = vadd.f32 %v2200_v11, %v5811_v14 }
 0xb88   :  { %v2206_v18 = vsel %vm142_vm1, %v6064_v16, 0.0 }
 0xbde   :  { %v1325_v39 = vpop.xlane.xlu0 %1324 }
 0xbdf   :  { %5537 = vrcp.f32 %v1325_v39 }
 0xbe2   :  { %v1490_v40 = vpop.xlane.xlu0 %1489 }
 0xbe3   :  { %5539 = vrcp.f32 %v1490_v40 }
 0xbe6   :  { %v1329_v41 = vpop.permute.xlu0 %1328 }
 0xbe7   :  { %5187 = vmatpush3.msra.mxu1 %v1329_v41 }
 0xbe8   :  { %5196 = vmatprep.subr.mxu1 %v5636_v55 }
 0xbe9   :  { %v5538_v42 = vpop.eup %5537 }
 0xbea   :  { %v1327_v43 = vmul.f32 %v5538_v42, %v5534_v32 }
 0xbec   :  { %5189 = vmatmul.mubr.msk.f32.vlgmr.msra.gmra.mrb[12].mxu1 %vm286_vm3, %v1327_v43 }
 0xbed   :  { %v5540_v45 = vpop.eup %5539  ;;  %5197 = vmatpush3.msra.mxu1 %v1494_v44  ;;  %5198 = vmatprep.mubr.msk.f32.mxu1 %vm5637_vm2, %v5636_v55 }
 0xbee   :  { %v1492_v46 = vmul.f32 %v5540_v45, %v5536_v34  ;;  %5206 = vmatprep.subr.mxu1 %v5636_v55 }
 0xbf0   :  { %5199 = vmatmul.mubr.msk.f32.vlgmr.msra.gmra.mrb[14].mxu1 %vm286_vm3, %v1492_v46 }
 0xbf1   :  { %5207 = vmatpush3.msra.mxu1 %v5919_v28  ;;  %5208 = vmatprep.mubr.msk.f32.mxu1 %vm5637_vm2, %v5636_v55  ;;  %v1716_v28 = vpop.permute.xlu1 %1715 }
 0xbf2   :  { %5216 = vmatprep.subr.mxu1 %v5636_v55 }
 0xcbf   :  { %v1400_v47 = vpop.f32.mrb[12].mxu1 }
 0xcc0   :  { %v5190_v48 = vpop.f32.mrb[13].mxu1  ;;  %5209 = vmatmul.mubr.msk.f32.vlgmr.msra.gmra.mrb[16].mxu1 %vm286_vm3, %v1400_v47 }
 0xcc1   :  { %5218 = vmatprep.mubr.msk.f32.mxu1 %vm5637_vm2, %v5636_v55 }
 0xcc3   :  { %v1565_v50 = vpop.f32.mrb[14].mxu1 }
 0xcc4   :  { %v5200_v51 = vpop.f32.mrb[15].mxu1  ;;  %5204 = vmatmul.mubr.msk.f32.vlgmr.msra.gmra.mrb[18].mxu0 %vm286_vm3, %v1565_v50 }
 0xcc5   :  { %5212 = vmatpush3.xpose.msk.msra.mxu0 %vm286_vm3, %v1718_v49  ;;  %5213 = vmatprep.mubr.msk.f32.mxu0 %vm5637_vm2, %v5636_v55 }
 0xcc6   :  { %5221 = vmatprep.subr.mxu0 %v5636_v55 }
 0xcc8   :  { %5214 = vmatmul.mubr.msk.f32.vlgmr.msra.gmra.mrb[20].mxu0 %vm286_vm3, %v1716_v28  ;;  %v4886_v28 = vld [vmem:[%s6516_s9] ss:$0 sm:$0xff] }
 0xcc9   :  { %5222 = vmatpush3.msra.mxu0 %v5956_v54  ;;  %5223 = vmatprep.mubr.msk.f32.mxu0 %vm5637_vm2, %v5636_v55 }
 0xcca   :  { %5231 = vmatprep.subr.mxu0 %v5636_v55 }
 0xd93   :  { %v1711_v52 = vpop.f32.mrb[16].mxu1 }
 0xd94   :  { %v5210_v53 = vpop.f32.mrb[17].mxu1 }
 0xd95   :  { %v4887_v53 = vld [vmem:[%s6517_s1] ss:$0 sm:$0xff] }
 0xd97   :  { %v1638_v56 = vpop.f32.mrb[18].mxu0 }
 0xd98   :  { %v1712_v57 = vadd.f32 %v1711_v52, %v1638_v56  ;;  %v5205_v59 = vpop.f32.mrb[19].mxu0 }
 0xd99   :  { %v2248_v59 = vld [vmem:[%s6518_s21] sm:$0xff] }
 0xd9b   :  { %v1789_v61 = vpop.f32.mrb[20].mxu0 }
 0xd9c   :  { %v5215_v62 = vpop.f32.mrb[21].mxu0  ;;  %v1793_v63 = vsel %vm286_vm3, %v1789_v61, -inf }
 0xd9d   :  { %1794 = vmax.xlane.f32.xlu0 %v1793_v63  ;;  %v2250_v63 = vld [vmem:[%s6518_s21 + $0x10] sm:$0xff] }
 0xdb3   :  { %1804 = vrot.lane.b32.xlu0 %v5865_v58, %s5647_s28 }
 0xdb7   :  { %1954 = vrot.lane.b32.xlu0 %v5971_v5, %s5646_s29 }
 0xe2a   :  { %v1795_v54 = vpop.xlane.xlu0 %1794 }
 0xe2b   :  { %v1796_v0 = vsub.f32 %v1789_v61, %v1795_v54  ;;  %v2249_v61 = vld [vmem:[%s6518_s21 + $0x8] sm:$0xff]  ;;  %v2251_v54 = vld [vmem:[%s6518_s21 + $0x18] sm:$0xff] }
 0xe2c   :  { %v5440_v62 = vpack.c.bf16 %v2249_v61, %v2248_v59  ;;  %v4896_v61 = vld [vmem:[%s6477_s3 + $0x1] ss:$0 sm:$0xff] }
 0xe2d   :  { %v1797_v1 = vmul.f32 1.442695, %v1796_v0  ;;  %v5444_v0 = vpack.c.bf16 %v2251_v54, %v2250_v63  ;;  %v4897_v63 = vld [vmem:[%s6478_s4 + $0x1] ss:$0 sm:$0xff] }
 0xe2e   :  { %v1805_v2 = vpop.permute.xlu0 %1804 }
 0xe2f   :  { %5541 = vpow2.f32 %v1797_v1  ;;  %5217 = vmatpush3.msra.mxu1 %v1805_v2  ;;  %v2342_v1 = vld [vmem:[%s6519_s19] sm:$0xff]  ;;  %v2343_v2 = vld [vmem:[%s6519_s19 + $0x8] sm:$0xff] }
 0xe30   :  { %5226 = vmatprep.subr.mxu1 %v5636_v55 }
 0xe32   :  { %v1955_v8 = vpop.permute.xlu0 %1954 }
 0xe39   :  { %v5542_v3 = vpop.eup %5541 }
 0xe3a   :  { %v1799_v4 = vsel %vm286_vm3, %v5542_v3, 0.0 }
 0xe3b   :  { %1800 = vadd.xlane.f32.xlu1 %v1799_v4  ;;  %v5448_v4 = vpack.c.bf16 %v2343_v2, %v2342_v1 }
 0xe4c   :  { %1956 = vrot.lane.b32.xlu1 %v5865_v58, %s5645_s27 }
 0xec8   :  { %v1801_v60 = vpop.xlane.xlu1 %1800 }
 0xec9   :  { %5543 = vrcp.f32 %v1801_v60  ;;  %v2345_v60 = vld [vmem:[%s6519_s19 + $0x18] sm:$0xff] }
 0xecc   :  { %v1957_v5 = vpop.permute.xlu1 %1956 }
 0xed3   :  { %v5544_v6 = vpop.eup %5543 }
 0xed4   :  { %v1803_v7 = vmul.f32 %v5544_v6, %v5542_v3  ;;  %v2344_v3 = vld [vmem:[%s6519_s19 + $0x10] sm:$0xff] }
 0xed5   :  { %v5452_v6 = vpack.c.bf16 %v2345_v60, %v2344_v3  ;;  %v4903_v60 = vld [vmem:[%s6480_s6 + $0x1] ss:$0 sm:$0xff] }
 0xed6   :  { %5219 = vmatmul.mubr.msk.f32.vlgmr.msra.gmra.mrb[18].mxu1 %vm286_vm3, %v1803_v7  ;;  %v2346_v7 = vld [vmem:[%s6519_s19 + $0x20] sm:$0xff] }
 0xed7   :  { %5227 = vmatpush3.xpose.msk.msra.mxu1 %vm286_vm3, %v1957_v5  ;;  %5228 = vmatprep.mubr.msk.f32.mxu1 %vm5637_vm2, %v5636_v55  ;;  %v2347_v5 = vld [vmem:[%s6519_s19 + $0x28] sm:$0xff] }
 0xed8   :  { %5236 = vmatprep.subr.mxu1 %v5636_v55 }
 0xeda   :  { %5229 = vmatmul.mubr.msk.f32.vlgmr.msra.gmra.mrb[20].mxu1 %vm286_vm3, %v1955_v8  ;;  %v5456_v8 = vpack.c.bf16 %v2347_v5, %v2346_v7 }
 0xedb   :  { %5237 = vmatpush3.msra.mxu1 %v5994_v15  ;;  %5238 = vmatprep.mubr.msk.f32.mxu1 %vm5637_vm2, %v5636_v55 }
 0xedc   :  { %5449 = vmatprep.subr.bf16.mxu1 %v5448_v4 }
 0xfa9   :  { %v1876_v10 = vpop.f32.mrb[18].mxu1 }
 0xfaa   :  { %v5220_v12 = vpop.f32.mrb[19].mxu1  ;;  %5224 = vmatmul.mubr.msk.f32.vlgmr.msra.gmra.mrb[22].mxu0 %vm286_vm3, %v1876_v10 }
 0xfab   :  { %5233 = vmatprep.mubr.msk.f32.mxu0 %vm5637_vm2, %v5636_v55 }
 0xfad   :  { %v2028_v13 = vpop.f32.mrb[20].mxu1 }
 0xfae   :  { %v5230_v15 = vpop.f32.mrb[21].mxu1  ;;  %v2032_v17 = vsel %vm286_vm3, %v2028_v13, -inf }
 0xfaf   :  { %2033 = vmax.xlane.f32.xlu1 %v2032_v17 }
 0xfb3   :  { %2207 = vadd.xlane.f32.xlu1 %v2206_v18  ;;  %v2348_v18 = vld [vmem:[%s6519_s19 + $0x30] sm:$0xff] }
0x103c   :  { %v2034_v19 = vpop.xlane.xlu1 %2033 }
0x103d   :  { %v2035_v20 = vsub.f32 %v2028_v13, %v2034_v19  ;;  %v2349_v19 = vld [vmem:[%s6519_s19 + $0x38] sm:$0xff] }
0x103f   :  { %v2036_v22 = vmul.f32 1.442695, %v2035_v20  ;;  %v5460_v20 = vpack.c.bf16 %v2349_v19, %v2348_v18 }
0x1040   :  { %v2208_v34 = vpop.xlane.xlu1 %2207 }
0x1041   :  { %5545 = vpow2.f32 %v2036_v22  ;;  %v2212_v35 = vmul.f32 0.03125, %v2208_v34  ;;  %v4888_v22 = vld [vmem:[%s6520_s23] ss:$0 sm:$0xff] }
0x1043   :  { %v2214_v38 = vsub.f32 %v6064_v16, %v2212_v35 }
0x1045   :  { %v2216_v42 = vmul.f32 %v2214_v38, %v2214_v38 }
0x1047   :  { %v2218_v43 = vsel %vm142_vm1, %v2216_v42, 0.0 }
0x104b   :  { %v5546_v23 = vpop.eup %5545 }
0x104c   :  { %v2038_v24 = vsel %vm286_vm3, %v5546_v23, 0.0 }
0x104d   :  { %2039 = vadd.xlane.f32.xlu0 %v2038_v24 }
0x1063   :  { %2043 = vrot.lane.b32.xlu0 %v5865_v58, %s5648_s15 }
0x107d   :  { %v1949_v14 = vpop.f32.mrb[22].mxu0 }
0x107e   :  { %v1953_v25 = vadd.f32 %v1949_v14, %v1712_v57  ;;  %v5225_v26 = vpop.f32.mrb[23].mxu0 }
0x10da   :  { %v2040_v27 = vpop.xlane.xlu0 %2039 }
0x10db   :  { %5547 = vrcp.f32 %v2040_v27 }
0x10de   :  { %v2044_v29 = vpop.permute.xlu0 %2043 }
0x10df   :  { %5232 = vmatpush3.msra.mxu0 %v2044_v29 }
0x10e0   :  { %5441 = vmatprep.subr.bf16.mxu0 %v5440_v62 }
0x10e5   :  { %v5548_v30 = vpop.eup %5547 }
0x10e6   :  { %v2042_v31 = vmul.f32 %v5548_v30, %v5546_v23  ;;  %v4893_v30 = vld [vmem:[%s6521_s25] ss:$0 sm:$0xff] }
0x10e8   :  { %5234 = vmatmul.mubr.msk.f32.vlgmr.msra.gmra.mrb[24].mxu0 %vm286_vm3, %v2042_v31 }
0x10e9   :  { %5443 = vmatpush3.bf16.msra.mxu0 %v5440_v62 }
0x10ea   :  { %5445 = vmatprep.subr.bf16.mxu0 %v5444_v0 }
0x10ed   :  { %5447 = vmatpush3.bf16.msra.mxu0 %v5444_v0 }
0x11bb   :  { %v2115_v32 = vpop.f32.mrb[24].mxu0 }
0x11bc   :  { %v5235_v33 = vpop.f32.mrb[25].mxu0  ;;  %5239 = vmatmul.mubr.msk.f32.vlgmr.msra.gmra.mrb[22].mxu1 %vm286_vm3, %v2115_v32 }
0x11bd   :  { %5451 = vmatpush3.bf16.msra.mxu1 %v5448_v4 }
0x11be   :  { %5453 = vmatprep.subr.bf16.mxu1 %v5452_v6 }
0x11c1   :  { %5455 = vmatpush3.bf16.msra.mxu1 %v5452_v6 }
0x11c2   :  { %5457 = vmatprep.subr.bf16.mxu1 %v5456_v8 }
0x11c5   :  { %5459 = vmatpush3.bf16.msra.mxu1 %v5456_v8 }
0x11c6   :  { %5461 = vmatprep.subr.bf16.mxu1 %v5460_v20 }
0x11c9   :  { %5463 = vmatpush3.bf16.msra.mxu1 %v5460_v20 }
0x11ca   :  { %5287 = vmatprep.subr.mxu1 %v5636_v55 }
0x128f   :  { %v2188_v36 = vpop.f32.mrb[22].mxu1 }
0x1290   :  { %v2192_v37 = vadd.f32 %v2188_v36, %v1953_v25  ;;  %v5240_v58 = vpop.f32.mrb[23].mxu1 }
0x1292   :  { %v2201_v39 = vadd.f32 %v4885_v9, %v2192_v37 }
0x1294   :  { %v6076_v40 = vadd.f32 %v2201_v39, %v5828_v21 }
0x1296   :  { %v2209_v41 = vsel %vm142_vm1, %v6076_v40, 0.0 }
0x1297   :  { %2210 = vadd.xlane.f32.xlu1 %v2209_v41 }
0x129b   :  { %2219 = vadd.xlane.f32.xlu1 %v2218_v43 }
0x1324   :  { %v2211_v44 = vpop.xlane.xlu1 %2210 }
0x1325   :  { %v2213_v45 = vmul.f32 0.03125, %v2211_v44 }
0x1327   :  { %v2215_v46 = vsub.f32 %v6076_v40, %v2213_v45 }
0x1328   :  { %v2220_v47 = vpop.xlane.xlu1 %2219 }
0x1329   :  { %v2224_v48 = vmul.f32 0.03125, %v2220_v47  ;;  %v2217_v49 = vmul.f32 %v2215_v46, %v2215_v46  ;;  %v4899_v47 = vld [vmem:[%s6479_s5 + $0x28] sm:$0xff] }
0x132b   :  { %v2226_v50 = vadd.f32 1e-05, %v2224_v48  ;;  %v2221_v51 = vsel %vm142_vm1, %v2217_v49, 0.0  ;;  %v4900_v49 = vld [vmem:[%s6479_s5 + $0x30] sm:$0xff] }
0x132c   :  { %2222 = vadd.xlane.f32.xlu1 %v2221_v51 }
0x132d   :  { %5549 = vrsqrt.f32 %v2226_v50  ;;  %v4901_v50 = vld [vmem:[%s6479_s5 + $0x38] sm:$0xff] }
0x132e   :  { %v5468_v51 = vpack.c.bf16 %v4901_v50, %v4900_v49 }
0x1337   :  { %v5550_v21 = vpop.eup %5549 }
0x1338   :  { %v2230_v52 = vmul.f32 %v5550_v21, %v2214_v38 }
0x133a   :  { %v2238_v56 = vmul.f32 %v4886_v28, %v2230_v52 }
0x133c   :  { %v2246_v57 = vadd.f32 %v4887_v53, %v2238_v56 }
0x133e   :  { %5249 = vmatprep.mubr.msk.f32.mxu0 %vm142_vm1, %v2246_v57 }
0x13b9   :  { %v2223_v9 = vpop.xlane.xlu1 %2222 }
0x13ba   :  { %v2225_v10 = vmul.f32 0.03125, %v2223_v9 }
0x13bc   :  { %v2227_v11 = vadd.f32 1e-05, %v2225_v10 }
0x13be   :  { %5551 = vrsqrt.f32 %v2227_v11 }
0x13c8   :  { %v5552_v12 = vpop.eup %5551 }
0x13c9   :  { %v2231_v13 = vmul.f32 %v5552_v12, %v2215_v46  ;;  %v4898_v46 = vld [vmem:[%s6479_s5 + $0x20] sm:$0xff] }
0x13ca   :  { %v5464_v48 = vpack.c.bf16 %v4899_v47, %v4898_v46 }
0x13cb   :  { %v2239_v15 = vmul.f32 %v4886_v28, %v2231_v13 }
0x13cc   :  { %5465 = vmatprep.subr.bf16.mxu0 %v5464_v48 }
0x13cd   :  { %v2247_v17 = vadd.f32 %v4887_v53, %v2239_v15 }
0x13cf   :  { %5250 = vmatmul.mubr.msk.f32.vlgmr.msra.gmra.mrb[26].mxu0 %vm142_vm1, %v2247_v17 }
0x13d0   :  { %5467 = vmatpush3.bf16.msra.mxu0 %v5464_v48 }
0x13d1   :  { %5469 = vmatprep.subr.bf16.mxu0 %v5468_v51 }
0x13d4   :  { %5471 = vmatpush3.bf16.msra.mxu0 %v5468_v51 }
0x13d5   :  { %5282 = vmatprep.subr.mxu0 %v5636_v55 }
0x14a2   :  { %v5251_v23 = vpop.f32.mrb[26].mxu0 }
0x14a3   :  { %v2337_v24 = vadd.f32 %v5251_v23, %v4888_v22  ;;  %v2331_v14 = vpop.f32.mrb[27].mxu0 }
0x14a4   :  { %v2332_v25 = vadd.f32 %v4888_v22, %v2331_v14 }
0x14a5   :  { %v2341_v27 = vmax.f32 %v2337_v24, 0.0 }
0x14a6   :  { %v2340_v26 = vmax.f32 %v2332_v25, 0.0 }
0x14a8   :  { %5268 = vmatprep.mubr.msk.f32.mxu1 %vm2350_vm4, %v2340_v26 }
0x14a9   :  { %5269 = vmatmul.mubr.msk.f32.vlgmr.msra.gmra.mrb[24].mxu1 %vm2350_vm4, %v2341_v27 }
0x14aa   :  { %5289 = vmatprep.mubr.msk.f32.mxu1 %vm5637_vm2, %v5636_v55 }
0x157c   :  { %v5270_v29 = vpop.f32.mrb[24].mxu1 }
0x157d   :  { %v2433_v31 = vadd.f32 %v5270_v29, %v6076_v40  ;;  %v2423_v32 = vpop.f32.mrb[25].mxu1 }
0x157e   :  { %v2432_v33 = vadd.f32 %v2423_v32, %v6064_v16  ;;  %v6217_v32 = vld [vmem:[%s6481_s7 + $0x28] sm:$0xff] }
0x157f   :  { %v6140_v34 = vadd.f32 %v4893_v30, %v2433_v31 }
0x1580   :  { %v6142_v35 = vadd.f32 %v4893_v30, %v2432_v33 }
0x1581   :  { %v2450_v36 = vsel %vm142_vm1, %v6140_v34, 0.0 }
0x1582   :  { %2451 = vadd.xlane.f32.xlu0 %v2450_v36  ;;  %v2447_v37 = vsel %vm142_vm1, %v6142_v35, 0.0 }
0x1583   :  { %2448 = vadd.xlane.f32.xlu1 %v2447_v37 }
0x160f   :  { %v2452_v58 = vpop.xlane.xlu0 %2451 }
0x1610   :  { %v2454_v38 = vmul.f32 0.03125, %v2452_v58  ;;  %v2449_v39 = vpop.xlane.xlu1 %2448 }
0x1611   :  { %v2453_v41 = vmul.f32 0.03125, %v2449_v39 }
0x1612   :  { %v2456_v40 = vsub.f32 %v6140_v34, %v2454_v38 }
0x1613   :  { %v2455_v16 = vsub.f32 %v6142_v35, %v2453_v41 }
0x1614   :  { %v2458_v44 = vmul.f32 %v2456_v40, %v2456_v40 }
0x1615   :  { %v2457_v42 = vmul.f32 %v2455_v16, %v2455_v16 }
0x1616   :  { %v2462_v45 = vsel %vm142_vm1, %v2458_v44, 0.0 }
0x1617   :  { %v2459_v43 = vsel %vm142_vm1, %v2457_v42, 0.0 }
0x1618   :  { %2460 = vadd.xlane.f32.xlu1 %v2459_v43 }
0x161c   :  { %2463 = vadd.xlane.f32.xlu1 %v2462_v45 }
0x16a5   :  { %v2461_v21 = vpop.xlane.xlu1 %2460 }
0x16a6   :  { %v2465_v28 = vmul.f32 0.03125, %v2461_v21 }
0x16a8   :  { %v2467_v52 = vadd.f32 1e-05, %v2465_v28 }
0x16a9   :  { %v2464_v53 = vpop.xlane.xlu1 %2463 }
0x16aa   :  { %5553 = vrsqrt.f32 %v2467_v52  ;;  %v2466_v56 = vmul.f32 0.03125, %v2464_v53 }
0x16ac   :  { %v2468_v57 = vadd.f32 1e-05, %v2466_v56 }
0x16ae   :  { %5555 = vrsqrt.f32 %v2468_v57 }
0x16b4   :  { %v5554_v59 = vpop.eup %5553 }
0x16b5   :  { %v2471_v62 = vmul.f32 %v5554_v59, %v2455_v16  ;;  %v6232_v16 = vld [vmem:[%s6481_s7 + $0x20] sm:$0xff] }
0x16b7   :  { %v2479_v54 = vmul.f32 %v4896_v61, %v2471_v62 }
0x16b8   :  { %v5556_v0 = vpop.eup %5555 }
0x16b9   :  { %v2472_v1 = vmul.f32 %v5556_v0, %v2456_v40  ;;  %v2487_v2 = vadd.f32 %v4897_v63, %v2479_v54 }
0x16bb   :  { %v2480_v3 = vmul.f32 %v4896_v61, %v2472_v1  ;;  %5279 = vmatprep.mubr.msk.f32.mxu0 %vm142_vm1, %v2487_v2 }
0x16bd   :  { %v2488_v4 = vadd.f32 %v4897_v63, %v2480_v3 }
0x16bf   :  { %5280 = vmatmul.mubr.msk.f32.vlgmr.msra.gmra.mrb[28].mxu0 %vm142_vm1, %v2488_v4  ;;  %v6267_v4 = vld [vmem:[%s6481_s7 + $0x30] sm:$0xff] }
0x16c0   :  { %5284 = vmatprep.mubr.msk.f32.mxu0 %vm5637_vm2, %v5636_v55 }
0x1792   :  { %v5281_v6 = vpop.f32.mrb[28].mxu0 }
0x1793   :  { %v6178_v7 = vadd.f32 %v5281_v6, %v4903_v60  ;;  %v2574_v5 = vpop.f32.mrb[29].mxu0 }
0x1794   :  { %v6180_v8 = vadd.f32 %v4903_v60, %v2574_v5 }
0x1796   :  { %2590 = vrot.lane.b32.xlu1 %v6180_v8, %s5639_s10  ;;  %v6185_v9 = vmul.f32 0.35355338, %v6180_v8 }
0x1798   :  { %2754 = vrot.lane.b32.xlu0 %v6185_v9, %s5640_s8 }
0x179a   :  { %2756 = vrot.lane.b32.xlu1 %v6180_v8, %s5638_s26 }
0x1808   :  { %v2591_v10 = vpop.permute.xlu1 %2590 }
0x1809   :  { %5283 = vmatpush3.xpose.msk.msra.mxu0 %vm286_vm3, %v2591_v10 }
0x180a   :  { %5292 = vmatprep.subr.mxu0 %v5636_v55  ;;  %v2755_v12 = vpop.permute.xlu0 %2754 }
0x180c   :  { %v2757_v11 = vpop.permute.xlu1 %2756  ;;  %5285 = vmatmul.mubr.msk.f32.vlgmr.msra.gmra.mrb[30].mxu0 %vm286_vm3, %v6185_v9 }
0x180d   :  { %5293 = vmatpush3.xpose.msk.msra.mxu0 %vm286_vm3, %v2757_v11  ;;  %5294 = vmatprep.mubr.msk.f32.mxu0 %vm5637_vm2, %v5636_v55 }
0x180e   :  { %5302 = vmatprep.subr.mxu0 %v5636_v55 }
0x1810   :  { %5295 = vmatmul.mubr.msk.f32.vlgmr.msra.gmra.mrb[32].mxu0 %vm286_vm3, %v2755_v12 }
0x1811   :  { %5304 = vmatprep.mubr.msk.f32.mxu0 %vm5637_vm2, %v5636_v55  ;;  %5303 = vmatpush3.msra.mxu0 %v6217_v32 }
0x1812   :  { %5312 = vmatprep.subr.mxu0 %v5636_v55 }
0x18df   :  { %v2663_v13 = vpop.f32.mrb[30].mxu0 }
0x18e0   :  { %v5286_v15 = vpop.f32.mrb[31].mxu0  ;;  %v2667_v17 = vsel %vm286_vm3, %v2663_v13, -inf }
0x18e1   :  { %2668 = vmax.xlane.f32.xlu1 %v2667_v17 }
0x18e3   :  { %v2828_v18 = vpop.f32.mrb[32].mxu0 }
0x18e4   :  { %v5296_v19 = vpop.f32.mrb[33].mxu0  ;;  %v2832_v20 = vsel %vm286_vm3, %v2828_v18, -inf }
0x18e5   :  { %2833 = vmax.xlane.f32.xlu0 %v2832_v20 }
0x18fb   :  { %2843 = vrot.lane.b32.xlu0 %v6180_v8, %s5644_s18 }
0x196e   :  { %v2669_v22 = vpop.xlane.xlu1 %2668 }
0x196f   :  { %v2670_v23 = vsub.f32 %v2663_v13, %v2669_v22 }
0x1971   :  { %v2671_v24 = vmul.f32 1.442695, %v2670_v23 }
0x1972   :  { %v2834_v14 = vpop.xlane.xlu0 %2833 }
0x1973   :  { %5557 = vpow2.f32 %v2671_v24  ;;  %v2835_v25 = vsub.f32 %v2828_v18, %v2834_v14  ;;  %v6283_v18 = vmul.f32 0.35355338, %v6178_v7 }
0x1975   :  { %v2836_v26 = vmul.f32 1.442695, %v2835_v25 }
0x1976   :  { %v2844_v39 = vpop.permute.xlu0 %2843 }
0x1977   :  { %5559 = vpow2.f32 %v2836_v26 }
0x197d   :  { %v5558_v27 = vpop.eup %5557 }
0x197e   :  { %v2673_v29 = vsel %vm286_vm3, %v5558_v27, 0.0 }
0x197f   :  { %2674 = vadd.xlane.f32.xlu1 %v2673_v29  ;;  %v6307_v29 = vld [vmem:[%s6481_s7 + $0x38] sm:$0xff] }
0x1981   :  { %v5560_v30 = vpop.eup %5559 }
0x1982   :  { %v2838_v31 = vsel %vm286_vm3, %v5560_v30, 0.0 }
0x1983   :  { %2839 = vadd.xlane.f32.xlu1 %v2838_v31 }
0x1994   :  { %2678 = vrot.lane.b32.xlu1 %v6180_v8, %s5641_s11 }
0x1998   :  { %3067 = vrot.lane.b32.xlu1 %v6180_v8, %s5642_s13 }
0x199c   :  { %3065 = vrot.lane.b32.xlu1 %v6185_v9, %s5643_s30 }
0x1a0c   :  { %v2675_v33 = vpop.xlane.xlu1 %2674 }
0x1a0d   :  { %5561 = vrcp.f32 %v2675_v33 }
0x1a10   :  { %v2840_v36 = vpop.xlane.xlu1 %2839 }
0x1a11   :  { %5563 = vrcp.f32 %v2840_v36 }
0x1a14   :  { %v2679_v37 = vpop.permute.xlu1 %2678 }
0x1a15   :  { %5288 = vmatpush3.msra.mxu1 %v2679_v37 }
0x1a16   :  { %5297 = vmatprep.subr.mxu1 %v5636_v55 }
0x1a17   :  { %v5562_v58 = vpop.eup %5561 }
0x1a18   :  { %v2677_v38 = vmul.f32 %v5562_v58, %v5558_v27  ;;  %v3068_v44 = vpop.permute.xlu1 %3067 }
0x1a1a   :  { %5290 = vmatmul.mubr.msk.f32.vlgmr.msra.gmra.mrb[26].mxu1 %vm286_vm3, %v2677_v38 }
0x1a1b   :  { %v5564_v41 = vpop.eup %5563  ;;  %5298 = vmatpush3.msra.mxu1 %v2844_v39  ;;  %5299 = vmatprep.mubr.msk.f32.mxu1 %vm5637_vm2, %v5636_v55 }
0x1a1c   :  { %v2842_v40 = vmul.f32 %v5564_v41, %v5560_v30  ;;  %5307 = vmatprep.subr.mxu1 %v5636_v55  ;;  %v3066_v47 = vpop.permute.xlu1 %3065 }
0x1a1e   :  { %5300 = vmatmul.mubr.msk.f32.vlgmr.msra.gmra.mrb[28].mxu1 %vm286_vm3, %v2842_v40 }
0x1a1f   :  { %5309 = vmatprep.mubr.msk.f32.mxu1 %vm5637_vm2, %v5636_v55  ;;  %5308 = vmatpush3.msra.mxu1 %v6232_v16 }
0x1a20   :  { %5317 = vmatprep.subr.mxu1 %v5636_v55 }
0x1aed   :  { %v2750_v42 = vpop.f32.mrb[26].mxu1 }
0x1aee   :  { %v5291_v43 = vpop.f32.mrb[27].mxu1  ;;  %5310 = vmatmul.mubr.msk.f32.vlgmr.msra.gmra.mrb[30].mxu1 %vm286_vm3, %v2750_v42 }
0x1aef   :  { %5319 = vmatprep.mubr.msk.f32.mxu1 %vm5637_vm2, %v5636_v55 }
0x1af1   :  { %v2915_v45 = vpop.f32.mrb[28].mxu1 }
0x1af2   :  { %v5301_v46 = vpop.f32.mrb[29].mxu1  ;;  %5305 = vmatmul.mubr.msk.f32.vlgmr.msra.gmra.mrb[34].mxu0 %vm286_vm3, %v2915_v45 }
0x1af3   :  { %5313 = vmatpush3.xpose.msk.msra.mxu0 %vm286_vm3, %v3068_v44  ;;  %5314 = vmatprep.mubr.msk.f32.mxu0 %vm5637_vm2, %v5636_v55 }
0x1af4   :  { %5322 = vmatprep.subr.mxu0 %v5636_v55 }
0x1af6   :  { %5315 = vmatmul.mubr.msk.f32.vlgmr.msra.gmra.mrb[36].mxu0 %vm286_vm3, %v3066_v47 }
0x1af7   :  { %5324 = vmatprep.mubr.msk.f32.mxu0 %vm5637_vm2, %v5636_v55  ;;  %5323 = vmatpush3.msra.mxu0 %v6267_v4 }
0x1af8   :  { %5332 = vmatprep.subr.mxu0 %v5636_v55 }
0x1bc1   :  { %v3061_v48 = vpop.f32.mrb[30].mxu1 }
0x1bc2   :  { %v5311_v49 = vpop.f32.mrb[31].mxu1 }
0x1bc5   :  { %v2988_v50 = vpop.f32.mrb[34].mxu0 }
0x1bc6   :  { %v3062_v51 = vadd.f32 %v3061_v48, %v2988_v50  ;;  %v5306_v21 = vpop.f32.mrb[35].mxu0 }
0x1bc9   :  { %v3139_v28 = vpop.f32.mrb[36].mxu0 }
0x1bca   :  { %v5316_v52 = vpop.f32.mrb[37].mxu0  ;;  %v3143_v53 = vsel %vm286_vm3, %v3139_v28, -inf }
0x1bcb   :  { %3144 = vmax.xlane.f32.xlu1 %v3143_v53 }
0x1bdc   :  { %3154 = vrot.lane.b32.xlu1 %v6180_v8, %s5647_s28 }
0x1be0   :  { %3304 = vrot.lane.b32.xlu1 %v6185_v9, %s5646_s29 }
0x1c58   :  { %v3145_v56 = vpop.xlane.xlu1 %3144 }
0x1c59   :  { %v3146_v57 = vsub.f32 %v3139_v28, %v3145_v56 }
0x1c5b   :  { %v3147_v59 = vmul.f32 1.442695, %v3146_v57 }
0x1c5c   :  { %v3155_v61 = vpop.permute.xlu1 %3154 }
0x1c5d   :  { %5565 = vpow2.f32 %v3147_v59  ;;  %5318 = vmatpush3.msra.mxu1 %v3155_v61 }
0x1c5e   :  { %5327 = vmatprep.subr.mxu1 %v5636_v55 }
0x1c60   :  { %v3305_v3 = vpop.permute.xlu1 %3304 }
0x1c67   :  { %v5566_v62 = vpop.eup %5565 }
0x1c68   :  { %v3149_v63 = vsel %vm286_vm3, %v5566_v62, 0.0 }
0x1c69   :  { %3150 = vadd.xlane.f32.xlu0 %v3149_v63 }
0x1c7f   :  { %3306 = vrot.lane.b32.xlu0 %v6180_v8, %s5645_s27 }
0x1cf6   :  { %v3151_v54 = vpop.xlane.xlu0 %3150 }
0x1cf7   :  { %5567 = vrcp.f32 %v3151_v54 }
0x1cfa   :  { %v3307_v2 = vpop.permute.xlu0 %3306 }
0x1d01   :  { %v5568_v0 = vpop.eup %5567 }
0x1d02   :  { %v3153_v1 = vmul.f32 %v5568_v0, %v5566_v62 }
0x1d04   :  { %5320 = vmatmul.mubr.msk.f32.vlgmr.msra.gmra.mrb[32].mxu1 %vm286_vm3, %v3153_v1 }
0x1d05   :  { %5328 = vmatpush3.xpose.msk.msra.mxu1 %vm286_vm3, %v3307_v2  ;;  %5329 = vmatprep.mubr.msk.f32.mxu1 %vm5637_vm2, %v5636_v55 }
0x1d06   :  { %5337 = vmatprep.subr.mxu1 %v5636_v55 }
0x1d08   :  { %5330 = vmatmul.mubr.msk.f32.vlgmr.msra.gmra.mrb[34].mxu1 %vm286_vm3, %v3305_v3 }
0x1d09   :  { %5339 = vmatprep.mubr.msk.f32.mxu1 %vm5637_vm2, %v5636_v55  ;;  %5338 = vmatpush3.msra.mxu1 %v6307_v29 }
0x1d0a   :  { %5347 = vmatprep.subr.mxu1 %v5636_v55 }
0x1dd7   :  { %v3226_v60 = vpop.f32.mrb[32].mxu1 }
0x1dd8   :  { %v5321_v6 = vpop.f32.mrb[33].mxu1  ;;  %5325 = vmatmul.mubr.msk.f32.vlgmr.msra.gmra.mrb[38].mxu0 %vm286_vm3, %v3226_v60 }
0x1dd9   :  { %5334 = vmatprep.mubr.msk.f32.mxu0 %vm5637_vm2, %v5636_v55 }
0x1ddb   :  { %v3378_v5 = vpop.f32.mrb[34].mxu1 }
0x1ddc   :  { %v5331_v9 = vpop.f32.mrb[35].mxu1  ;;  %v3382_v10 = vsel %vm286_vm3, %v3378_v5, -inf }
0x1ddd   :  { %3383 = vmax.xlane.f32.xlu1 %v3382_v10 }
0x1dee   :  { %3545 = vrot.lane.b32.xlu1 %v6178_v7, %s5639_s10 }
0x1df2   :  { %3711 = vrot.lane.b32.xlu1 %v6178_v7, %s5638_s26 }
0x1e6a   :  { %v3384_v11 = vpop.xlane.xlu1 %3383 }
0x1e6b   :  { %v3385_v12 = vsub.f32 %v3378_v5, %v3384_v11 }
0x1e6d   :  { %v3386_v13 = vmul.f32 1.442695, %v3385_v12 }
0x1e6e   :  { %v3546_v25 = vpop.permute.xlu1 %3545 }
0x1e6f   :  { %5569 = vpow2.f32 %v3386_v13 }
0x1e79   :  { %v5570_v15 = vpop.eup %5569 }
0x1e7a   :  { %v3388_v17 = vsel %vm286_vm3, %v5570_v15, 0.0 }
0x1e7b   :  { %3389 = vadd.xlane.f32.xlu0 %v3388_v17 }
0x1e91   :  { %3393 = vrot.lane.b32.xlu0 %v6180_v8, %s5648_s15  ;;  %v3712_v8 = vpop.permute.xlu1 %3711 }
0x1e95   :  { %3709 = vrot.lane.b32.xlu0 %v6283_v18, %s5640_s8 }
0x1eab   :  { %v3299_v19 = vpop.f32.mrb[38].mxu0 }
0x1eac   :  { %v3303_v20 = vadd.f32 %v3299_v19, %v3062_v51  ;;  %v5326_v22 = vpop.f32.mrb[39].mxu0 }
0x1f08   :  { %v3390_v23 = vpop.xlane.xlu0 %3389 }
0x1f09   :  { %5571 = vrcp.f32 %v3390_v23 }
0x1f0c   :  { %v3394_v24 = vpop.permute.xlu0 %3393 }
0x1f0d   :  { %5333 = vmatpush3.msra.mxu0 %v3394_v24 }
0x1f0e   :  { %5342 = vmatprep.subr.mxu0 %v5636_v55 }
0x1f10   :  { %v3710_v27 = vpop.permute.xlu0 %3709 }
0x1f13   :  { %v5572_v14 = vpop.eup %5571 }
0x1f14   :  { %v3392_v26 = vmul.f32 %v5572_v14, %v5570_v15 }
0x1f16   :  { %5335 = vmatmul.mubr.msk.f32.vlgmr.msra.gmra.mrb[40].mxu0 %vm286_vm3, %v3392_v26 }
0x1f17   :  { %5343 = vmatpush3.xpose.msk.msra.mxu0 %vm286_vm3, %v3546_v25  ;;  %5344 = vmatprep.mubr.msk.f32.mxu0 %vm5637_vm2, %v5636_v55 }
0x1f18   :  { %5352 = vmatprep.subr.mxu0 %v5636_v55 }
0x1f1a   :  { %5345 = vmatmul.mubr.msk.f32.vlgmr.msra.gmra.mrb[42].mxu0 %vm286_vm3, %v6283_v18 }
0x1f1b   :  { %5353 = vmatpush3.xpose.msk.msra.mxu0 %vm286_vm3, %v3712_v8  ;;  %5354 = vmatprep.mubr.msk.f32.mxu0 %vm5637_vm2, %v5636_v55 }
0x1f1c   :  { %5362 = vmatprep.subr.mxu0 %v5636_v55 }
0x1f1e   :  { %5355 = vmatmul.mubr.msk.f32.vlgmr.msra.gmra.mrb[44].mxu0 %vm286_vm3, %v3710_v27 }
0x1f1f   :  { %5363 = vmatpush3.msra.mxu0 %v6217_v32  ;;  %5364 = vmatprep.mubr.msk.f32.mxu0 %vm5637_vm2, %v5636_v55 }
0x1f20   :  { %5372 = vmatprep.subr.mxu0 %v5636_v55 }
0x1fe9   :  { %v3465_v30 = vpop.f32.mrb[40].mxu0 }
0x1fea   :  { %v5336_v31 = vpop.f32.mrb[41].mxu0  ;;  %5340 = vmatmul.mubr.msk.f32.vlgmr.msra.gmra.mrb[36].mxu1 %vm286_vm3, %v3465_v30 }
0x1feb   :  { %5349 = vmatprep.mubr.msk.f32.mxu1 %vm5637_vm2, %v5636_v55 }
0x1fed   :  { %v3618_v32 = vpop.f32.mrb[42].mxu0 }
0x1fee   :  { %v5346_v33 = vpop.f32.mrb[43].mxu0  ;;  %v3622_v36 = vsel %vm286_vm3, %v3618_v32, -inf }
0x1fef   :  { %3623 = vmax.xlane.f32.xlu1 %v3622_v36  ;;  %v4943_v33 = vld [vmem:[%s6515_s24 + $0x1] ss:$0 sm:$0xff] }
0x1ff1   :  { %v3783_v37 = vpop.f32.mrb[44].mxu0 }
0x1ff2   :  { %v5356_v58 = vpop.f32.mrb[45].mxu0  ;;  %v3787_v38 = vsel %vm286_vm3, %v3783_v37, -inf }
0x1ff3   :  { %3788 = vmax.xlane.f32.xlu0 %v3787_v38 }
0x207c   :  { %v3624_v39 = vpop.xlane.xlu1 %3623 }
0x207d   :  { %v3625_v41 = vsub.f32 %v3618_v32, %v3624_v39 }
0x207f   :  { %v3626_v40 = vmul.f32 1.442695, %v3625_v41 }
0x2080   :  { %v3789_v42 = vpop.xlane.xlu0 %3788 }
0x2081   :  { %5573 = vpow2.f32 %v3626_v40  ;;  %v3790_v43 = vsub.f32 %v3783_v37, %v3789_v42 }
0x2083   :  { %v3791_v44 = vmul.f32 1.442695, %v3790_v43 }
0x2085   :  { %5575 = vpow2.f32 %v3791_v44 }
0x208b   :  { %v5574_v45 = vpop.eup %5573 }
0x208c   :  { %v3628_v46 = vsel %vm286_vm3, %v5574_v45, 0.0 }
0x208d   :  { %3629 = vadd.xlane.f32.xlu0 %v3628_v46 }
0x208f   :  { %v5576_v47 = vpop.eup %5575 }
0x2090   :  { %v3793_v48 = vsel %vm286_vm3, %v5576_v47, 0.0 }
0x2091   :  { %3794 = vadd.xlane.f32.xlu1 %v3793_v48 }
0x20a2   :  { %3798 = vrot.lane.b32.xlu1 %v6178_v7, %s5644_s18  ;;  %s6522_s18 = sld [smem:[#allocation18_spill]] }
0x20a3   :  { %3633 = vrot.lane.b32.xlu0 %v6178_v7, %s5641_s11 }
0x20a6   :  { %4022 = vrot.lane.b32.xlu1 %v6178_v7, %s5642_s13 }
0x20a7   :  { %4020 = vrot.lane.b32.xlu0 %v6283_v18, %s5643_s30 }
0x20bd   :  { %v3538_v49 = vpop.f32.mrb[36].mxu1 }
0x20be   :  { %v6326_v50 = vadd.f32 %v3538_v49, %v3303_v20  ;;  %v5341_v51 = vpop.f32.mrb[37].mxu1 }
0x211a   :  { %v3630_v21 = vpop.xlane.xlu0 %3629 }
0x211b   :  { %5577 = vrcp.f32 %v3630_v21 }
0x211e   :  { %v3795_v28 = vpop.xlane.xlu1 %3794  ;;  %v3634_v52 = vpop.permute.xlu0 %3633 }
0x211f   :  { %5579 = vrcp.f32 %v3795_v28  ;;  %5348 = vmatpush3.msra.mxu1 %v3634_v52 }
0x2120   :  { %5357 = vmatprep.subr.mxu1 %v5636_v55 }
0x2122   :  { %v3799_v57 = vpop.permute.xlu1 %3798 }
0x2125   :  { %v5578_v53 = vpop.eup %5577 }
0x2126   :  { %v3632_v56 = vmul.f32 %v5578_v53, %v5574_v45  ;;  %v4023_v0 = vpop.permute.xlu1 %4022 }
0x2128   :  { %5350 = vmatmul.mubr.msk.f32.vlgmr.msra.gmra.mrb[38].mxu1 %vm286_vm3, %v3632_v56 }
0x2129   :  { %v5580_v59 = vpop.eup %5579  ;;  %5358 = vmatpush3.msra.mxu1 %v3799_v57  ;;  %5359 = vmatprep.mubr.msk.f32.mxu1 %vm5637_vm2, %v5636_v55 }
0x212a   :  { %v3797_v61 = vmul.f32 %v5580_v59, %v5576_v47  ;;  %5367 = vmatprep.subr.mxu1 %v5636_v55 }
0x212c   :  { %5360 = vmatmul.mubr.msk.f32.vlgmr.msra.gmra.mrb[40].mxu1 %vm286_vm3, %v3797_v61 }
0x212d   :  { %5368 = vmatpush3.msra.mxu1 %v6232_v16  ;;  %5369 = vmatprep.mubr.msk.f32.mxu1 %vm5637_vm2, %v5636_v55  ;;  %v4021_v16 = vpop.permute.xlu0 %4020 }
0x212e   :  { %5377 = vmatprep.subr.mxu1 %v5636_v55 }
0x21fb   :  { %v3705_v62 = vpop.f32.mrb[38].mxu1 }
0x21fc   :  { %v5351_v63 = vpop.f32.mrb[39].mxu1  ;;  %5370 = vmatmul.mubr.msk.f32.vlgmr.msra.gmra.mrb[42].mxu1 %vm286_vm3, %v3705_v62 }
0x21fd   :  { %5379 = vmatprep.mubr.msk.f32.mxu1 %vm5637_vm2, %v5636_v55 }
0x21ff   :  { %v3870_v54 = vpop.f32.mrb[40].mxu1 }
0x2200   :  { %v5361_v1 = vpop.f32.mrb[41].mxu1  ;;  %5365 = vmatmul.mubr.msk.f32.vlgmr.msra.gmra.mrb[46].mxu0 %vm286_vm3, %v3870_v54 }
0x2201   :  { %5373 = vmatpush3.xpose.msk.msra.mxu0 %vm286_vm3, %v4023_v0  ;;  %5374 = vmatprep.mubr.msk.f32.mxu0 %vm5637_vm2, %v5636_v55  ;;  %v4946_v1 = vld [vmem:[%s6516_s9 + $0x1] ss:$0 sm:$0xff] }
0x2202   :  { %5382 = vmatprep.subr.mxu0 %v5636_v55 }
0x2204   :  { %5375 = vmatmul.mubr.msk.f32.vlgmr.msra.gmra.mrb[48].mxu0 %vm286_vm3, %v4021_v16 }
0x2205   :  { %5383 = vmatpush3.msra.mxu0 %v6267_v4  ;;  %5384 = vmatprep.mubr.msk.f32.mxu0 %vm5637_vm2, %v5636_v55 }
0x2206   :  { %5392 = vmatprep.subr.mxu0 %v5636_v55 }
0x22cf   :  { %v4016_v2 = vpop.f32.mrb[42].mxu1 }
0x22d0   :  { %v5371_v3 = vpop.f32.mrb[43].mxu1 }
0x22d3   :  { %v3943_v60 = vpop.f32.mrb[46].mxu0 }
0x22d4   :  { %v4017_v6 = vadd.f32 %v4016_v2, %v3943_v60  ;;  %v5366_v5 = vpop.f32.mrb[47].mxu0  ;;  %v4947_v2 = vld [vmem:[%s6517_s1 + $0x1] ss:$0 sm:$0xff] }
0x22d5   :  { %v4949_v5 = vld [vmem:[%s6518_s21 + $0x28] sm:$0xff] }
0x22d7   :  { %v4094_v9 = vpop.f32.mrb[48].mxu0 }
0x22d8   :  { %v5376_v10 = vpop.f32.mrb[49].mxu0  ;;  %v4098_v11 = vsel %vm286_vm3, %v4094_v9, -inf }
0x22d9   :  { %4099 = vmax.xlane.f32.xlu1 %v4098_v11  ;;  %v4950_v10 = vld [vmem:[%s6518_s21 + $0x30] sm:$0xff]  ;;  %v4951_v11 = vld [vmem:[%s6518_s21 + $0x38] sm:$0xff] }
0x22ea   :  { %4261 = vrot.lane.b32.xlu1 %v6178_v7, %s5645_s27 }
0x22ee   :  { %4259 = vrot.lane.b32.xlu1 %v6283_v18, %s5646_s29 }
0x2366   :  { %v4100_v4 = vpop.xlane.xlu1 %4099 }
0x2367   :  { %v4101_v12 = vsub.f32 %v4094_v9, %v4100_v4  ;;  %v5476_v4 = vpack.c.bf16 %v4951_v11, %v4950_v10 }
0x2369   :  { %v4102_v13 = vmul.f32 1.442695, %v4101_v12  ;;  %v4956_v12 = vld [vmem:[%s6519_s19 + $0x40] sm:$0xff] }
0x236a   :  { %v4262_v23 = vpop.permute.xlu1 %4261 }
0x236b   :  { %5581 = vpow2.f32 %v4102_v13  ;;  %v4957_v13 = vld [vmem:[%s6519_s19 + $0x48] sm:$0xff] }
0x236e   :  { %v4260_v24 = vpop.permute.xlu1 %4259 }
0x2375   :  { %v5582_v15 = vpop.eup %5581 }
0x2376   :  { %v4104_v17 = vsel %vm286_vm3, %v5582_v15, 0.0 }
0x2377   :  { %4105 = vadd.xlane.f32.xlu0 %v4104_v17  ;;  %v5480_v17 = vpack.c.bf16 %v4957_v13, %v4956_v12 }
0x238d   :  { %4109 = vrot.lane.b32.xlu0 %v6178_v7, %s5647_s28  ;;  %s6523_s28 = sld [smem:[#allocation19_spill]] }
0x2404   :  { %v4106_v19 = vpop.xlane.xlu0 %4105 }
0x2405   :  { %5583 = vrcp.f32 %v4106_v19  ;;  %v4959_v19 = vld [vmem:[%s6519_s19 + $0x58] sm:$0xff] }
0x2408   :  { %v4110_v20 = vpop.permute.xlu0 %4109 }
0x2409   :  { %5378 = vmatpush3.msra.mxu1 %v4110_v20 }
0x240a   :  { %5387 = vmatprep.subr.mxu1 %v5636_v55 }
0x240f   :  { %v5584_v22 = vpop.eup %5583 }
0x2410   :  { %v4108_v18 = vmul.f32 %v5584_v22, %v5582_v15  ;;  %v4958_v15 = vld [vmem:[%s6519_s19 + $0x50] sm:$0xff]  ;;  %v4960_v22 = vld [vmem:[%s6519_s19 + $0x60] sm:$0xff] }
0x2411   :  { %v5484_v20 = vpack.c.bf16 %v4959_v19, %v4958_v15 }
0x2412   :  { %5380 = vmatmul.mubr.msk.f32.vlgmr.msra.gmra.mrb[44].mxu1 %vm286_vm3, %v4108_v18 }
0x2413   :  { %5388 = vmatpush3.xpose.msk.msra.mxu1 %vm286_vm3, %v4262_v23  ;;  %5389 = vmatprep.mubr.msk.f32.mxu1 %vm5637_vm2, %v5636_v55  ;;  %v4961_v23 = vld [vmem:[%s6519_s19 + $0x68] sm:$0xff] }
0x2414   :  { %5397 = vmatprep.subr.mxu1 %v5636_v55  ;;  %v5488_v18 = vpack.c.bf16 %v4961_v23, %v4960_v22 }
0x2416   :  { %5390 = vmatmul.mubr.msk.f32.vlgmr.msra.gmra.mrb[46].mxu1 %vm286_vm3, %v4260_v24 }
0x2417   :  { %5398 = vmatpush3.msra.mxu1 %v6307_v29  ;;  %5399 = vmatprep.mubr.msk.f32.mxu1 %vm5637_vm2, %v5636_v55 }
0x2418   :  { %5481 = vmatprep.subr.bf16.mxu1 %v5480_v17 }
0x24e5   :  { %v4181_v14 = vpop.f32.mrb[44].mxu1 }
0x24e6   :  { %v5381_v25 = vpop.f32.mrb[45].mxu1  ;;  %5385 = vmatmul.mubr.msk.f32.vlgmr.msra.gmra.mrb[50].mxu0 %vm286_vm3, %v4181_v14 }
0x24e7   :  { %5394 = vmatprep.mubr.msk.f32.mxu0 %vm5637_vm2, %v5636_v55  ;;  %v4506_v55 = vadd.f32 %v4943_v33, %v6326_v50 }
0x24e9   :  { %v4333_v26 = vpop.f32.mrb[46].mxu1  ;;  %v6380_v37 = vadd.f32 %v4506_v55, %v6142_v35 }
0x24ea   :  { %v5391_v8 = vpop.f32.mrb[47].mxu1  ;;  %v4337_v27 = vsel %vm286_vm3, %v4333_v26, -inf }
0x24eb   :  { %4338 = vmax.xlane.f32.xlu0 %v4337_v27 }
0x2501   :  { %4348 = vrot.lane.b32.xlu0 %v6178_v7, %s5648_s15  ;;  %v4514_v7 = vsel %vm142_vm1, %v6380_v37, 0.0  ;;  %s5649_s15 = smov [#allocation6]  }
0x2502   :  { %s4805_s24 = sshll.u32 %s5649_s15, 4  ;;  %s4806_s24 = int_to_ptr.vmem [resolvable:$true] %s4805_s24 }
0x2503   :  { %s5609_s9 = scalar_lea.vmem %s4806_s24, 256  ;;  %p5614_p6 = scmp.lt.s32.totalorder %s4806_s24, %s4806_s24 }
0x2504   :  { %p5610_p5 = scmp.ne.s32.totalorder %s4806_s24, %s5609_s9  ;;  %p5615_p7 = scmp.lt.s32.totalorder %s5609_s9, %s5609_s9 }
0x2506   :  { %p5616_p8 = por %p5615_p7, %p5614_p6 }
0x2508   :  { %p5617_p9 = pnand %p5616_p8, %p5610_p5 }
0x2578   :  { %v4339_v30 = vpop.xlane.xlu0 %4338 }
0x2579   :  { %v4340_v29 = vsub.f32 %v4333_v26, %v4339_v30 }
0x257b   :  { %v4341_v31 = vmul.f32 1.442695, %v4340_v29  ;;  %v4962_v29 = vld [vmem:[%s6519_s19 + $0x70] sm:$0xff] }
0x257c   :  { %v4349_v32 = vpop.permute.xlu0 %4348 }
0x257d   :  { %5585 = vpow2.f32 %v4341_v31  ;;  %5393 = vmatpush3.msra.mxu0 %v4349_v32  ;;  %v4963_v31 = vld [vmem:[%s6519_s19 + $0x78] sm:$0xff] }
0x257e   :  { %v5492_v32 = vpack.c.bf16 %v4963_v31, %v4962_v29 }
0x2587   :  { %v5586_v36 = vpop.eup %5585 }
0x2588   :  { %v4343_v58 = vsel %vm286_vm3, %v5586_v36, 0.0 }
0x2589   :  { %4344 = vadd.xlane.f32.xlu1 %v4343_v58 }
0x258d   :  { %4515 = vadd.xlane.f32.xlu1 %v4514_v7 }
0x25b9   :  { %v4254_v38 = vpop.f32.mrb[50].mxu0 }
0x25ba   :  { %v4258_v39 = vadd.f32 %v4254_v38, %v4017_v6  ;;  %v5386_v41 = vpop.f32.mrb[51].mxu0  ;;  %v4948_v6 = vld [vmem:[%s6518_s21 + $0x20] sm:$0xff] }
0x25bb   :  { %v5472_v9 = vpack.c.bf16 %v4949_v5, %v4948_v6 }
0x25bd   :  { %5473 = vmatprep.subr.bf16.mxu0 %v5472_v9 }
0x2616   :  { %v4345_v40 = vpop.xlane.xlu1 %4344 }
0x2617   :  { %5587 = vrcp.f32 %v4345_v40  ;;  %v4967_v40 = vld [vmem:[%s6521_s25 + $0x1] ss:$0 sm:$0xff] }
0x261a   :  { %v4516_v35 = vpop.xlane.xlu1 %4515 }
0x261b   :  { %v4520_v46 = vmul.f32 0.03125, %v4516_v35 }
0x261d   :  { %v4522_v50 = vsub.f32 %v6380_v37, %v4520_v46 }
0x261f   :  { %v4524_v52 = vmul.f32 %v4522_v50, %v4522_v50 }
0x2621   :  { %v5588_v42 = vpop.eup %5587  ;;  %v4526_v53 = vsel %vm142_vm1, %v4524_v52, 0.0 }
0x2622   :  { %v4347_v43 = vmul.f32 %v5588_v42, %v5586_v36 }
0x2624   :  { %5395 = vmatmul.mubr.msk.f32.vlgmr.msra.gmra.mrb[52].mxu0 %vm286_vm3, %v4347_v43 }
0x2625   :  { %5475 = vmatpush3.bf16.msra.mxu0 %v5472_v9 }
0x2626   :  { %5477 = vmatprep.subr.bf16.mxu0 %v5476_v4 }
0x2629   :  { %5479 = vmatpush3.bf16.msra.mxu0 %v5476_v4 }
0x26f7   :  { %v4420_v44 = vpop.f32.mrb[52].mxu0 }
0x26f8   :  { %v5396_v45 = vpop.f32.mrb[53].mxu0  ;;  %5400 = vmatmul.mubr.msk.f32.vlgmr.msra.gmra.mrb[48].mxu1 %vm286_vm3, %v4420_v44 }
0x26f9   :  { %5483 = vmatpush3.bf16.msra.mxu1 %v5480_v17 }
0x26fa   :  { %5485 = vmatprep.subr.bf16.mxu1 %v5484_v20 }
0x26fd   :  { %5487 = vmatpush3.bf16.msra.mxu1 %v5484_v20 }
0x26fe   :  { %5489 = vmatprep.subr.bf16.mxu1 %v5488_v18 }
0x2701   :  { %5491 = vmatpush3.bf16.msra.mxu1 %v5488_v18 }
0x2702   :  { %5493 = vmatprep.subr.bf16.mxu1 %v5492_v32 }
0x2705   :  { %5495 = vmatpush3.bf16.msra.mxu1 %v5492_v32 }
0x27cb   :  { %v4493_v47 = vpop.f32.mrb[48].mxu1 }
0x27cc   :  { %v4497_v48 = vadd.f32 %v4493_v47, %v4258_v39  ;;  %v5401_v49 = vpop.f32.mrb[49].mxu1 }
0x27ce   :  { %v4507_v51 = vadd.f32 %v4943_v33, %v4497_v48  ;;  %v4953_v33 = vld [vmem:[%s6520_s23 + $0x1] ss:$0 sm:$0xff] }
0x27d0   :  { %v6389_v21 = vadd.f32 %v4507_v51, %v6140_v34 }
0x27d2   :  { %v4517_v28 = vsel %vm142_vm1, %v6389_v21, 0.0 }
0x27d3   :  { %4518 = vadd.xlane.f32.xlu1 %v4517_v28 }
0x27d7   :  { %4527 = vadd.xlane.f32.xlu1 %v4526_v53 }
0x2860   :  { %v4519_v56 = vpop.xlane.xlu1 %4518 }
0x2861   :  { %v4521_v57 = vmul.f32 0.03125, %v4519_v56 }
0x2863   :  { %v4523_v59 = vsub.f32 %v6389_v21, %v4521_v57 }
0x2864   :  { %v4528_v61 = vpop.xlane.xlu1 %4527 }
0x2865   :  { %v4532_v62 = vmul.f32 0.03125, %v4528_v61  ;;  %v4525_v63 = vmul.f32 %v4523_v59, %v4523_v59 }
0x2867   :  { %v4534_v54 = vadd.f32 1e-05, %v4532_v62  ;;  %v4529_v0 = vsel %vm142_vm1, %v4525_v63, 0.0 }
0x2868   :  { %4530 = vadd.xlane.f32.xlu1 %v4529_v0 }
0x2869   :  { %5589 = vrsqrt.f32 %v4534_v54 }
0x2873   :  { %v5590_v34 = vpop.eup %5589 }
0x2874   :  { %v4538_v16 = vmul.f32 %v5590_v34, %v4522_v50  ;;  %v4968_v34 = vld [vmem:[%s6522_s18] ss:$0 sm:$0xff] }
0x2876   :  { %v4546_v3 = vmul.f32 %v4946_v1, %v4538_v16  ;;  %v4969_v16 = vld [vmem:[%s6523_s28] ss:$0 sm:$0xff] }
0x2878   :  { %v4554_v60 = vadd.f32 %v4947_v2, %v4546_v3 }
0x287a   :  { %5410 = vmatprep.mubr.msk.f32.mxu0 %vm142_vm1, %v4554_v60 }
0x28f5   :  { %v4531_v24 = vpop.xlane.xlu1 %4530 }
0x28f6   :  { %v4533_v14 = vmul.f32 0.03125, %v4531_v24 }
0x28f8   :  { %v4535_v25 = vadd.f32 1e-05, %v4533_v14 }
0x28fa   :  { %5591 = vrsqrt.f32 %v4535_v25 }
0x2904   :  { %v5592_v26 = vpop.eup %5591 }
0x2905   :  { %v4539_v8 = vmul.f32 %v5592_v26, %v4523_v59 }
0x2907   :  { %v4547_v27 = vmul.f32 %v4946_v1, %v4539_v8 }
0x2909   :  { %v4555_v30 = vadd.f32 %v4947_v2, %v4547_v27 }
0x290b   :  { %5411 = vmatmul.mubr.msk.f32.vlgmr.msra.gmra.mrb[54].mxu0 %vm142_vm1, %v4555_v30 }
0x29de   :  { %v5412_v55 = vpop.f32.mrb[54].mxu0 }
0x29df   :  { %v4647_v36 = vadd.f32 %v5412_v55, %v4953_v33  ;;  %v4641_v58 = vpop.f32.mrb[55].mxu0 }
0x29e0   :  { %v4642_v7 = vadd.f32 %v4953_v33, %v4641_v58 }
0x29e1   :  { %v4651_v39 = vmax.f32 %v4647_v36, 0.0 }
0x29e2   :  { %v4650_v38 = vmax.f32 %v4642_v7, 0.0 }
0x29e4   :  { %5429 = vmatprep.mubr.msk.f32.mxu1 %vm2350_vm4, %v4650_v38 }
0x29e5   :  { %5430 = vmatmul.mubr.msk.f32.vlgmr.msra.gmra.mrb[50].mxu1 %vm2350_vm4, %v4651_v39 }
0x2ab8   :  { %v5431_v41 = vpop.f32.mrb[50].mxu1 }
0x2ab9   :  { %v4743_v42 = vadd.f32 %v5431_v41, %v6389_v21  ;;  %v4733_v43 = vpop.f32.mrb[51].mxu1 }
0x2aba   :  { %v4742_v44 = vadd.f32 %v4733_v43, %v6380_v37 }
0x2abb   :  { %v4753_v45 = vadd.f32 %v4967_v40, %v4743_v42 }
0x2abc   :  { %v4752_v35 = vadd.f32 %v4967_v40, %v4742_v44 }
0x2abd   :  { %v4759_v46 = vsel %vm142_vm1, %v4753_v45, 0.0 }
0x2abe   :  { %4760 = vadd.xlane.f32.xlu1 %v4759_v46  ;;  %v4756_v47 = vsel %vm142_vm1, %v4752_v35, 0.0 }
0x2abf   :  { %4757 = vadd.xlane.f32.xlu0 %v4756_v47 }
0x2b4b   :  { %v4761_v48 = vpop.xlane.xlu1 %4760 }
0x2b4c   :  { %v4763_v49 = vmul.f32 0.03125, %v4761_v48  ;;  %v4758_v50 = vpop.xlane.xlu0 %4757 }
0x2b4d   :  { %v4762_v51 = vmul.f32 0.03125, %v4758_v50 }
0x2b4e   :  { %v4765_v28 = vsub.f32 %v4753_v45, %v4763_v49 }
0x2b4f   :  { %v4764_v52 = vsub.f32 %v4752_v35, %v4762_v51 }
0x2b50   :  { %v4767_v56 = vmul.f32 %v4765_v28, %v4765_v28 }
0x2b51   :  { %v4766_v53 = vmul.f32 %v4764_v52, %v4764_v52 }
0x2b52   :  { %v4771_v37 = vsel %vm142_vm1, %v4767_v56, 0.0 }
0x2b53   :  { %v4768_v21 = vsel %vm142_vm1, %v4766_v53, 0.0 }
0x2b54   :  { %4769 = vadd.xlane.f32.xlu1 %v4768_v21 }
0x2b58   :  { %4772 = vadd.xlane.f32.xlu1 %v4771_v37 }
0x2be1   :  { %v4770_v57 = vpop.xlane.xlu1 %4769 }
0x2be2   :  { %v4774_v59 = vmul.f32 0.03125, %v4770_v57 }
0x2be4   :  { %v4776_v61 = vadd.f32 1e-05, %v4774_v59 }
0x2be5   :  { %v4773_v62 = vpop.xlane.xlu1 %4772 }
0x2be6   :  { %5593 = vrsqrt.f32 %v4776_v61  ;;  %v4775_v63 = vmul.f32 0.03125, %v4773_v62 }
0x2be8   :  { %v4777_v54 = vadd.f32 1e-05, %v4775_v63 }
0x2bea   :  { %5595 = vrsqrt.f32 %v4777_v54 }
0x2bf0   :  { %v5594_v0 = vpop.eup %5593 }
0x2bf1   :  { %v4780_v1 = vmul.f32 %v5594_v0, %v4764_v52 }
0x2bf3   :  { %v4788_v2 = vmul.f32 %v4968_v34, %v4780_v1 }
0x2bf4   :  { %v5596_v3 = vpop.eup %5595 }
0x2bf5   :  { %v4781_v60 = vmul.f32 %v5596_v3, %v4765_v28  ;;  %v4796_v6 = vadd.f32 %v4969_v16, %v4788_v2 }
0x2bf7   :  { %v4789_v5 = vmul.f32 %v4968_v34, %v4781_v60  ;;  %4798 = vst.msk [vmem:[#allocation6] sm:$0xff] %vm142_vm1, %v4796_v6 }
0x2bf9   :  { %v4797_v9 = vadd.f32 %v4969_v16, %v4789_v5 }
0x2bfb   :  { %4799 = vst.msk [vmem:[#allocation6 + $0x8] sm:$0xff] %vm142_vm1, %v4797_v9 }
0x2bfc   :  { %5620 = shalt.err (!%p5617_p9)
}
0x2bfd   :  { %s6524_s20 = sld [smem:[#allocation20_spill]] }
0x2c03   :  { %s5621_s5 = scalar_lea.hbm %s6524_s20, 256 }
0x2c04   :  { %p5622_p10 = scmp.ne.s32.totalorder %s6524_s20, %s5621_s5  ;;  %p5625_p11 = scmp.lt.u32.totalorder %s5621_s5, %s6524_s20 }
0x2c06   :  { %p5627_p12 = pnand %p5625_p11, %p5622_p10 }
0x2c08   :  { %5630 = shalt.err (!%p5627_p12)
}
0x2c09   :  { %s5650_s6 = smov 128   ;;  %s5651_s14 = smov 8  }
0x2c0a   :  { %4811 = dma.vmem_to_hbm [thread:$0]  %s4806_s24, 256, %s6524_s20, [#allocation4], %s5650_s6, %s5650_s6, %s5651_s14  }
0x2c0b   :  { %5633 = dma.done.wait [#allocation4], 256  }
0x2c0c   :  { %5634 = vsyncadd [#allocation4], 4294967040 }
0x2c0d   :  { %4815 = vsyncpa [#allocation4], 1 }
0x2c0e   :  { %4816 = vsyncpa [#allocation5], 1 }

</bundles_post_ra>
